<compile_context>
chip_gen: v5e
topology: v5e:2x2
jax: 0.10.0
libtpu: 0.0.40
codegen_flags: <defaults>
</compile_context>

<pallas_src>
import functools

import jax
import jax.numpy as jnp
import numpy as np
from jax.experimental import pallas as pl
from jax.experimental.pallas import tpu as pltpu


# ----------------------------------------------------------------------------
# Fused kernel: all LSTM layers (both directions) + attention + fc.
# ----------------------------------------------------------------------------
def _fused_lstm_model_kernel(*refs, num_layers, S, Bp, H):
    """Whole model in one grid step; everything resident in VMEM.

    refs layout:
      refs[0]               x_flat (S*Bp, D0) f32, time-major (row = t*Bp + b)
      refs[1 : 1+3L]        per layer: [wih, whh, b]
                            wih: (Din, 8H) bf16   fused gate/direction columns
                            whh: (2H, 8H)  bf16   block-diagonal per direction
                            b  : (1, 8H)   f32    combined b_ih + b_hh
      refs[1+3L : 4+3L]     watt (1,2H) f32, wfc (2H,O) bf16, bfc (1,O) f32
      refs[4+3L]            out (Bp, O) f32
      refs[5+3L]            gx scratch  (S*Bp, 8H) f32  (hoisted x @ W_ih + b)
      refs[6+3L]            act scratch (S*Bp, 2H) f32  (layer activations)
    """
    H2, H8 = 2 * H, 8 * H
    nW = 3 * num_layers
    x_ref = refs[0]
    w_refs = refs[1:1 + nW]
    watt_ref, wfc_ref, bfc_ref = refs[1 + nW:4 + nW]
    out_ref = refs[4 + nW]
    gx_ref = refs[5 + nW]
    act_ref = refs[6 + nW]

    # Column mask over the fused 8H gate layout [i_f,i_b,f_f,f_b,g_f,g_b,o_f,o_b]:
    # True on columns belonging to the FORWARD direction.  Hoisted, computed once.
    col = jax.lax.broadcasted_iota(jnp.int32, (Bp, H8), 1)
    fwd_mask = ((col < H)
                | ((col >= H2) & (col < H2 + H))
                | ((col >= 2 * H2) & (col < 2 * H2 + H))
                | ((col >= 3 * H2) & (col < 3 * H2 + H)))

    for l in range(num_layers):
        wih = w_refs[3 * l + 0][...]          # (Din, 8H) bf16
        whh = w_refs[3 * l + 1][...]          # (2H, 8H)  bf16 (block-diagonal)
        b = w_refs[3 * l + 2][...]            # (1, 8H)   f32

        # Hoisted input-to-hidden matmul for ALL timesteps and BOTH directions:
        # one (S*Bp, Din) x (Din, 8H) MXU matmul, f32 accumulation, bias folded.
        src_bf = (x_ref[...] if l == 0 else act_ref[...]).astype(jnp.bfloat16)
        gx_ref[...] = jnp.dot(src_bf, wih,
                              preferred_element_type=jnp.float32) + b
        # TODO(synk): at realistic sizes store gx/act in bf16 (re-add bias in f32
        # at use) to halve the largest temporaries (v7x 64 MiB VMEM).

        # Recurrence: ONE MXU push + ONE fused cell per step for both directions.
        # State layout: h = [h_f | h_b], c = [c_f | c_b], each (Bp, 2H) f32.
        h = jnp.zeros((Bp, H2), jnp.float32)
        c = jnp.zeros((Bp, H2), jnp.float32)
        # TODO(synk): for long sequences switch to lax.fori_loop(unroll=2..4)
        # with h/c in small VMEM scratch refs to bound unrolled code size.
        for t in range(S):
            tb = S - 1 - t
            # Forward columns read input time t, backward columns time S-1-t.
            gx_t = jnp.where(fwd_mask,
                             gx_ref[t * Bp:(t + 1) * Bp, :],
                             gx_ref[tb * Bp:(tb + 1) * Bp, :])     # (Bp, 8H)
            gates = gx_t + jnp.dot(h.astype(jnp.bfloat16), whh,
                                   preferred_element_type=jnp.float32)
            i = jax.nn.sigmoid(gates[:, 0:H2])            # [i_f | i_b]
            f = jax.nn.sigmoid(gates[:, H2:2 * H2])       # [f_f | f_b]
            g = jnp.tanh(gates[:, 2 * H2:3 * H2])         # [g_f | g_b]
            o = jax.nn.sigmoid(gates[:, 3 * H2:4 * H2])   # [o_f | o_b]
            c = f * c + i * g
            h = o * jnp.tanh(c)
            act_ref[t * Bp:(t + 1) * Bp, 0:H] = h[:, 0:H]        # forward @ t
            act_ref[tb * Bp:(tb + 1) * Bp, H:H2] = h[:, H:H2]    # backward @ tb

    # ---- attention (softmax over time per batch row) + final fc -------------
    act = act_ref[...]                                      # (S*Bp, 2H) f32
    watt = watt_ref[...]                                    # (1, 2H)    f32
    scores = jnp.sum(act * watt, axis=-1, keepdims=True)    # (S*Bp, 1)  VPU+XLU
    # TODO(synk): for large S restructure to a (Bp, S) lane layout with a single
    # lane-axis max/exp/sum instead of this unrolled (but tile-aligned) loop.
    m = scores[0:Bp, :]
    for t in range(1, S):
        m = jnp.maximum(m, scores[t * Bp:(t + 1) * Bp, :])
    den = jnp.zeros((Bp, 1), jnp.float32)
    num = jnp.zeros((Bp, H2), jnp.float32)
    for t in range(S):
        e = jnp.exp(scores[t * Bp:(t + 1) * Bp, :] - m)
        den = den + e
        num = num + e * act[t * Bp:(t + 1) * Bp, :]
    ctx = num / den                                         # (Bp, 2H)
    # TODO(synk): dropout on the context vector omitted (eval mode => identity).
    out_ref[...] = (jnp.dot(ctx.astype(jnp.bfloat16), wfc_ref[...],
                            preferred_element_type=jnp.float32) + bfc_ref[...])


# ----------------------------------------------------------------------------
# Parameter handling
# ----------------------------------------------------------------------------
def init_params(key, input_size, hidden_size, num_layers, output_size):
    """PyTorch-layout f32 parameters."""
    H = hidden_size
    k = 1.0 / np.sqrt(H)
    params = {"lstm": {}}
    for l in range(num_layers):
        in_dim = input_size if l == 0 else 2 * hidden_size
        for d in range(2):
            key, k1, k2, k3, k4 = jax.random.split(key, 5)
            params["lstm"][(l, d)] = (
                jax.random.uniform(k1, (4 * H, in_dim), jnp.float32, -k, k),  # w_ih
                jax.random.uniform(k2, (4 * H, H), jnp.float32, -k, k),       # w_hh
                jax.random.uniform(k3, (4 * H,), jnp.float32, -k, k),         # b_ih
                jax.random.uniform(k4, (4 * H,), jnp.float32, -k, k),         # b_hh
            )
    key, k1, k2, k3 = jax.random.split(key, 4)
    params["w_att"] = jax.random.uniform(k1, (1, 2 * H), jnp.float32, -k, k)
    kf = 1.0 / np.sqrt(2 * H)
    params["w_fc"] = jax.random.uniform(k2, (output_size, 2 * H), jnp.float32, -kf, kf)
    params["b_fc"] = jax.random.uniform(k3, (output_size,), jnp.float32, -kf, kf)
    return params


def prepare_params(params, num_layers, hidden_size):
    """One-time conversion to kernel format.

    Per layer, both directions are fused:
      wih (Din, 8H) bf16, columns [i_f,i_b,f_f,f_b,g_f,g_b,o_f,o_b]
      whh (2H, 8H)  bf16, block-diagonal: rows 0:H (h_f) feed forward columns,
                                           rows H:2H (h_b) feed backward columns
      b   (1, 8H)   f32, combined b_ih + b_hh in the same column layout
    """
    H = hidden_size
    layer_w = []
    for l in range(num_layers):
        w_ih_f, w_hh_f, b_ih_f, b_hh_f = params["lstm"][(l, 0)]
        w_ih_b, w_hh_b, b_ih_b, b_hh_b = params["lstm"][(l, 1)]
        wih_fT = jnp.transpose(w_ih_f)   # (Din, 4H), gate order [i,f,g,o]
        wih_bT = jnp.transpose(w_ih_b)
        whh_fT = jnp.transpose(w_hh_f)   # (H, 4H)
        whh_bT = jnp.transpose(w_hh_b)
        bf = b_ih_f + b_hh_f
        bb = b_ih_b + b_hh_b

        wih_cols, b_cols = [], []
        whh_comb = jnp.zeros((2 * H, 8 * H), jnp.float32)
        for g in range(4):
            wih_cols.append(wih_fT[:, g * H:(g + 1) * H])
            wih_cols.append(wih_bT[:, g * H:(g + 1) * H])
            b_cols.append(bf[g * H:(g + 1) * H])
            b_cols.append(bb[g * H:(g + 1) * H])
            whh_comb = whh_comb.at[0:H, 2 * g * H:(2 * g + 1) * H].set(
                whh_fT[:, g * H:(g + 1) * H])
            whh_comb = whh_comb.at[H:2 * H, (2 * g + 1) * H:(2 * g + 2) * H].set(
                whh_bT[:, g * H:(g + 1) * H])
        layer_w.append(jnp.concatenate(wih_cols, axis=1).astype(jnp.bfloat16))
        layer_w.append(whh_comb.astype(jnp.bfloat16))
        layer_w.append(jnp.concatenate(b_cols)[None, :].astype(jnp.float32))
    return {
        "layer_w": layer_w,
        "w_att": params["w_att"].astype(jnp.float32),                 # (1, 2H)
        "w_fc": jnp.transpose(params["w_fc"]).astype(jnp.bfloat16),   # (2H, O)
        "b_fc": params["b_fc"][None, :].astype(jnp.float32),          # (1, O)
    }


# ----------------------------------------------------------------------------
# Forward wrapper: one pallas_call for the whole model.
# ----------------------------------------------------------------------------
def lstm_model_forward(x, prep, *, hidden_size, num_layers):
    """x: (B, S, input_size) f32 -> (B, output_size) f32."""
    B, S, D = x.shape
    H = hidden_size
    O = prep["b_fc"].shape[-1]
    Bp = ((B + 7) // 8) * 8            # pad batch to the f32 sublane tile

    # Time-major, batch-padded, flattened: row = t*Bp + b.  Padded rows carry
    # zeros -> all math stays finite; they are sliced off at the end.
    xt = jnp.transpose(x, (1, 0, 2))
    if Bp != B:
        xt = jnp.pad(xt, ((0, 0), (0, Bp - B), (0, 0)))
    x_flat = xt.reshape(S * Bp, D)

    inputs = ([x_flat] + list(prep["layer_w"])
              + [prep["w_att"], prep["w_fc"], prep["b_fc"]])

    def _full_spec(a):
        nd = a.ndim
        return pl.BlockSpec(a.shape, lambda i, _nd=nd: (0,) * _nd)

    # VMEM budget: double-buffered inputs/output + scratch + generous headroom.
    scratch_bytes = S * Bp * 8 * H * 4 + S * Bp * 2 * H * 4
    io_bytes = sum(a.size * a.dtype.itemsize for a in inputs) + Bp * O * 4
    vmem_limit = int(min(2 * io_bytes + scratch_bytes + (8 << 20), 100 << 20))
    # TODO(synk): at realistic sizes single-buffer / stream per-layer weights
    # (pipeline_mode=pl.Buffered(1) or manual make_async_copy prefetch) and, on
    # v7x, split the two directions across the second TensorCore.

    kernel = functools.partial(_fused_lstm_model_kernel,
                               num_layers=num_layers, S=S, Bp=Bp, H=H)

    out = pl.pallas_call(
        kernel,
        out_shape=jax.ShapeDtypeStruct((Bp, O), jnp.float32),
        grid_spec=pltpu.PrefetchScalarGridSpec(
            num_scalar_prefetch=0,
            grid=(1,),
            in_specs=[_full_spec(a) for a in inputs],
            out_specs=pl.BlockSpec((Bp, O), lambda i: (0, 0)),
            scratch_shapes=[pltpu.VMEM((S * Bp, 8 * H), jnp.float32),  # gx
                            pltpu.VMEM((S * Bp, 2 * H), jnp.float32)], # act
        ),
        compiler_params=pltpu.CompilerParams(
            dimension_semantics=("arbitrary",),
            vmem_limit_bytes=vmem_limit),
    )(*inputs)
    return out[:B]


# ----------------------------------------------------------------------------
# Pure-JAX f32 reference (matches PyTorch LSTMModel.forward in eval mode)
# ----------------------------------------------------------------------------
def ref_forward(x, params, hidden_size, num_layers):
    B, S, _ = x.shape
    H = hidden_size
    layer_in = x
    for l in range(num_layers):
        outs = []
        for d in range(2):
            w_ih, w_hh, b_ih, b_hh = params["lstm"][(l, d)]
            seq = layer_in if d == 0 else layer_in[:, ::-1, :]
            h = jnp.zeros((B, H), jnp.float32)
            c = jnp.zeros((B, H), jnp.float32)
            hs = []
            for t in range(S):
                g = seq[:, t, :] @ w_ih.T + h @ w_hh.T + b_ih + b_hh
                i = jax.nn.sigmoid(g[:, :H])
                f = jax.nn.sigmoid(g[:, H:2 * H])
                gg = jnp.tanh(g[:, 2 * H:3 * H])
                o = jax.nn.sigmoid(g[:, 3 * H:4 * H])
                c = f * c + i * gg
                h = o * jnp.tanh(c)
                hs.append(h)
            hseq = jnp.stack(hs, axis=1)
            if d == 1:
                hseq = hseq[:, ::-1, :]
            outs.append(hseq)
        layer_in = jnp.concatenate(outs, axis=-1)
    att = layer_in @ params["w_att"].T              # (B, S, 1)
    w = jax.nn.softmax(att, axis=1)
    ctx = jnp.sum(w * layer_in, axis=1)             # (B, 2H)
    return ctx @ params["w_fc"].T + params["b_fc"]


if __name__ == "__main__":
    input_size = 8
    hidden_size = 32
    num_layers = 2
    output_size = 4
    batch = 2
    seq = 8

    key = jax.random.PRNGKey(0)
    key, pkey, xkey = jax.random.split(key, 3)
    params = init_params(pkey, input_size, hidden_size, num_layers, output_size)
    prep = prepare_params(params, num_layers, hidden_size)
    x = jax.random.normal(xkey, (batch, seq, input_size), jnp.float32)

    fwd = jax.jit(functools.partial(
        lstm_model_forward, hidden_size=hidden_size, num_layers=num_layers))
    out = fwd(x, prep)
    out = jax.block_until_ready(out)

    ref = ref_forward(x, params, hidden_size, num_layers)
    assert out.shape == (batch, output_size)
    # bf16 MXU operands with f32 accumulation => compare against the f32
    # reference with a slightly loosened tolerance.
    np.testing.assert_allclose(np.asarray(out), np.asarray(ref),
                               rtol=2e-2, atol=2e-2)
    print("KERNEL_OK")
</pallas_src>

<mosaic_0001>
module attributes {stable_mosaic.version = 11 : i64} {
  func.func @_fused_lstm_model_kernel(%arg0: i32, %arg1: memref<64x8xf32, #tpu.memory_space<vmem>>, %arg2: memref<8x256xbf16, #tpu.memory_space<vmem>>, %arg3: memref<64x256xbf16, #tpu.memory_space<vmem>>, %arg4: memref<1x256xf32, #tpu.memory_space<vmem>>, %arg5: memref<64x256xbf16, #tpu.memory_space<vmem>>, %arg6: memref<64x256xbf16, #tpu.memory_space<vmem>>, %arg7: memref<1x256xf32, #tpu.memory_space<vmem>>, %arg8: memref<1x64xf32, #tpu.memory_space<vmem>>, %arg9: memref<64x4xbf16, #tpu.memory_space<vmem>>, %arg10: memref<1x4xf32, #tpu.memory_space<vmem>>, %arg11: memref<8x4xf32, #tpu.memory_space<vmem>>, %arg12: memref<64x256xf32, #tpu.memory_space<vmem>>, %arg13: memref<64x64xf32, #tpu.memory_space<vmem>>) attributes {dimension_semantics = [#tpu.dimension_semantics<arbitrary>], iteration_bounds = array<i64: 1>, scalar_prefetch = 0 : i64, scratch_operands = 2 : i64, tpu.core_type = #tpu.core_type<tc>, window_params = [{pipeline_mode = #tpu.pipeline_mode<synchronous>, transform_indices = @transform_0, window_bounds = array<i64: 64, 8>}, {pipeline_mode = #tpu.pipeline_mode<synchronous>, transform_indices = @transform_1, window_bounds = array<i64: 8, 256>}, {pipeline_mode = #tpu.pipeline_mode<synchronous>, transform_indices = @transform_2, window_bounds = array<i64: 64, 256>}, {pipeline_mode = #tpu.pipeline_mode<synchronous>, transform_indices = @transform_3, window_bounds = array<i64: 1, 256>}, {pipeline_mode = #tpu.pipeline_mode<synchronous>, transform_indices = @transform_4, window_bounds = array<i64: 64, 256>}, {pipeline_mode = #tpu.pipeline_mode<synchronous>, transform_indices = @transform_5, window_bounds = array<i64: 64, 256>}, {pipeline_mode = #tpu.pipeline_mode<synchronous>, transform_indices = @transform_6, window_bounds = array<i64: 1, 256>}, {pipeline_mode = #tpu.pipeline_mode<synchronous>, transform_indices = @transform_7, window_bounds = array<i64: 1, 64>}, {pipeline_mode = #tpu.pipeline_mode<synchronous>, transform_indices = @transform_8, window_bounds = array<i64: 64, 4>}, {pipeline_mode = #tpu.pipeline_mode<synchronous>, transform_indices = @transform_9, window_bounds = array<i64: 1, 4>}, {pipeline_mode = #tpu.pipeline_mode<synchronous>, transform_indices = @transform_10, window_bounds = array<i64: 8, 4>}]} {
    %0 = tpu.iota {dimensions = array<i32: 1>} : vector<8x256xi32>
    %c32_i32 = arith.constant 32 : i32
    %1 = vector.broadcast %c32_i32 : i32 to vector<8x256xi32>
    %2 = arith.cmpi slt, %0, %1 : vector<8x256xi32>
    %c64_i32 = arith.constant 64 : i32
    %3 = vector.broadcast %c64_i32 : i32 to vector<8x256xi32>
    %4 = arith.cmpi sge, %0, %3 : vector<8x256xi32>
    %c96_i32 = arith.constant 96 : i32
    %5 = vector.broadcast %c96_i32 : i32 to vector<8x256xi32>
    %6 = arith.cmpi slt, %0, %5 : vector<8x256xi32>
    %7 = arith.andi %4, %6 : vector<8x256xi1>
    %8 = arith.ori %2, %7 : vector<8x256xi1>
    %c128_i32 = arith.constant 128 : i32
    %9 = vector.broadcast %c128_i32 : i32 to vector<8x256xi32>
    %10 = arith.cmpi sge, %0, %9 : vector<8x256xi32>
    %c160_i32 = arith.constant 160 : i32
    %11 = vector.broadcast %c160_i32 : i32 to vector<8x256xi32>
    %12 = arith.cmpi slt, %0, %11 : vector<8x256xi32>
    %13 = arith.andi %10, %12 : vector<8x256xi1>
    %14 = arith.ori %8, %13 : vector<8x256xi1>
    %c192_i32 = arith.constant 192 : i32
    %15 = vector.broadcast %c192_i32 : i32 to vector<8x256xi32>
    %16 = arith.cmpi sge, %0, %15 : vector<8x256xi32>
    %c224_i32 = arith.constant 224 : i32
    %17 = vector.broadcast %c224_i32 : i32 to vector<8x256xi32>
    %18 = arith.cmpi slt, %0, %17 : vector<8x256xi32>
    %19 = arith.andi %16, %18 : vector<8x256xi1>
    %20 = arith.ori %14, %19 : vector<8x256xi1>
    %c0 = arith.constant 0 : index
    %c0_0 = arith.constant 0 : index
    %21 = vector.load %arg2[%c0, %c0_0] : memref<8x256xbf16, #tpu.memory_space<vmem>>, vector<8x256xbf16>
    %c0_1 = arith.constant 0 : index
    %c0_2 = arith.constant 0 : index
    %22 = vector.load %arg3[%c0_1, %c0_2] : memref<64x256xbf16, #tpu.memory_space<vmem>>, vector<64x256xbf16>
    %c0_3 = arith.constant 0 : index
    %c0_4 = arith.constant 0 : index
    %23 = vector.load %arg4[%c0_3, %c0_4] : memref<1x256xf32, #tpu.memory_space<vmem>>, vector<1x256xf32>
    %c0_5 = arith.constant 0 : index
    %c0_6 = arith.constant 0 : index
    %24 = vector.load %arg1[%c0_5, %c0_6] : memref<64x8xf32, #tpu.memory_space<vmem>>, vector<64x8xf32>
    %25 = arith.truncf %24 : vector<64x8xf32> to vector<64x8xbf16>
    %cst = arith.constant dense<0.000000e+00> : vector<64x256xf32>
    %26 = tpu.matmul %25, %21, %cst {dimension_numbers = #tpu.dot_dimension_numbers<[1], [0], [0], [1], [0, 0, 1, 1], [], []>} : vector<64x8xbf16>, vector<8x256xbf16>, vector<64x256xf32> -> vector<64x256xf32>
    %27 = vector.broadcast %23 : vector<1x256xf32> to vector<64x256xf32>
    %28 = arith.addf %26, %27 : vector<64x256xf32>
    %c0_7 = arith.constant 0 : index
    %c0_8 = arith.constant 0 : index
    %29 = vector.load %arg12[%c0_7, %c0_8] : memref<64x256xf32, #tpu.memory_space<vmem>>, vector<64x256xf32>
    tpu.vector_store %arg12[%c0_7, %c0_8], %28 {strides = array<i32>} : memref<64x256xf32, #tpu.memory_space<vmem>>, vector<64x256xf32>,
    %cst_9 = arith.constant 0.000000e+00 : f32
    %30 = vector.broadcast %cst_9 : f32 to vector<8x64xf32>
    %cst_10 = arith.constant 0.000000e+00 : f32
    %31 = vector.broadcast %cst_10 : f32 to vector<8x64xf32>
    %c0_11 = arith.constant 0 : index
    %c0_12 = arith.constant 0 : index
    %32 = vector.load %arg12[%c0_11, %c0_12] : memref<64x256xf32, #tpu.memory_space<vmem>>, vector<8x256xf32>
    %c56 = arith.constant 56 : index
    %c0_13 = arith.constant 0 : index
    %33 = vector.load %arg12[%c56, %c0_13] : memref<64x256xf32, #tpu.memory_space<vmem>>, vector<8x256xf32>
    %34 = arith.select %20, %32, %33 : vector<8x256xi1>, vector<8x256xf32>
    %35 = arith.truncf %30 : vector<8x64xf32> to vector<8x64xbf16>
    %cst_14 = arith.constant dense<0.000000e+00> : vector<8x256xf32>
    %36 = tpu.matmul %35, %22, %cst_14 {dimension_numbers = #tpu.dot_dimension_numbers<[1], [0], [0], [1], [0, 0, 1, 1], [], []>} : vector<8x64xbf16>, vector<64x256xbf16>, vector<8x256xf32> -> vector<8x256xf32>
    %37 = arith.addf %34, %36 : vector<8x256xf32>
    %38 = vector.extract_strided_slice %37 {offsets = [0, 0], sizes = [8, 64], strides = [1, 1]} : vector<8x256xf32> to vector<8x64xf32>
    %39 = arith.negf %38 : vector<8x64xf32>
    %40 = math.exp %39 : vector<8x64xf32>
    %cst_15 = arith.constant 1.000000e+00 : f32
    %41 = vector.broadcast %cst_15 : f32 to vector<8x64xf32>
    %42 = arith.addf %41, %40 : vector<8x64xf32>
    %43 = arith.divf %41, %42 : vector<8x64xf32>
    %44 = vector.extract_strided_slice %37 {offsets = [0, 64], sizes = [8, 64], strides = [1, 1]} : vector<8x256xf32> to vector<8x64xf32>
    %45 = arith.negf %44 : vector<8x64xf32>
    %46 = math.exp %45 : vector<8x64xf32>
    %cst_16 = arith.constant 1.000000e+00 : f32
    %47 = vector.broadcast %cst_16 : f32 to vector<8x64xf32>
    %48 = arith.addf %47, %46 : vector<8x64xf32>
    %49 = arith.divf %47, %48 : vector<8x64xf32>
    %50 = vector.extract_strided_slice %37 {offsets = [0, 128], sizes = [8, 64], strides = [1, 1]} : vector<8x256xf32> to vector<8x64xf32>
    %51 = math.tanh %50 : vector<8x64xf32>
    %52 = vector.extract_strided_slice %37 {offsets = [0, 192], sizes = [8, 64], strides = [1, 1]} : vector<8x256xf32> to vector<8x64xf32>
    %53 = arith.negf %52 : vector<8x64xf32>
    %54 = math.exp %53 : vector<8x64xf32>
    %cst_17 = arith.constant 1.000000e+00 : f32
    %55 = vector.broadcast %cst_17 : f32 to vector<8x64xf32>
    %56 = arith.addf %55, %54 : vector<8x64xf32>
    %57 = arith.divf %55, %56 : vector<8x64xf32>
    %58 = arith.mulf %49, %31 : vector<8x64xf32>
    %59 = arith.mulf %43, %51 : vector<8x64xf32>
    %60 = arith.addf %58, %59 : vector<8x64xf32>
    %61 = math.tanh %60 : vector<8x64xf32>
    %62 = arith.mulf %57, %61 : vector<8x64xf32>
    %63 = vector.extract_strided_slice %62 {offsets = [0, 0], sizes = [8, 32], strides = [1, 1]} : vector<8x64xf32> to vector<8x32xf32>
    %c0_18 = arith.constant 0 : index
    %c0_19 = arith.constant 0 : index
    %64 = vector.load %arg13[%c0_18, %c0_19] : memref<64x64xf32, #tpu.memory_space<vmem>>, vector<8x32xf32>
    tpu.vector_store %arg13[%c0_18, %c0_19], %63 {strides = array<i32>} : memref<64x64xf32, #tpu.memory_space<vmem>>, vector<8x32xf32>,
    %65 = vector.extract_strided_slice %62 {offsets = [0, 32], sizes = [8, 32], strides = [1, 1]} : vector<8x64xf32> to vector<8x32xf32>
    %c56_20 = arith.constant 56 : index
    %c32 = arith.constant 32 : index
    %66 = vector.load %arg13[%c56_20, %c32] : memref<64x64xf32, #tpu.memory_space<vmem>>, vector<8x32xf32>
    tpu.vector_store %arg13[%c56_20, %c32], %65 {strides = array<i32>} : memref<64x64xf32, #tpu.memory_space<vmem>>, vector<8x32xf32>,
    %c8 = arith.constant 8 : index
    %c0_21 = arith.constant 0 : index
    %67 = vector.load %arg12[%c8, %c0_21] : memref<64x256xf32, #tpu.memory_space<vmem>>, vector<8x256xf32>
    %c48 = arith.constant 48 : index
    %c0_22 = arith.constant 0 : index
    %68 = vector.load %arg12[%c48, %c0_22] : memref<64x256xf32, #tpu.memory_space<vmem>>, vector<8x256xf32>
    %69 = arith.select %20, %67, %68 : vector<8x256xi1>, vector<8x256xf32>
    %70 = arith.truncf %62 : vector<8x64xf32> to vector<8x64xbf16>
    %cst_23 = arith.constant dense<0.000000e+00> : vector<8x256xf32>
    %71 = tpu.matmul %70, %22, %cst_23 {dimension_numbers = #tpu.dot_dimension_numbers<[1], [0], [0], [1], [0, 0, 1, 1], [], []>} : vector<8x64xbf16>, vector<64x256xbf16>, vector<8x256xf32> -> vector<8x256xf32>
    %72 = arith.addf %69, %71 : vector<8x256xf32>
    %73 = vector.extract_strided_slice %72 {offsets = [0, 0], sizes = [8, 64], strides = [1, 1]} : vector<8x256xf32> to vector<8x64xf32>
    %74 = arith.negf %73 : vector<8x64xf32>
    %75 = math.exp %74 : vector<8x64xf32>
    %cst_24 = arith.constant 1.000000e+00 : f32
    %76 = vector.broadcast %cst_24 : f32 to vector<8x64xf32>
    %77 = arith.addf %76, %75 : vector<8x64xf32>
    %78 = arith.divf %76, %77 : vector<8x64xf32>
    %79 = vector.extract_strided_slice %72 {offsets = [0, 64], sizes = [8, 64], strides = [1, 1]} : vector<8x256xf32> to vector<8x64xf32>
    %80 = arith.negf %79 : vector<8x64xf32>
    %81 = math.exp %80 : vector<8x64xf32>
    %cst_25 = arith.constant 1.000000e+00 : f32
    %82 = vector.broadcast %cst_25 : f32 to vector<8x64xf32>
    %83 = arith.addf %82, %81 : vector<8x64xf32>
    %84 = arith.divf %82, %83 : vector<8x64xf32>
    %85 = vector.extract_strided_slice %72 {offsets = [0, 128], sizes = [8, 64], strides = [1, 1]} : vector<8x256xf32> to vector<8x64xf32>
    %86 = math.tanh %85 : vector<8x64xf32>
    %87 = vector.extract_strided_slice %72 {offsets = [0, 192], sizes = [8, 64], strides = [1, 1]} : vector<8x256xf32> to vector<8x64xf32>
    %88 = arith.negf %87 : vector<8x64xf32>
    %89 = math.exp %88 : vector<8x64xf32>
    %cst_26 = arith.constant 1.000000e+00 : f32
    %90 = vector.broadcast %cst_26 : f32 to vector<8x64xf32>
    %91 = arith.addf %90, %89 : vector<8x64xf32>
    %92 = arith.divf %90, %91 : vector<8x64xf32>
    %93 = arith.mulf %84, %60 : vector<8x64xf32>
    %94 = arith.mulf %78, %86 : vector<8x64xf32>
    %95 = arith.addf %93, %94 : vector<8x64xf32>
    %96 = math.tanh %95 : vector<8x64xf32>
    %97 = arith.mulf %92, %96 : vector<8x64xf32>
    %98 = vector.extract_strided_slice %97 {offsets = [0, 0], sizes = [8, 32], strides = [1, 1]} : vector<8x64xf32> to vector<8x32xf32>
    %c8_27 = arith.constant 8 : index
    %c0_28 = arith.constant 0 : index
    %99 = vector.load %arg13[%c8_27, %c0_28] : memref<64x64xf32, #tpu.memory_space<vmem>>, vector<8x32xf32>
    tpu.vector_store %arg13[%c8_27, %c0_28], %98 {strides = array<i32>} : memref<64x64xf32, #tpu.memory_space<vmem>>, vector<8x32xf32>,
    %100 = vector.extract_strided_slice %97 {offsets = [0, 32], sizes = [8, 32], strides = [1, 1]} : vector<8x64xf32> to vector<8x32xf32>
    %c48_29 = arith.constant 48 : index
    %c32_30 = arith.constant 32 : index
    %101 = vector.load %arg13[%c48_29, %c32_30] : memref<64x64xf32, #tpu.memory_space<vmem>>, vector<8x32xf32>
    tpu.vector_store %arg13[%c48_29, %c32_30], %100 {strides = array<i32>} : memref<64x64xf32, #tpu.memory_space<vmem>>, vector<8x32xf32>,
    %c16 = arith.constant 16 : index
    %c0_31 = arith.constant 0 : index
    %102 = vector.load %arg12[%c16, %c0_31] : memref<64x256xf32, #tpu.memory_space<vmem>>, vector<8x256xf32>
    %c40 = arith.constant 40 : index
    %c0_32 = arith.constant 0 : index
    %103 = vector.load %arg12[%c40, %c0_32] : memref<64x256xf32, #tpu.memory_space<vmem>>, vector<8x256xf32>
    %104 = arith.select %20, %102, %103 : vector<8x256xi1>, vector<8x256xf32>
    %105 = arith.truncf %97 : vector<8x64xf32> to vector<8x64xbf16>
    %cst_33 = arith.constant dense<0.000000e+00> : vector<8x256xf32>
    %106 = tpu.matmul %105, %22, %cst_33 {dimension_numbers = #tpu.dot_dimension_numbers<[1], [0], [0], [1], [0, 0, 1, 1], [], []>} : vector<8x64xbf16>, vector<64x256xbf16>, vector<8x256xf32> -> vector<8x256xf32>
    %107 = arith.addf %104, %106 : vector<8x256xf32>
    %108 = vector.extract_strided_slice %107 {offsets = [0, 0], sizes = [8, 64], strides = [1, 1]} : vector<8x256xf32> to vector<8x64xf32>
    %109 = arith.negf %108 : vector<8x64xf32>
    %110 = math.exp %109 : vector<8x64xf32>
    %cst_34 = arith.constant 1.000000e+00 : f32
    %111 = vector.broadcast %cst_34 : f32 to vector<8x64xf32>
    %112 = arith.addf %111, %110 : vector<8x64xf32>
    %113 = arith.divf %111, %112 : vector<8x64xf32>
    %114 = vector.extract_strided_slice %107 {offsets = [0, 64], sizes = [8, 64], strides = [1, 1]} : vector<8x256xf32> to vector<8x64xf32>
    %115 = arith.negf %114 : vector<8x64xf32>
    %116 = math.exp %115 : vector<8x64xf32>
    %cst_35 = arith.constant 1.000000e+00 : f32
    %117 = vector.broadcast %cst_35 : f32 to vector<8x64xf32>
    %118 = arith.addf %117, %116 : vector<8x64xf32>
    %119 = arith.divf %117, %118 : vector<8x64xf32>
    %120 = vector.extract_strided_slice %107 {offsets = [0, 128], sizes = [8, 64], strides = [1, 1]} : vector<8x256xf32> to vector<8x64xf32>
    %121 = math.tanh %120 : vector<8x64xf32>
    %122 = vector.extract_strided_slice %107 {offsets = [0, 192], sizes = [8, 64], strides = [1, 1]} : vector<8x256xf32> to vector<8x64xf32>
    %123 = arith.negf %122 : vector<8x64xf32>
    %124 = math.exp %123 : vector<8x64xf32>
    %cst_36 = arith.constant 1.000000e+00 : f32
    %125 = vector.broadcast %cst_36 : f32 to vector<8x64xf32>
    %126 = arith.addf %125, %124 : vector<8x64xf32>
    %127 = arith.divf %125, %126 : vector<8x64xf32>
    %128 = arith.mulf %119, %95 : vector<8x64xf32>
    %129 = arith.mulf %113, %121 : vector<8x64xf32>
    %130 = arith.addf %128, %129 : vector<8x64xf32>
    %131 = math.tanh %130 : vector<8x64xf32>
    %132 = arith.mulf %127, %131 : vector<8x64xf32>
    %133 = vector.extract_strided_slice %132 {offsets = [0, 0], sizes = [8, 32], strides = [1, 1]} : vector<8x64xf32> to vector<8x32xf32>
    %c16_37 = arith.constant 16 : index
    %c0_38 = arith.constant 0 : index
    %134 = vector.load %arg13[%c16_37, %c0_38] : memref<64x64xf32, #tpu.memory_space<vmem>>, vector<8x32xf32>
    tpu.vector_store %arg13[%c16_37, %c0_38], %133 {strides = array<i32>} : memref<64x64xf32, #tpu.memory_space<vmem>>, vector<8x32xf32>,
    %135 = vector.extract_strided_slice %132 {offsets = [0, 32], sizes = [8, 32], strides = [1, 1]} : vector<8x64xf32> to vector<8x32xf32>
    %c40_39 = arith.constant 40 : index
    %c32_40 = arith.constant 32 : index
    %136 = vector.load %arg13[%c40_39, %c32_40] : memref<64x64xf32, #tpu.memory_space<vmem>>, vector<8x32xf32>
    tpu.vector_store %arg13[%c40_39, %c32_40], %135 {strides = array<i32>} : memref<64x64xf32, #tpu.memory_space<vmem>>, vector<8x32xf32>,
    %c24 = arith.constant 24 : index
    %c0_41 = arith.constant 0 : index
    %137 = vector.load %arg12[%c24, %c0_41] : memref<64x256xf32, #tpu.memory_space<vmem>>, vector<8x256xf32>
    %c32_42 = arith.constant 32 : index
    %c0_43 = arith.constant 0 : index
    %138 = vector.load %arg12[%c32_42, %c0_43] : memref<64x256xf32, #tpu.memory_space<vmem>>, vector<8x256xf32>
    %139 = arith.select %20, %137, %138 : vector<8x256xi1>, vector<8x256xf32>
    %140 = arith.truncf %132 : vector<8x64xf32> to vector<8x64xbf16>
    %cst_44 = arith.constant dense<0.000000e+00> : vector<8x256xf32>
    %141 = tpu.matmul %140, %22, %cst_44 {dimension_numbers = #tpu.dot_dimension_numbers<[1], [0], [0], [1], [0, 0, 1, 1], [], []>} : vector<8x64xbf16>, vector<64x256xbf16>, vector<8x256xf32> -> vector<8x256xf32>
    %142 = arith.addf %139, %141 : vector<8x256xf32>
    %143 = vector.extract_strided_slice %142 {offsets = [0, 0], sizes = [8, 64], strides = [1, 1]} : vector<8x256xf32> to vector<8x64xf32>
    %144 = arith.negf %143 : vector<8x64xf32>
    %145 = math.exp %144 : vector<8x64xf32>
    %cst_45 = arith.constant 1.000000e+00 : f32
    %146 = vector.broadcast %cst_45 : f32 to vector<8x64xf32>
    %147 = arith.addf %146, %145 : vector<8x64xf32>
    %148 = arith.divf %146, %147 : vector<8x64xf32>
    %149 = vector.extract_strided_slice %142 {offsets = [0, 64], sizes = [8, 64], strides = [1, 1]} : vector<8x256xf32> to vector<8x64xf32>
    %150 = arith.negf %149 : vector<8x64xf32>
    %151 = math.exp %150 : vector<8x64xf32>
    %cst_46 = arith.constant 1.000000e+00 : f32
    %152 = vector.broadcast %cst_46 : f32 to vector<8x64xf32>
    %153 = arith.addf %152, %151 : vector<8x64xf32>
    %154 = arith.divf %152, %153 : vector<8x64xf32>
    %155 = vector.extract_strided_slice %142 {offsets = [0, 128], sizes = [8, 64], strides = [1, 1]} : vector<8x256xf32> to vector<8x64xf32>
    %156 = math.tanh %155 : vector<8x64xf32>
    %157 = vector.extract_strided_slice %142 {offsets = [0, 192], sizes = [8, 64], strides = [1, 1]} : vector<8x256xf32> to vector<8x64xf32>
    %158 = arith.negf %157 : vector<8x64xf32>
    %159 = math.exp %158 : vector<8x64xf32>
    %cst_47 = arith.constant 1.000000e+00 : f32
    %160 = vector.broadcast %cst_47 : f32 to vector<8x64xf32>
    %161 = arith.addf %160, %159 : vector<8x64xf32>
    %162 = arith.divf %160, %161 : vector<8x64xf32>
    %163 = arith.mulf %154, %130 : vector<8x64xf32>
    %164 = arith.mulf %148, %156 : vector<8x64xf32>
    %165 = arith.addf %163, %164 : vector<8x64xf32>
    %166 = math.tanh %165 : vector<8x64xf32>
    %167 = arith.mulf %162, %166 : vector<8x64xf32>
    %168 = vector.extract_strided_slice %167 {offsets = [0, 0], sizes = [8, 32], strides = [1, 1]} : vector<8x64xf32> to vector<8x32xf32>
    %c24_48 = arith.constant 24 : index
    %c0_49 = arith.constant 0 : index
    %169 = vector.load %arg13[%c24_48, %c0_49] : memref<64x64xf32, #tpu.memory_space<vmem>>, vector<8x32xf32>
    tpu.vector_store %arg13[%c24_48, %c0_49], %168 {strides = array<i32>} : memref<64x64xf32, #tpu.memory_space<vmem>>, vector<8x32xf32>,
    %170 = vector.extract_strided_slice %167 {offsets = [0, 32], sizes = [8, 32], strides = [1, 1]} : vector<8x64xf32> to vector<8x32xf32>
    %c32_50 = arith.constant 32 : index
    %c32_51 = arith.constant 32 : index
    %171 = vector.load %arg13[%c32_50, %c32_51] : memref<64x64xf32, #tpu.memory_space<vmem>>, vector<8x32xf32>
    tpu.vector_store %arg13[%c32_50, %c32_51], %170 {strides = array<i32>} : memref<64x64xf32, #tpu.memory_space<vmem>>, vector<8x32xf32>,
    %c32_52 = arith.constant 32 : index
    %c0_53 = arith.constant 0 : index
    %172 = vector.load %arg12[%c32_52, %c0_53] : memref<64x256xf32, #tpu.memory_space<vmem>>, vector<8x256xf32>
    %c24_54 = arith.constant 24 : index
    %c0_55 = arith.constant 0 : index
    %173 = vector.load %arg12[%c24_54, %c0_55] : memref<64x256xf32, #tpu.memory_space<vmem>>, vector<8x256xf32>
    %174 = arith.select %20, %172, %173 : vector<8x256xi1>, vector<8x256xf32>
    %175 = arith.truncf %167 : vector<8x64xf32> to vector<8x64xbf16>
    %cst_56 = arith.constant dense<0.000000e+00> : vector<8x256xf32>
    %176 = tpu.matmul %175, %22, %cst_56 {dimension_numbers = #tpu.dot_dimension_numbers<[1], [0], [0], [1], [0, 0, 1, 1], [], []>} : vector<8x64xbf16>, vector<64x256xbf16>, vector<8x256xf32> -> vector<8x256xf32>
    %177 = arith.addf %174, %176 : vector<8x256xf32>
    %178 = vector.extract_strided_slice %177 {offsets = [0, 0], sizes = [8, 64], strides = [1, 1]} : vector<8x256xf32> to vector<8x64xf32>
    %179 = arith.negf %178 : vector<8x64xf32>
    %180 = math.exp %179 : vector<8x64xf32>
    %cst_57 = arith.constant 1.000000e+00 : f32
    %181 = vector.broadcast %cst_57 : f32 to vector<8x64xf32>
    %182 = arith.addf %181, %180 : vector<8x64xf32>
    %183 = arith.divf %181, %182 : vector<8x64xf32>
    %184 = vector.extract_strided_slice %177 {offsets = [0, 64], sizes = [8, 64], strides = [1, 1]} : vector<8x256xf32> to vector<8x64xf32>
    %185 = arith.negf %184 : vector<8x64xf32>
    %186 = math.exp %185 : vector<8x64xf32>
    %cst_58 = arith.constant 1.000000e+00 : f32
    %187 = vector.broadcast %cst_58 : f32 to vector<8x64xf32>
    %188 = arith.addf %187, %186 : vector<8x64xf32>
    %189 = arith.divf %187, %188 : vector<8x64xf32>
    %190 = vector.extract_strided_slice %177 {offsets = [0, 128], sizes = [8, 64], strides = [1, 1]} : vector<8x256xf32> to vector<8x64xf32>
    %191 = math.tanh %190 : vector<8x64xf32>
    %192 = vector.extract_strided_slice %177 {offsets = [0, 192], sizes = [8, 64], strides = [1, 1]} : vector<8x256xf32> to vector<8x64xf32>
    %193 = arith.negf %192 : vector<8x64xf32>
    %194 = math.exp %193 : vector<8x64xf32>
    %cst_59 = arith.constant 1.000000e+00 : f32
    %195 = vector.broadcast %cst_59 : f32 to vector<8x64xf32>
    %196 = arith.addf %195, %194 : vector<8x64xf32>
    %197 = arith.divf %195, %196 : vector<8x64xf32>
    %198 = arith.mulf %189, %165 : vector<8x64xf32>
    %199 = arith.mulf %183, %191 : vector<8x64xf32>
    %200 = arith.addf %198, %199 : vector<8x64xf32>
    %201 = math.tanh %200 : vector<8x64xf32>
    %202 = arith.mulf %197, %201 : vector<8x64xf32>
    %203 = vector.extract_strided_slice %202 {offsets = [0, 0], sizes = [8, 32], strides = [1, 1]} : vector<8x64xf32> to vector<8x32xf32>
    %c32_60 = arith.constant 32 : index
    %c0_61 = arith.constant 0 : index
    %204 = vector.load %arg13[%c32_60, %c0_61] : memref<64x64xf32, #tpu.memory_space<vmem>>, vector<8x32xf32>
    tpu.vector_store %arg13[%c32_60, %c0_61], %203 {strides = array<i32>} : memref<64x64xf32, #tpu.memory_space<vmem>>, vector<8x32xf32>,
    %205 = vector.extract_strided_slice %202 {offsets = [0, 32], sizes = [8, 32], strides = [1, 1]} : vector<8x64xf32> to vector<8x32xf32>
    %c24_62 = arith.constant 24 : index
    %c32_63 = arith.constant 32 : index
    %206 = vector.load %arg13[%c24_62, %c32_63] : memref<64x64xf32, #tpu.memory_space<vmem>>, vector<8x32xf32>
    tpu.vector_store %arg13[%c24_62, %c32_63], %205 {strides = array<i32>} : memref<64x64xf32, #tpu.memory_space<vmem>>, vector<8x32xf32>,
    %c40_64 = arith.constant 40 : index
    %c0_65 = arith.constant 0 : index
    %207 = vector.load %arg12[%c40_64, %c0_65] : memref<64x256xf32, #tpu.memory_space<vmem>>, vector<8x256xf32>
    %c16_66 = arith.constant 16 : index
    %c0_67 = arith.constant 0 : index
    %208 = vector.load %arg12[%c16_66, %c0_67] : memref<64x256xf32, #tpu.memory_space<vmem>>, vector<8x256xf32>
    %209 = arith.select %20, %207, %208 : vector<8x256xi1>, vector<8x256xf32>
    %210 = arith.truncf %202 : vector<8x64xf32> to vector<8x64xbf16>
    %cst_68 = arith.constant dense<0.000000e+00> : vector<8x256xf32>
    %211 = tpu.matmul %210, %22, %cst_68 {dimension_numbers = #tpu.dot_dimension_numbers<[1], [0], [0], [1], [0, 0, 1, 1], [], []>} : vector<8x64xbf16>, vector<64x256xbf16>, vector<8x256xf32> -> vector<8x256xf32>
    %212 = arith.addf %209, %211 : vector<8x256xf32>
    %213 = vector.extract_strided_slice %212 {offsets = [0, 0], sizes = [8, 64], strides = [1, 1]} : vector<8x256xf32> to vector<8x64xf32>
    %214 = arith.negf %213 : vector<8x64xf32>
    %215 = math.exp %214 : vector<8x64xf32>
    %cst_69 = arith.constant 1.000000e+00 : f32
    %216 = vector.broadcast %cst_69 : f32 to vector<8x64xf32>
    %217 = arith.addf %216, %215 : vector<8x64xf32>
    %218 = arith.divf %216, %217 : vector<8x64xf32>
    %219 = vector.extract_strided_slice %212 {offsets = [0, 64], sizes = [8, 64], strides = [1, 1]} : vector<8x256xf32> to vector<8x64xf32>
    %220 = arith.negf %219 : vector<8x64xf32>
    %221 = math.exp %220 : vector<8x64xf32>
    %cst_70 = arith.constant 1.000000e+00 : f32
    %222 = vector.broadcast %cst_70 : f32 to vector<8x64xf32>
    %223 = arith.addf %222, %221 : vector<8x64xf32>
    %224 = arith.divf %222, %223 : vector<8x64xf32>
    %225 = vector.extract_strided_slice %212 {offsets = [0, 128], sizes = [8, 64], strides = [1, 1]} : vector<8x256xf32> to vector<8x64xf32>
    %226 = math.tanh %225 : vector<8x64xf32>
    %227 = vector.extract_strided_slice %212 {offsets = [0, 192], sizes = [8, 64], strides = [1, 1]} : vector<8x256xf32> to vector<8x64xf32>
    %228 = arith.negf %227 : vector<8x64xf32>
    %229 = math.exp %228 : vector<8x64xf32>
    %cst_71 = arith.constant 1.000000e+00 : f32
    %230 = vector.broadcast %cst_71 : f32 to vector<8x64xf32>
    %231 = arith.addf %230, %229 : vector<8x64xf32>
    %232 = arith.divf %230, %231 : vector<8x64xf32>
    %233 = arith.mulf %224, %200 : vector<8x64xf32>
    %234 = arith.mulf %218, %226 : vector<8x64xf32>
    %235 = arith.addf %233, %234 : vector<8x64xf32>
    %236 = math.tanh %235 : vector<8x64xf32>
    %237 = arith.mulf %232, %236 : vector<8x64xf32>
    %238 = vector.extract_strided_slice %237 {offsets = [0, 0], sizes = [8, 32], strides = [1, 1]} : vector<8x64xf32> to vector<8x32xf32>
    %c40_72 = arith.constant 40 : index
    %c0_73 = arith.constant 0 : index
    %239 = vector.load %arg13[%c40_72, %c0_73] : memref<64x64xf32, #tpu.memory_space<vmem>>, vector<8x32xf32>
    tpu.vector_store %arg13[%c40_72, %c0_73], %238 {strides = array<i32>} : memref<64x64xf32, #tpu.memory_space<vmem>>, vector<8x32xf32>,
    %240 = vector.extract_strided_slice %237 {offsets = [0, 32], sizes = [8, 32], strides = [1, 1]} : vector<8x64xf32> to vector<8x32xf32>
    %c16_74 = arith.constant 16 : index
    %c32_75 = arith.constant 32 : index
    %241 = vector.load %arg13[%c16_74, %c32_75] : memref<64x64xf32, #tpu.memory_space<vmem>>, vector<8x32xf32>
    tpu.vector_store %arg13[%c16_74, %c32_75], %240 {strides = array<i32>} : memref<64x64xf32, #tpu.memory_space<vmem>>, vector<8x32xf32>,
    %c48_76 = arith.constant 48 : index
    %c0_77 = arith.constant 0 : index
    %242 = vector.load %arg12[%c48_76, %c0_77] : memref<64x256xf32, #tpu.memory_space<vmem>>, vector<8x256xf32>
    %c8_78 = arith.constant 8 : index
    %c0_79 = arith.constant 0 : index
    %243 = vector.load %arg12[%c8_78, %c0_79] : memref<64x256xf32, #tpu.memory_space<vmem>>, vector<8x256xf32>
    %244 = arith.select %20, %242, %243 : vector<8x256xi1>, vector<8x256xf32>
    %245 = arith.truncf %237 : vector<8x64xf32> to vector<8x64xbf16>
    %cst_80 = arith.constant dense<0.000000e+00> : vector<8x256xf32>
    %246 = tpu.matmul %245, %22, %cst_80 {dimension_numbers = #tpu.dot_dimension_numbers<[1], [0], [0], [1], [0, 0, 1, 1], [], []>} : vector<8x64xbf16>, vector<64x256xbf16>, vector<8x256xf32> -> vector<8x256xf32>
    %247 = arith.addf %244, %246 : vector<8x256xf32>
    %248 = vector.extract_strided_slice %247 {offsets = [0, 0], sizes = [8, 64], strides = [1, 1]} : vector<8x256xf32> to vector<8x64xf32>
    %249 = arith.negf %248 : vector<8x64xf32>
    %250 = math.exp %249 : vector<8x64xf32>
    %cst_81 = arith.constant 1.000000e+00 : f32
    %251 = vector.broadcast %cst_81 : f32 to vector<8x64xf32>
    %252 = arith.addf %251, %250 : vector<8x64xf32>
    %253 = arith.divf %251, %252 : vector<8x64xf32>
    %254 = vector.extract_strided_slice %247 {offsets = [0, 64], sizes = [8, 64], strides = [1, 1]} : vector<8x256xf32> to vector<8x64xf32>
    %255 = arith.negf %254 : vector<8x64xf32>
    %256 = math.exp %255 : vector<8x64xf32>
    %cst_82 = arith.constant 1.000000e+00 : f32
    %257 = vector.broadcast %cst_82 : f32 to vector<8x64xf32>
    %258 = arith.addf %257, %256 : vector<8x64xf32>
    %259 = arith.divf %257, %258 : vector<8x64xf32>
    %260 = vector.extract_strided_slice %247 {offsets = [0, 128], sizes = [8, 64], strides = [1, 1]} : vector<8x256xf32> to vector<8x64xf32>
    %261 = math.tanh %260 : vector<8x64xf32>
    %262 = vector.extract_strided_slice %247 {offsets = [0, 192], sizes = [8, 64], strides = [1, 1]} : vector<8x256xf32> to vector<8x64xf32>
    %263 = arith.negf %262 : vector<8x64xf32>
    %264 = math.exp %263 : vector<8x64xf32>
    %cst_83 = arith.constant 1.000000e+00 : f32
    %265 = vector.broadcast %cst_83 : f32 to vector<8x64xf32>
    %266 = arith.addf %265, %264 : vector<8x64xf32>
    %267 = arith.divf %265, %266 : vector<8x64xf32>
    %268 = arith.mulf %259, %235 : vector<8x64xf32>
    %269 = arith.mulf %253, %261 : vector<8x64xf32>
    %270 = arith.addf %268, %269 : vector<8x64xf32>
    %271 = math.tanh %270 : vector<8x64xf32>
    %272 = arith.mulf %267, %271 : vector<8x64xf32>
    %273 = vector.extract_strided_slice %272 {offsets = [0, 0], sizes = [8, 32], strides = [1, 1]} : vector<8x64xf32> to vector<8x32xf32>
    %c48_84 = arith.constant 48 : index
    %c0_85 = arith.constant 0 : index
    %274 = vector.load %arg13[%c48_84, %c0_85] : memref<64x64xf32, #tpu.memory_space<vmem>>, vector<8x32xf32>
    tpu.vector_store %arg13[%c48_84, %c0_85], %273 {strides = array<i32>} : memref<64x64xf32, #tpu.memory_space<vmem>>, vector<8x32xf32>,
    %275 = vector.extract_strided_slice %272 {offsets = [0, 32], sizes = [8, 32], strides = [1, 1]} : vector<8x64xf32> to vector<8x32xf32>
    %c8_86 = arith.constant 8 : index
    %c32_87 = arith.constant 32 : index
    %276 = vector.load %arg13[%c8_86, %c32_87] : memref<64x64xf32, #tpu.memory_space<vmem>>, vector<8x32xf32>
    tpu.vector_store %arg13[%c8_86, %c32_87], %275 {strides = array<i32>} : memref<64x64xf32, #tpu.memory_space<vmem>>, vector<8x32xf32>,
    %c56_88 = arith.constant 56 : index
    %c0_89 = arith.constant 0 : index
    %277 = vector.load %arg12[%c56_88, %c0_89] : memref<64x256xf32, #tpu.memory_space<vmem>>, vector<8x256xf32>
    %c0_90 = arith.constant 0 : index
    %c0_91 = arith.constant 0 : index
    %278 = vector.load %arg12[%c0_90, %c0_91] : memref<64x256xf32, #tpu.memory_space<vmem>>, vector<8x256xf32>
    %279 = arith.select %20, %277, %278 : vector<8x256xi1>, vector<8x256xf32>
    %280 = arith.truncf %272 : vector<8x64xf32> to vector<8x64xbf16>
    %cst_92 = arith.constant dense<0.000000e+00> : vector<8x256xf32>
    %281 = tpu.matmul %280, %22, %cst_92 {dimension_numbers = #tpu.dot_dimension_numbers<[1], [0], [0], [1], [0, 0, 1, 1], [], []>} : vector<8x64xbf16>, vector<64x256xbf16>, vector<8x256xf32> -> vector<8x256xf32>
    %282 = arith.addf %279, %281 : vector<8x256xf32>
    %283 = vector.extract_strided_slice %282 {offsets = [0, 0], sizes = [8, 64], strides = [1, 1]} : vector<8x256xf32> to vector<8x64xf32>
    %284 = arith.negf %283 : vector<8x64xf32>
    %285 = math.exp %284 : vector<8x64xf32>
    %cst_93 = arith.constant 1.000000e+00 : f32
    %286 = vector.broadcast %cst_93 : f32 to vector<8x64xf32>
    %287 = arith.addf %286, %285 : vector<8x64xf32>
    %288 = arith.divf %286, %287 : vector<8x64xf32>
    %289 = vector.extract_strided_slice %282 {offsets = [0, 64], sizes = [8, 64], strides = [1, 1]} : vector<8x256xf32> to vector<8x64xf32>
    %290 = arith.negf %289 : vector<8x64xf32>
    %291 = math.exp %290 : vector<8x64xf32>
    %cst_94 = arith.constant 1.000000e+00 : f32
    %292 = vector.broadcast %cst_94 : f32 to vector<8x64xf32>
    %293 = arith.addf %292, %291 : vector<8x64xf32>
    %294 = arith.divf %292, %293 : vector<8x64xf32>
    %295 = vector.extract_strided_slice %282 {offsets = [0, 128], sizes = [8, 64], strides = [1, 1]} : vector<8x256xf32> to vector<8x64xf32>
    %296 = math.tanh %295 : vector<8x64xf32>
    %297 = vector.extract_strided_slice %282 {offsets = [0, 192], sizes = [8, 64], strides = [1, 1]} : vector<8x256xf32> to vector<8x64xf32>
    %298 = arith.negf %297 : vector<8x64xf32>
    %299 = math.exp %298 : vector<8x64xf32>
    %cst_95 = arith.constant 1.000000e+00 : f32
    %300 = vector.broadcast %cst_95 : f32 to vector<8x64xf32>
    %301 = arith.addf %300, %299 : vector<8x64xf32>
    %302 = arith.divf %300, %301 : vector<8x64xf32>
    %303 = arith.mulf %294, %270 : vector<8x64xf32>
    %304 = arith.mulf %288, %296 : vector<8x64xf32>
    %305 = arith.addf %303, %304 : vector<8x64xf32>
    %306 = math.tanh %305 : vector<8x64xf32>
    %307 = arith.mulf %302, %306 : vector<8x64xf32>
    %308 = vector.extract_strided_slice %307 {offsets = [0, 0], sizes = [8, 32], strides = [1, 1]} : vector<8x64xf32> to vector<8x32xf32>
    %c56_96 = arith.constant 56 : index
    %c0_97 = arith.constant 0 : index
    %309 = vector.load %arg13[%c56_96, %c0_97] : memref<64x64xf32, #tpu.memory_space<vmem>>, vector<8x32xf32>
    tpu.vector_store %arg13[%c56_96, %c0_97], %308 {strides = array<i32>} : memref<64x64xf32, #tpu.memory_space<vmem>>, vector<8x32xf32>,
    %310 = vector.extract_strided_slice %307 {offsets = [0, 32], sizes = [8, 32], strides = [1, 1]} : vector<8x64xf32> to vector<8x32xf32>
    %c0_98 = arith.constant 0 : index
    %c32_99 = arith.constant 32 : index
    %311 = vector.load %arg13[%c0_98, %c32_99] : memref<64x64xf32, #tpu.memory_space<vmem>>, vector<8x32xf32>
    tpu.vector_store %arg13[%c0_98, %c32_99], %310 {strides = array<i32>} : memref<64x64xf32, #tpu.memory_space<vmem>>, vector<8x32xf32>,
    %c0_100 = arith.constant 0 : index
    %c0_101 = arith.constant 0 : index
    %312 = vector.load %arg5[%c0_100, %c0_101] : memref<64x256xbf16, #tpu.memory_space<vmem>>, vector<64x256xbf16>
    %c0_102 = arith.constant 0 : index
    %c0_103 = arith.constant 0 : index
    %313 = vector.load %arg6[%c0_102, %c0_103] : memref<64x256xbf16, #tpu.memory_space<vmem>>, vector<64x256xbf16>
    %c0_104 = arith.constant 0 : index
    %c0_105 = arith.constant 0 : index
    %314 = vector.load %arg7[%c0_104, %c0_105] : memref<1x256xf32, #tpu.memory_space<vmem>>, vector<1x256xf32>
    %c0_106 = arith.constant 0 : index
    %c0_107 = arith.constant 0 : index
    %315 = vector.load %arg13[%c0_106, %c0_107] : memref<64x64xf32, #tpu.memory_space<vmem>>, vector<64x64xf32>
    %316 = arith.truncf %315 : vector<64x64xf32> to vector<64x64xbf16>
    %cst_108 = arith.constant dense<0.000000e+00> : vector<64x256xf32>
    %317 = tpu.matmul %316, %312, %cst_108 {dimension_numbers = #tpu.dot_dimension_numbers<[1], [0], [0], [1], [0, 0, 1, 1], [], []>} : vector<64x64xbf16>, vector<64x256xbf16>, vector<64x256xf32> -> vector<64x256xf32>
    %318 = vector.broadcast %314 : vector<1x256xf32> to vector<64x256xf32>
    %319 = arith.addf %317, %318 : vector<64x256xf32>
    %c0_109 = arith.constant 0 : index
    %c0_110 = arith.constant 0 : index
    %320 = vector.load %arg12[%c0_109, %c0_110] : memref<64x256xf32, #tpu.memory_space<vmem>>, vector<64x256xf32>
    tpu.vector_store %arg12[%c0_109, %c0_110], %319 {strides = array<i32>} : memref<64x256xf32, #tpu.memory_space<vmem>>, vector<64x256xf32>,
    %cst_111 = arith.constant 0.000000e+00 : f32
    %321 = vector.broadcast %cst_111 : f32 to vector<8x64xf32>
    %cst_112 = arith.constant 0.000000e+00 : f32
    %322 = vector.broadcast %cst_112 : f32 to vector<8x64xf32>
    %c0_113 = arith.constant 0 : index
    %c0_114 = arith.constant 0 : index
    %323 = vector.load %arg12[%c0_113, %c0_114] : memref<64x256xf32, #tpu.memory_space<vmem>>, vector<8x256xf32>
    %c56_115 = arith.constant 56 : index
    %c0_116 = arith.constant 0 : index
    %324 = vector.load %arg12[%c56_115, %c0_116] : memref<64x256xf32, #tpu.memory_space<vmem>>, vector<8x256xf32>
    %325 = arith.select %20, %323, %324 : vector<8x256xi1>, vector<8x256xf32>
    %326 = arith.truncf %321 : vector<8x64xf32> to vector<8x64xbf16>
    %cst_117 = arith.constant dense<0.000000e+00> : vector<8x256xf32>
    %327 = tpu.matmul %326, %313, %cst_117 {dimension_numbers = #tpu.dot_dimension_numbers<[1], [0], [0], [1], [0, 0, 1, 1], [], []>} : vector<8x64xbf16>, vector<64x256xbf16>, vector<8x256xf32> -> vector<8x256xf32>
    %328 = arith.addf %325, %327 : vector<8x256xf32>
    %329 = vector.extract_strided_slice %328 {offsets = [0, 0], sizes = [8, 64], strides = [1, 1]} : vector<8x256xf32> to vector<8x64xf32>
    %330 = arith.negf %329 : vector<8x64xf32>
    %331 = math.exp %330 : vector<8x64xf32>
    %cst_118 = arith.constant 1.000000e+00 : f32
    %332 = vector.broadcast %cst_118 : f32 to vector<8x64xf32>
    %333 = arith.addf %332, %331 : vector<8x64xf32>
    %334 = arith.divf %332, %333 : vector<8x64xf32>
    %335 = vector.extract_strided_slice %328 {offsets = [0, 64], sizes = [8, 64], strides = [1, 1]} : vector<8x256xf32> to vector<8x64xf32>
    %336 = arith.negf %335 : vector<8x64xf32>
    %337 = math.exp %336 : vector<8x64xf32>
    %cst_119 = arith.constant 1.000000e+00 : f32
    %338 = vector.broadcast %cst_119 : f32 to vector<8x64xf32>
    %339 = arith.addf %338, %337 : vector<8x64xf32>
    %340 = arith.divf %338, %339 : vector<8x64xf32>
    %341 = vector.extract_strided_slice %328 {offsets = [0, 128], sizes = [8, 64], strides = [1, 1]} : vector<8x256xf32> to vector<8x64xf32>
    %342 = math.tanh %341 : vector<8x64xf32>
    %343 = vector.extract_strided_slice %328 {offsets = [0, 192], sizes = [8, 64], strides = [1, 1]} : vector<8x256xf32> to vector<8x64xf32>
    %344 = arith.negf %343 : vector<8x64xf32>
    %345 = math.exp %344 : vector<8x64xf32>
    %cst_120 = arith.constant 1.000000e+00 : f32
    %346 = vector.broadcast %cst_120 : f32 to vector<8x64xf32>
    %347 = arith.addf %346, %345 : vector<8x64xf32>
    %348 = arith.divf %346, %347 : vector<8x64xf32>
    %349 = arith.mulf %340, %322 : vector<8x64xf32>
    %350 = arith.mulf %334, %342 : vector<8x64xf32>
    %351 = arith.addf %349, %350 : vector<8x64xf32>
    %352 = math.tanh %351 : vector<8x64xf32>
    %353 = arith.mulf %348, %352 : vector<8x64xf32>
    %354 = vector.extract_strided_slice %353 {offsets = [0, 0], sizes = [8, 32], strides = [1, 1]} : vector<8x64xf32> to vector<8x32xf32>
    %c0_121 = arith.constant 0 : index
    %c0_122 = arith.constant 0 : index
    %355 = vector.load %arg13[%c0_121, %c0_122] : memref<64x64xf32, #tpu.memory_space<vmem>>, vector<8x32xf32>
    tpu.vector_store %arg13[%c0_121, %c0_122], %354 {strides = array<i32>} : memref<64x64xf32, #tpu.memory_space<vmem>>, vector<8x32xf32>,
    %356 = vector.extract_strided_slice %353 {offsets = [0, 32], sizes = [8, 32], strides = [1, 1]} : vector<8x64xf32> to vector<8x32xf32>
    %c56_123 = arith.constant 56 : index
    %c32_124 = arith.constant 32 : index
    %357 = vector.load %arg13[%c56_123, %c32_124] : memref<64x64xf32, #tpu.memory_space<vmem>>, vector<8x32xf32>
    tpu.vector_store %arg13[%c56_123, %c32_124], %356 {strides = array<i32>} : memref<64x64xf32, #tpu.memory_space<vmem>>, vector<8x32xf32>,
    %c8_125 = arith.constant 8 : index
    %c0_126 = arith.constant 0 : index
    %358 = vector.load %arg12[%c8_125, %c0_126] : memref<64x256xf32, #tpu.memory_space<vmem>>, vector<8x256xf32>
    %c48_127 = arith.constant 48 : index
    %c0_128 = arith.constant 0 : index
    %359 = vector.load %arg12[%c48_127, %c0_128] : memref<64x256xf32, #tpu.memory_space<vmem>>, vector<8x256xf32>
    %360 = arith.select %20, %358, %359 : vector<8x256xi1>, vector<8x256xf32>
    %361 = arith.truncf %353 : vector<8x64xf32> to vector<8x64xbf16>
    %cst_129 = arith.constant dense<0.000000e+00> : vector<8x256xf32>
    %362 = tpu.matmul %361, %313, %cst_129 {dimension_numbers = #tpu.dot_dimension_numbers<[1], [0], [0], [1], [0, 0, 1, 1], [], []>} : vector<8x64xbf16>, vector<64x256xbf16>, vector<8x256xf32> -> vector<8x256xf32>
    %363 = arith.addf %360, %362 : vector<8x256xf32>
    %364 = vector.extract_strided_slice %363 {offsets = [0, 0], sizes = [8, 64], strides = [1, 1]} : vector<8x256xf32> to vector<8x64xf32>
    %365 = arith.negf %364 : vector<8x64xf32>
    %366 = math.exp %365 : vector<8x64xf32>
    %cst_130 = arith.constant 1.000000e+00 : f32
    %367 = vector.broadcast %cst_130 : f32 to vector<8x64xf32>
    %368 = arith.addf %367, %366 : vector<8x64xf32>
    %369 = arith.divf %367, %368 : vector<8x64xf32>
    %370 = vector.extract_strided_slice %363 {offsets = [0, 64], sizes = [8, 64], strides = [1, 1]} : vector<8x256xf32> to vector<8x64xf32>
    %371 = arith.negf %370 : vector<8x64xf32>
    %372 = math.exp %371 : vector<8x64xf32>
    %cst_131 = arith.constant 1.000000e+00 : f32
    %373 = vector.broadcast %cst_131 : f32 to vector<8x64xf32>
    %374 = arith.addf %373, %372 : vector<8x64xf32>
    %375 = arith.divf %373, %374 : vector<8x64xf32>
    %376 = vector.extract_strided_slice %363 {offsets = [0, 128], sizes = [8, 64], strides = [1, 1]} : vector<8x256xf32> to vector<8x64xf32>
    %377 = math.tanh %376 : vector<8x64xf32>
    %378 = vector.extract_strided_slice %363 {offsets = [0, 192], sizes = [8, 64], strides = [1, 1]} : vector<8x256xf32> to vector<8x64xf32>
    %379 = arith.negf %378 : vector<8x64xf32>
    %380 = math.exp %379 : vector<8x64xf32>
    %cst_132 = arith.constant 1.000000e+00 : f32
    %381 = vector.broadcast %cst_132 : f32 to vector<8x64xf32>
    %382 = arith.addf %381, %380 : vector<8x64xf32>
    %383 = arith.divf %381, %382 : vector<8x64xf32>
    %384 = arith.mulf %375, %351 : vector<8x64xf32>
    %385 = arith.mulf %369, %377 : vector<8x64xf32>
    %386 = arith.addf %384, %385 : vector<8x64xf32>
    %387 = math.tanh %386 : vector<8x64xf32>
    %388 = arith.mulf %383, %387 : vector<8x64xf32>
    %389 = vector.extract_strided_slice %388 {offsets = [0, 0], sizes = [8, 32], strides = [1, 1]} : vector<8x64xf32> to vector<8x32xf32>
    %c8_133 = arith.constant 8 : index
    %c0_134 = arith.constant 0 : index
    %390 = vector.load %arg13[%c8_133, %c0_134] : memref<64x64xf32, #tpu.memory_space<vmem>>, vector<8x32xf32>
    tpu.vector_store %arg13[%c8_133, %c0_134], %389 {strides = array<i32>} : memref<64x64xf32, #tpu.memory_space<vmem>>, vector<8x32xf32>,
    %391 = vector.extract_strided_slice %388 {offsets = [0, 32], sizes = [8, 32], strides = [1, 1]} : vector<8x64xf32> to vector<8x32xf32>
    %c48_135 = arith.constant 48 : index
    %c32_136 = arith.constant 32 : index
    %392 = vector.load %arg13[%c48_135, %c32_136] : memref<64x64xf32, #tpu.memory_space<vmem>>, vector<8x32xf32>
    tpu.vector_store %arg13[%c48_135, %c32_136], %391 {strides = array<i32>} : memref<64x64xf32, #tpu.memory_space<vmem>>, vector<8x32xf32>,
    %c16_137 = arith.constant 16 : index
    %c0_138 = arith.constant 0 : index
    %393 = vector.load %arg12[%c16_137, %c0_138] : memref<64x256xf32, #tpu.memory_space<vmem>>, vector<8x256xf32>
    %c40_139 = arith.constant 40 : index
    %c0_140 = arith.constant 0 : index
    %394 = vector.load %arg12[%c40_139, %c0_140] : memref<64x256xf32, #tpu.memory_space<vmem>>, vector<8x256xf32>
    %395 = arith.select %20, %393, %394 : vector<8x256xi1>, vector<8x256xf32>
    %396 = arith.truncf %388 : vector<8x64xf32> to vector<8x64xbf16>
    %cst_141 = arith.constant dense<0.000000e+00> : vector<8x256xf32>
    %397 = tpu.matmul %396, %313, %cst_141 {dimension_numbers = #tpu.dot_dimension_numbers<[1], [0], [0], [1], [0, 0, 1, 1], [], []>} : vector<8x64xbf16>, vector<64x256xbf16>, vector<8x256xf32> -> vector<8x256xf32>
    %398 = arith.addf %395, %397 : vector<8x256xf32>
    %399 = vector.extract_strided_slice %398 {offsets = [0, 0], sizes = [8, 64], strides = [1, 1]} : vector<8x256xf32> to vector<8x64xf32>
    %400 = arith.negf %399 : vector<8x64xf32>
    %401 = math.exp %400 : vector<8x64xf32>
    %cst_142 = arith.constant 1.000000e+00 : f32
    %402 = vector.broadcast %cst_142 : f32 to vector<8x64xf32>
    %403 = arith.addf %402, %401 : vector<8x64xf32>
    %404 = arith.divf %402, %403 : vector<8x64xf32>
    %405 = vector.extract_strided_slice %398 {offsets = [0, 64], sizes = [8, 64], strides = [1, 1]} : vector<8x256xf32> to vector<8x64xf32>
    %406 = arith.negf %405 : vector<8x64xf32>
    %407 = math.exp %406 : vector<8x64xf32>
    %cst_143 = arith.constant 1.000000e+00 : f32
    %408 = vector.broadcast %cst_143 : f32 to vector<8x64xf32>
    %409 = arith.addf %408, %407 : vector<8x64xf32>
    %410 = arith.divf %408, %409 : vector<8x64xf32>
    %411 = vector.extract_strided_slice %398 {offsets = [0, 128], sizes = [8, 64], strides = [1, 1]} : vector<8x256xf32> to vector<8x64xf32>
    %412 = math.tanh %411 : vector<8x64xf32>
    %413 = vector.extract_strided_slice %398 {offsets = [0, 192], sizes = [8, 64], strides = [1, 1]} : vector<8x256xf32> to vector<8x64xf32>
    %414 = arith.negf %413 : vector<8x64xf32>
    %415 = math.exp %414 : vector<8x64xf32>
    %cst_144 = arith.constant 1.000000e+00 : f32
    %416 = vector.broadcast %cst_144 : f32 to vector<8x64xf32>
    %417 = arith.addf %416, %415 : vector<8x64xf32>
    %418 = arith.divf %416, %417 : vector<8x64xf32>
    %419 = arith.mulf %410, %386 : vector<8x64xf32>
    %420 = arith.mulf %404, %412 : vector<8x64xf32>
    %421 = arith.addf %419, %420 : vector<8x64xf32>
    %422 = math.tanh %421 : vector<8x64xf32>
    %423 = arith.mulf %418, %422 : vector<8x64xf32>
    %424 = vector.extract_strided_slice %423 {offsets = [0, 0], sizes = [8, 32], strides = [1, 1]} : vector<8x64xf32> to vector<8x32xf32>
    %c16_145 = arith.constant 16 : index
    %c0_146 = arith.constant 0 : index
    %425 = vector.load %arg13[%c16_145, %c0_146] : memref<64x64xf32, #tpu.memory_space<vmem>>, vector<8x32xf32>
    tpu.vector_store %arg13[%c16_145, %c0_146], %424 {strides = array<i32>} : memref<64x64xf32, #tpu.memory_space<vmem>>, vector<8x32xf32>,
    %426 = vector.extract_strided_slice %423 {offsets = [0, 32], sizes = [8, 32], strides = [1, 1]} : vector<8x64xf32> to vector<8x32xf32>
    %c40_147 = arith.constant 40 : index
    %c32_148 = arith.constant 32 : index
    %427 = vector.load %arg13[%c40_147, %c32_148] : memref<64x64xf32, #tpu.memory_space<vmem>>, vector<8x32xf32>
    tpu.vector_store %arg13[%c40_147, %c32_148], %426 {strides = array<i32>} : memref<64x64xf32, #tpu.memory_space<vmem>>, vector<8x32xf32>,
    %c24_149 = arith.constant 24 : index
    %c0_150 = arith.constant 0 : index
    %428 = vector.load %arg12[%c24_149, %c0_150] : memref<64x256xf32, #tpu.memory_space<vmem>>, vector<8x256xf32>
    %c32_151 = arith.constant 32 : index
    %c0_152 = arith.constant 0 : index
    %429 = vector.load %arg12[%c32_151, %c0_152] : memref<64x256xf32, #tpu.memory_space<vmem>>, vector<8x256xf32>
    %430 = arith.select %20, %428, %429 : vector<8x256xi1>, vector<8x256xf32>
    %431 = arith.truncf %423 : vector<8x64xf32> to vector<8x64xbf16>
    %cst_153 = arith.constant dense<0.000000e+00> : vector<8x256xf32>
    %432 = tpu.matmul %431, %313, %cst_153 {dimension_numbers = #tpu.dot_dimension_numbers<[1], [0], [0], [1], [0, 0, 1, 1], [], []>} : vector<8x64xbf16>, vector<64x256xbf16>, vector<8x256xf32> -> vector<8x256xf32>
    %433 = arith.addf %430, %432 : vector<8x256xf32>
    %434 = vector.extract_strided_slice %433 {offsets = [0, 0], sizes = [8, 64], strides = [1, 1]} : vector<8x256xf32> to vector<8x64xf32>
    %435 = arith.negf %434 : vector<8x64xf32>
    %436 = math.exp %435 : vector<8x64xf32>
    %cst_154 = arith.constant 1.000000e+00 : f32
    %437 = vector.broadcast %cst_154 : f32 to vector<8x64xf32>
    %438 = arith.addf %437, %436 : vector<8x64xf32>
    %439 = arith.divf %437, %438 : vector<8x64xf32>
    %440 = vector.extract_strided_slice %433 {offsets = [0, 64], sizes = [8, 64], strides = [1, 1]} : vector<8x256xf32> to vector<8x64xf32>
    %441 = arith.negf %440 : vector<8x64xf32>
    %442 = math.exp %441 : vector<8x64xf32>
    %cst_155 = arith.constant 1.000000e+00 : f32
    %443 = vector.broadcast %cst_155 : f32 to vector<8x64xf32>
    %444 = arith.addf %443, %442 : vector<8x64xf32>
    %445 = arith.divf %443, %444 : vector<8x64xf32>
    %446 = vector.extract_strided_slice %433 {offsets = [0, 128], sizes = [8, 64], strides = [1, 1]} : vector<8x256xf32> to vector<8x64xf32>
    %447 = math.tanh %446 : vector<8x64xf32>
    %448 = vector.extract_strided_slice %433 {offsets = [0, 192], sizes = [8, 64], strides = [1, 1]} : vector<8x256xf32> to vector<8x64xf32>
    %449 = arith.negf %448 : vector<8x64xf32>
    %450 = math.exp %449 : vector<8x64xf32>
    %cst_156 = arith.constant 1.000000e+00 : f32
    %451 = vector.broadcast %cst_156 : f32 to vector<8x64xf32>
    %452 = arith.addf %451, %450 : vector<8x64xf32>
    %453 = arith.divf %451, %452 : vector<8x64xf32>
    %454 = arith.mulf %445, %421 : vector<8x64xf32>
    %455 = arith.mulf %439, %447 : vector<8x64xf32>
    %456 = arith.addf %454, %455 : vector<8x64xf32>
    %457 = math.tanh %456 : vector<8x64xf32>
    %458 = arith.mulf %453, %457 : vector<8x64xf32>
    %459 = vector.extract_strided_slice %458 {offsets = [0, 0], sizes = [8, 32], strides = [1, 1]} : vector<8x64xf32> to vector<8x32xf32>
    %c24_157 = arith.constant 24 : index
    %c0_158 = arith.constant 0 : index
    %460 = vector.load %arg13[%c24_157, %c0_158] : memref<64x64xf32, #tpu.memory_space<vmem>>, vector<8x32xf32>
    tpu.vector_store %arg13[%c24_157, %c0_158], %459 {strides = array<i32>} : memref<64x64xf32, #tpu.memory_space<vmem>>, vector<8x32xf32>,
    %461 = vector.extract_strided_slice %458 {offsets = [0, 32], sizes = [8, 32], strides = [1, 1]} : vector<8x64xf32> to vector<8x32xf32>
    %c32_159 = arith.constant 32 : index
    %c32_160 = arith.constant 32 : index
    %462 = vector.load %arg13[%c32_159, %c32_160] : memref<64x64xf32, #tpu.memory_space<vmem>>, vector<8x32xf32>
    tpu.vector_store %arg13[%c32_159, %c32_160], %461 {strides = array<i32>} : memref<64x64xf32, #tpu.memory_space<vmem>>, vector<8x32xf32>,
    %c32_161 = arith.constant 32 : index
    %c0_162 = arith.constant 0 : index
    %463 = vector.load %arg12[%c32_161, %c0_162] : memref<64x256xf32, #tpu.memory_space<vmem>>, vector<8x256xf32>
    %c24_163 = arith.constant 24 : index
    %c0_164 = arith.constant 0 : index
    %464 = vector.load %arg12[%c24_163, %c0_164] : memref<64x256xf32, #tpu.memory_space<vmem>>, vector<8x256xf32>
    %465 = arith.select %20, %463, %464 : vector<8x256xi1>, vector<8x256xf32>
    %466 = arith.truncf %458 : vector<8x64xf32> to vector<8x64xbf16>
    %cst_165 = arith.constant dense<0.000000e+00> : vector<8x256xf32>
    %467 = tpu.matmul %466, %313, %cst_165 {dimension_numbers = #tpu.dot_dimension_numbers<[1], [0], [0], [1], [0, 0, 1, 1], [], []>} : vector<8x64xbf16>, vector<64x256xbf16>, vector<8x256xf32> -> vector<8x256xf32>
    %468 = arith.addf %465, %467 : vector<8x256xf32>
    %469 = vector.extract_strided_slice %468 {offsets = [0, 0], sizes = [8, 64], strides = [1, 1]} : vector<8x256xf32> to vector<8x64xf32>
    %470 = arith.negf %469 : vector<8x64xf32>
    %471 = math.exp %470 : vector<8x64xf32>
    %cst_166 = arith.constant 1.000000e+00 : f32
    %472 = vector.broadcast %cst_166 : f32 to vector<8x64xf32>
    %473 = arith.addf %472, %471 : vector<8x64xf32>
    %474 = arith.divf %472, %473 : vector<8x64xf32>
    %475 = vector.extract_strided_slice %468 {offsets = [0, 64], sizes = [8, 64], strides = [1, 1]} : vector<8x256xf32> to vector<8x64xf32>
    %476 = arith.negf %475 : vector<8x64xf32>
    %477 = math.exp %476 : vector<8x64xf32>
    %cst_167 = arith.constant 1.000000e+00 : f32
    %478 = vector.broadcast %cst_167 : f32 to vector<8x64xf32>
    %479 = arith.addf %478, %477 : vector<8x64xf32>
    %480 = arith.divf %478, %479 : vector<8x64xf32>
    %481 = vector.extract_strided_slice %468 {offsets = [0, 128], sizes = [8, 64], strides = [1, 1]} : vector<8x256xf32> to vector<8x64xf32>
    %482 = math.tanh %481 : vector<8x64xf32>
    %483 = vector.extract_strided_slice %468 {offsets = [0, 192], sizes = [8, 64], strides = [1, 1]} : vector<8x256xf32> to vector<8x64xf32>
    %484 = arith.negf %483 : vector<8x64xf32>
    %485 = math.exp %484 : vector<8x64xf32>
    %cst_168 = arith.constant 1.000000e+00 : f32
    %486 = vector.broadcast %cst_168 : f32 to vector<8x64xf32>
    %487 = arith.addf %486, %485 : vector<8x64xf32>
    %488 = arith.divf %486, %487 : vector<8x64xf32>
    %489 = arith.mulf %480, %456 : vector<8x64xf32>
    %490 = arith.mulf %474, %482 : vector<8x64xf32>
    %491 = arith.addf %489, %490 : vector<8x64xf32>
    %492 = math.tanh %491 : vector<8x64xf32>
    %493 = arith.mulf %488, %492 : vector<8x64xf32>
    %494 = vector.extract_strided_slice %493 {offsets = [0, 0], sizes = [8, 32], strides = [1, 1]} : vector<8x64xf32> to vector<8x32xf32>
    %c32_169 = arith.constant 32 : index
    %c0_170 = arith.constant 0 : index
    %495 = vector.load %arg13[%c32_169, %c0_170] : memref<64x64xf32, #tpu.memory_space<vmem>>, vector<8x32xf32>
    tpu.vector_store %arg13[%c32_169, %c0_170], %494 {strides = array<i32>} : memref<64x64xf32, #tpu.memory_space<vmem>>, vector<8x32xf32>,
    %496 = vector.extract_strided_slice %493 {offsets = [0, 32], sizes = [8, 32], strides = [1, 1]} : vector<8x64xf32> to vector<8x32xf32>
    %c24_171 = arith.constant 24 : index
    %c32_172 = arith.constant 32 : index
    %497 = vector.load %arg13[%c24_171, %c32_172] : memref<64x64xf32, #tpu.memory_space<vmem>>, vector<8x32xf32>
    tpu.vector_store %arg13[%c24_171, %c32_172], %496 {strides = array<i32>} : memref<64x64xf32, #tpu.memory_space<vmem>>, vector<8x32xf32>,
    %c40_173 = arith.constant 40 : index
    %c0_174 = arith.constant 0 : index
    %498 = vector.load %arg12[%c40_173, %c0_174] : memref<64x256xf32, #tpu.memory_space<vmem>>, vector<8x256xf32>
    %c16_175 = arith.constant 16 : index
    %c0_176 = arith.constant 0 : index
    %499 = vector.load %arg12[%c16_175, %c0_176] : memref<64x256xf32, #tpu.memory_space<vmem>>, vector<8x256xf32>
    %500 = arith.select %20, %498, %499 : vector<8x256xi1>, vector<8x256xf32>
    %501 = arith.truncf %493 : vector<8x64xf32> to vector<8x64xbf16>
    %cst_177 = arith.constant dense<0.000000e+00> : vector<8x256xf32>
    %502 = tpu.matmul %501, %313, %cst_177 {dimension_numbers = #tpu.dot_dimension_numbers<[1], [0], [0], [1], [0, 0, 1, 1], [], []>} : vector<8x64xbf16>, vector<64x256xbf16>, vector<8x256xf32> -> vector<8x256xf32>
    %503 = arith.addf %500, %502 : vector<8x256xf32>
    %504 = vector.extract_strided_slice %503 {offsets = [0, 0], sizes = [8, 64], strides = [1, 1]} : vector<8x256xf32> to vector<8x64xf32>
    %505 = arith.negf %504 : vector<8x64xf32>
    %506 = math.exp %505 : vector<8x64xf32>
    %cst_178 = arith.constant 1.000000e+00 : f32
    %507 = vector.broadcast %cst_178 : f32 to vector<8x64xf32>
    %508 = arith.addf %507, %506 : vector<8x64xf32>
    %509 = arith.divf %507, %508 : vector<8x64xf32>
    %510 = vector.extract_strided_slice %503 {offsets = [0, 64], sizes = [8, 64], strides = [1, 1]} : vector<8x256xf32> to vector<8x64xf32>
    %511 = arith.negf %510 : vector<8x64xf32>
    %512 = math.exp %511 : vector<8x64xf32>
    %cst_179 = arith.constant 1.000000e+00 : f32
    %513 = vector.broadcast %cst_179 : f32 to vector<8x64xf32>
    %514 = arith.addf %513, %512 : vector<8x64xf32>
    %515 = arith.divf %513, %514 : vector<8x64xf32>
    %516 = vector.extract_strided_slice %503 {offsets = [0, 128], sizes = [8, 64], strides = [1, 1]} : vector<8x256xf32> to vector<8x64xf32>
    %517 = math.tanh %516 : vector<8x64xf32>
    %518 = vector.extract_strided_slice %503 {offsets = [0, 192], sizes = [8, 64], strides = [1, 1]} : vector<8x256xf32> to vector<8x64xf32>
    %519 = arith.negf %518 : vector<8x64xf32>
    %520 = math.exp %519 : vector<8x64xf32>
    %cst_180 = arith.constant 1.000000e+00 : f32
    %521 = vector.broadcast %cst_180 : f32 to vector<8x64xf32>
    %522 = arith.addf %521, %520 : vector<8x64xf32>
    %523 = arith.divf %521, %522 : vector<8x64xf32>
    %524 = arith.mulf %515, %491 : vector<8x64xf32>
    %525 = arith.mulf %509, %517 : vector<8x64xf32>
    %526 = arith.addf %524, %525 : vector<8x64xf32>
    %527 = math.tanh %526 : vector<8x64xf32>
    %528 = arith.mulf %523, %527 : vector<8x64xf32>
    %529 = vector.extract_strided_slice %528 {offsets = [0, 0], sizes = [8, 32], strides = [1, 1]} : vector<8x64xf32> to vector<8x32xf32>
    %c40_181 = arith.constant 40 : index
    %c0_182 = arith.constant 0 : index
    %530 = vector.load %arg13[%c40_181, %c0_182] : memref<64x64xf32, #tpu.memory_space<vmem>>, vector<8x32xf32>
    tpu.vector_store %arg13[%c40_181, %c0_182], %529 {strides = array<i32>} : memref<64x64xf32, #tpu.memory_space<vmem>>, vector<8x32xf32>,
    %531 = vector.extract_strided_slice %528 {offsets = [0, 32], sizes = [8, 32], strides = [1, 1]} : vector<8x64xf32> to vector<8x32xf32>
    %c16_183 = arith.constant 16 : index
    %c32_184 = arith.constant 32 : index
    %532 = vector.load %arg13[%c16_183, %c32_184] : memref<64x64xf32, #tpu.memory_space<vmem>>, vector<8x32xf32>
    tpu.vector_store %arg13[%c16_183, %c32_184], %531 {strides = array<i32>} : memref<64x64xf32, #tpu.memory_space<vmem>>, vector<8x32xf32>,
    %c48_185 = arith.constant 48 : index
    %c0_186 = arith.constant 0 : index
    %533 = vector.load %arg12[%c48_185, %c0_186] : memref<64x256xf32, #tpu.memory_space<vmem>>, vector<8x256xf32>
    %c8_187 = arith.constant 8 : index
    %c0_188 = arith.constant 0 : index
    %534 = vector.load %arg12[%c8_187, %c0_188] : memref<64x256xf32, #tpu.memory_space<vmem>>, vector<8x256xf32>
    %535 = arith.select %20, %533, %534 : vector<8x256xi1>, vector<8x256xf32>
    %536 = arith.truncf %528 : vector<8x64xf32> to vector<8x64xbf16>
    %cst_189 = arith.constant dense<0.000000e+00> : vector<8x256xf32>
    %537 = tpu.matmul %536, %313, %cst_189 {dimension_numbers = #tpu.dot_dimension_numbers<[1], [0], [0], [1], [0, 0, 1, 1], [], []>} : vector<8x64xbf16>, vector<64x256xbf16>, vector<8x256xf32> -> vector<8x256xf32>
    %538 = arith.addf %535, %537 : vector<8x256xf32>
    %539 = vector.extract_strided_slice %538 {offsets = [0, 0], sizes = [8, 64], strides = [1, 1]} : vector<8x256xf32> to vector<8x64xf32>
    %540 = arith.negf %539 : vector<8x64xf32>
    %541 = math.exp %540 : vector<8x64xf32>
    %cst_190 = arith.constant 1.000000e+00 : f32
    %542 = vector.broadcast %cst_190 : f32 to vector<8x64xf32>
    %543 = arith.addf %542, %541 : vector<8x64xf32>
    %544 = arith.divf %542, %543 : vector<8x64xf32>
    %545 = vector.extract_strided_slice %538 {offsets = [0, 64], sizes = [8, 64], strides = [1, 1]} : vector<8x256xf32> to vector<8x64xf32>
    %546 = arith.negf %545 : vector<8x64xf32>
    %547 = math.exp %546 : vector<8x64xf32>
    %cst_191 = arith.constant 1.000000e+00 : f32
    %548 = vector.broadcast %cst_191 : f32 to vector<8x64xf32>
    %549 = arith.addf %548, %547 : vector<8x64xf32>
    %550 = arith.divf %548, %549 : vector<8x64xf32>
    %551 = vector.extract_strided_slice %538 {offsets = [0, 128], sizes = [8, 64], strides = [1, 1]} : vector<8x256xf32> to vector<8x64xf32>
    %552 = math.tanh %551 : vector<8x64xf32>
    %553 = vector.extract_strided_slice %538 {offsets = [0, 192], sizes = [8, 64], strides = [1, 1]} : vector<8x256xf32> to vector<8x64xf32>
    %554 = arith.negf %553 : vector<8x64xf32>
    %555 = math.exp %554 : vector<8x64xf32>
    %cst_192 = arith.constant 1.000000e+00 : f32
    %556 = vector.broadcast %cst_192 : f32 to vector<8x64xf32>
    %557 = arith.addf %556, %555 : vector<8x64xf32>
    %558 = arith.divf %556, %557 : vector<8x64xf32>
    %559 = arith.mulf %550, %526 : vector<8x64xf32>
    %560 = arith.mulf %544, %552 : vector<8x64xf32>
    %561 = arith.addf %559, %560 : vector<8x64xf32>
    %562 = math.tanh %561 : vector<8x64xf32>
    %563 = arith.mulf %558, %562 : vector<8x64xf32>
    %564 = vector.extract_strided_slice %563 {offsets = [0, 0], sizes = [8, 32], strides = [1, 1]} : vector<8x64xf32> to vector<8x32xf32>
    %c48_193 = arith.constant 48 : index
    %c0_194 = arith.constant 0 : index
    %565 = vector.load %arg13[%c48_193, %c0_194] : memref<64x64xf32, #tpu.memory_space<vmem>>, vector<8x32xf32>
    tpu.vector_store %arg13[%c48_193, %c0_194], %564 {strides = array<i32>} : memref<64x64xf32, #tpu.memory_space<vmem>>, vector<8x32xf32>,
    %566 = vector.extract_strided_slice %563 {offsets = [0, 32], sizes = [8, 32], strides = [1, 1]} : vector<8x64xf32> to vector<8x32xf32>
    %c8_195 = arith.constant 8 : index
    %c32_196 = arith.constant 32 : index
    %567 = vector.load %arg13[%c8_195, %c32_196] : memref<64x64xf32, #tpu.memory_space<vmem>>, vector<8x32xf32>
    tpu.vector_store %arg13[%c8_195, %c32_196], %566 {strides = array<i32>} : memref<64x64xf32, #tpu.memory_space<vmem>>, vector<8x32xf32>,
    %c56_197 = arith.constant 56 : index
    %c0_198 = arith.constant 0 : index
    %568 = vector.load %arg12[%c56_197, %c0_198] : memref<64x256xf32, #tpu.memory_space<vmem>>, vector<8x256xf32>
    %c0_199 = arith.constant 0 : index
    %c0_200 = arith.constant 0 : index
    %569 = vector.load %arg12[%c0_199, %c0_200] : memref<64x256xf32, #tpu.memory_space<vmem>>, vector<8x256xf32>
    %570 = arith.select %20, %568, %569 : vector<8x256xi1>, vector<8x256xf32>
    %571 = arith.truncf %563 : vector<8x64xf32> to vector<8x64xbf16>
    %cst_201 = arith.constant dense<0.000000e+00> : vector<8x256xf32>
    %572 = tpu.matmul %571, %313, %cst_201 {dimension_numbers = #tpu.dot_dimension_numbers<[1], [0], [0], [1], [0, 0, 1, 1], [], []>} : vector<8x64xbf16>, vector<64x256xbf16>, vector<8x256xf32> -> vector<8x256xf32>
    %573 = arith.addf %570, %572 : vector<8x256xf32>
    %574 = vector.extract_strided_slice %573 {offsets = [0, 0], sizes = [8, 64], strides = [1, 1]} : vector<8x256xf32> to vector<8x64xf32>
    %575 = arith.negf %574 : vector<8x64xf32>
    %576 = math.exp %575 : vector<8x64xf32>
    %cst_202 = arith.constant 1.000000e+00 : f32
    %577 = vector.broadcast %cst_202 : f32 to vector<8x64xf32>
    %578 = arith.addf %577, %576 : vector<8x64xf32>
    %579 = arith.divf %577, %578 : vector<8x64xf32>
    %580 = vector.extract_strided_slice %573 {offsets = [0, 64], sizes = [8, 64], strides = [1, 1]} : vector<8x256xf32> to vector<8x64xf32>
    %581 = arith.negf %580 : vector<8x64xf32>
    %582 = math.exp %581 : vector<8x64xf32>
    %cst_203 = arith.constant 1.000000e+00 : f32
    %583 = vector.broadcast %cst_203 : f32 to vector<8x64xf32>
    %584 = arith.addf %583, %582 : vector<8x64xf32>
    %585 = arith.divf %583, %584 : vector<8x64xf32>
    %586 = vector.extract_strided_slice %573 {offsets = [0, 128], sizes = [8, 64], strides = [1, 1]} : vector<8x256xf32> to vector<8x64xf32>
    %587 = math.tanh %586 : vector<8x64xf32>
    %588 = vector.extract_strided_slice %573 {offsets = [0, 192], sizes = [8, 64], strides = [1, 1]} : vector<8x256xf32> to vector<8x64xf32>
    %589 = arith.negf %588 : vector<8x64xf32>
    %590 = math.exp %589 : vector<8x64xf32>
    %cst_204 = arith.constant 1.000000e+00 : f32
    %591 = vector.broadcast %cst_204 : f32 to vector<8x64xf32>
    %592 = arith.addf %591, %590 : vector<8x64xf32>
    %593 = arith.divf %591, %592 : vector<8x64xf32>
    %594 = arith.mulf %585, %561 : vector<8x64xf32>
    %595 = arith.mulf %579, %587 : vector<8x64xf32>
    %596 = arith.addf %594, %595 : vector<8x64xf32>
    %597 = math.tanh %596 : vector<8x64xf32>
    %598 = arith.mulf %593, %597 : vector<8x64xf32>
    %599 = vector.extract_strided_slice %598 {offsets = [0, 0], sizes = [8, 32], strides = [1, 1]} : vector<8x64xf32> to vector<8x32xf32>
    %c56_205 = arith.constant 56 : index
    %c0_206 = arith.constant 0 : index
    %600 = vector.load %arg13[%c56_205, %c0_206] : memref<64x64xf32, #tpu.memory_space<vmem>>, vector<8x32xf32>
    tpu.vector_store %arg13[%c56_205, %c0_206], %599 {strides = array<i32>} : memref<64x64xf32, #tpu.memory_space<vmem>>, vector<8x32xf32>,
    %601 = vector.extract_strided_slice %598 {offsets = [0, 32], sizes = [8, 32], strides = [1, 1]} : vector<8x64xf32> to vector<8x32xf32>
    %c0_207 = arith.constant 0 : index
    %c32_208 = arith.constant 32 : index
    %602 = vector.load %arg13[%c0_207, %c32_208] : memref<64x64xf32, #tpu.memory_space<vmem>>, vector<8x32xf32>
    tpu.vector_store %arg13[%c0_207, %c32_208], %601 {strides = array<i32>} : memref<64x64xf32, #tpu.memory_space<vmem>>, vector<8x32xf32>,
    %c0_209 = arith.constant 0 : index
    %c0_210 = arith.constant 0 : index
    %603 = vector.load %arg13[%c0_209, %c0_210] : memref<64x64xf32, #tpu.memory_space<vmem>>, vector<64x64xf32>
    %c0_211 = arith.constant 0 : index
    %c0_212 = arith.constant 0 : index
    %604 = vector.load %arg8[%c0_211, %c0_212] : memref<1x64xf32, #tpu.memory_space<vmem>>, vector<1x64xf32>
    %605 = vector.broadcast %604 : vector<1x64xf32> to vector<64x64xf32>
    %606 = arith.mulf %603, %605 : vector<64x64xf32>
    %cst_213 = arith.constant dense<0.000000e+00> : vector<64xf32>
    %607 = vector.multi_reduction <add>, %606, %cst_213 [1] : vector<64x64xf32> to vector<64xf32>
    %608 = vector.shape_cast %607 : vector<64xf32> to vector<64x1xf32>
    %609 = vector.extract_strided_slice %608 {offsets = [0, 0], sizes = [8, 1], strides = [1, 1]} : vector<64x1xf32> to vector<8x1xf32>
    %610 = vector.extract_strided_slice %608 {offsets = [8, 0], sizes = [8, 1], strides = [1, 1]} : vector<64x1xf32> to vector<8x1xf32>
    %611 = arith.maximumf %609, %610 : vector<8x1xf32>
    %612 = vector.extract_strided_slice %608 {offsets = [16, 0], sizes = [8, 1], strides = [1, 1]} : vector<64x1xf32> to vector<8x1xf32>
    %613 = arith.maximumf %611, %612 : vector<8x1xf32>
    %614 = vector.extract_strided_slice %608 {offsets = [24, 0], sizes = [8, 1], strides = [1, 1]} : vector<64x1xf32> to vector<8x1xf32>
    %615 = arith.maximumf %613, %614 : vector<8x1xf32>
    %616 = vector.extract_strided_slice %608 {offsets = [32, 0], sizes = [8, 1], strides = [1, 1]} : vector<64x1xf32> to vector<8x1xf32>
    %617 = arith.maximumf %615, %616 : vector<8x1xf32>
    %618 = vector.extract_strided_slice %608 {offsets = [40, 0], sizes = [8, 1], strides = [1, 1]} : vector<64x1xf32> to vector<8x1xf32>
    %619 = arith.maximumf %617, %618 : vector<8x1xf32>
    %620 = vector.extract_strided_slice %608 {offsets = [48, 0], sizes = [8, 1], strides = [1, 1]} : vector<64x1xf32> to vector<8x1xf32>
    %621 = arith.maximumf %619, %620 : vector<8x1xf32>
    %622 = vector.extract_strided_slice %608 {offsets = [56, 0], sizes = [8, 1], strides = [1, 1]} : vector<64x1xf32> to vector<8x1xf32>
    %623 = arith.maximumf %621, %622 : vector<8x1xf32>
    %cst_214 = arith.constant 0.000000e+00 : f32
    %624 = vector.broadcast %cst_214 : f32 to vector<8x1xf32>
    %cst_215 = arith.constant 0.000000e+00 : f32
    %625 = vector.broadcast %cst_215 : f32 to vector<8x64xf32>
    %626 = vector.extract_strided_slice %608 {offsets = [0, 0], sizes = [8, 1], strides = [1, 1]} : vector<64x1xf32> to vector<8x1xf32>
    %627 = arith.subf %626, %623 : vector<8x1xf32>
    %628 = math.exp %627 : vector<8x1xf32>
    %629 = arith.addf %624, %628 : vector<8x1xf32>
    %630 = vector.extract_strided_slice %603 {offsets = [0, 0], sizes = [8, 64], strides = [1, 1]} : vector<64x64xf32> to vector<8x64xf32>
    %631 = vector.broadcast %628 : vector<8x1xf32> to vector<8x64xf32>
    %632 = arith.mulf %631, %630 : vector<8x64xf32>
    %633 = arith.addf %625, %632 : vector<8x64xf32>
    %634 = vector.extract_strided_slice %608 {offsets = [8, 0], sizes = [8, 1], strides = [1, 1]} : vector<64x1xf32> to vector<8x1xf32>
    %635 = arith.subf %634, %623 : vector<8x1xf32>
    %636 = math.exp %635 : vector<8x1xf32>
    %637 = arith.addf %629, %636 : vector<8x1xf32>
    %638 = vector.extract_strided_slice %603 {offsets = [8, 0], sizes = [8, 64], strides = [1, 1]} : vector<64x64xf32> to vector<8x64xf32>
    %639 = vector.broadcast %636 : vector<8x1xf32> to vector<8x64xf32>
    %640 = arith.mulf %639, %638 : vector<8x64xf32>
    %641 = arith.addf %633, %640 : vector<8x64xf32>
    %642 = vector.extract_strided_slice %608 {offsets = [16, 0], sizes = [8, 1], strides = [1, 1]} : vector<64x1xf32> to vector<8x1xf32>
    %643 = arith.subf %642, %623 : vector<8x1xf32>
    %644 = math.exp %643 : vector<8x1xf32>
    %645 = arith.addf %637, %644 : vector<8x1xf32>
    %646 = vector.extract_strided_slice %603 {offsets = [16, 0], sizes = [8, 64], strides = [1, 1]} : vector<64x64xf32> to vector<8x64xf32>
    %647 = vector.broadcast %644 : vector<8x1xf32> to vector<8x64xf32>
    %648 = arith.mulf %647, %646 : vector<8x64xf32>
    %649 = arith.addf %641, %648 : vector<8x64xf32>
    %650 = vector.extract_strided_slice %608 {offsets = [24, 0], sizes = [8, 1], strides = [1, 1]} : vector<64x1xf32> to vector<8x1xf32>
    %651 = arith.subf %650, %623 : vector<8x1xf32>
    %652 = math.exp %651 : vector<8x1xf32>
    %653 = arith.addf %645, %652 : vector<8x1xf32>
    %654 = vector.extract_strided_slice %603 {offsets = [24, 0], sizes = [8, 64], strides = [1, 1]} : vector<64x64xf32> to vector<8x64xf32>
    %655 = vector.broadcast %652 : vector<8x1xf32> to vector<8x64xf32>
    %656 = arith.mulf %655, %654 : vector<8x64xf32>
    %657 = arith.addf %649, %656 : vector<8x64xf32>
    %658 = vector.extract_strided_slice %608 {offsets = [32, 0], sizes = [8, 1], strides = [1, 1]} : vector<64x1xf32> to vector<8x1xf32>
    %659 = arith.subf %658, %623 : vector<8x1xf32>
    %660 = math.exp %659 : vector<8x1xf32>
    %661 = arith.addf %653, %660 : vector<8x1xf32>
    %662 = vector.extract_strided_slice %603 {offsets = [32, 0], sizes = [8, 64], strides = [1, 1]} : vector<64x64xf32> to vector<8x64xf32>
    %663 = vector.broadcast %660 : vector<8x1xf32> to vector<8x64xf32>
    %664 = arith.mulf %663, %662 : vector<8x64xf32>
    %665 = arith.addf %657, %664 : vector<8x64xf32>
    %666 = vector.extract_strided_slice %608 {offsets = [40, 0], sizes = [8, 1], strides = [1, 1]} : vector<64x1xf32> to vector<8x1xf32>
    %667 = arith.subf %666, %623 : vector<8x1xf32>
    %668 = math.exp %667 : vector<8x1xf32>
    %669 = arith.addf %661, %668 : vector<8x1xf32>
    %670 = vector.extract_strided_slice %603 {offsets = [40, 0], sizes = [8, 64], strides = [1, 1]} : vector<64x64xf32> to vector<8x64xf32>
    %671 = vector.broadcast %668 : vector<8x1xf32> to vector<8x64xf32>
    %672 = arith.mulf %671, %670 : vector<8x64xf32>
    %673 = arith.addf %665, %672 : vector<8x64xf32>
    %674 = vector.extract_strided_slice %608 {offsets = [48, 0], sizes = [8, 1], strides = [1, 1]} : vector<64x1xf32> to vector<8x1xf32>
    %675 = arith.subf %674, %623 : vector<8x1xf32>
    %676 = math.exp %675 : vector<8x1xf32>
    %677 = arith.addf %669, %676 : vector<8x1xf32>
    %678 = vector.extract_strided_slice %603 {offsets = [48, 0], sizes = [8, 64], strides = [1, 1]} : vector<64x64xf32> to vector<8x64xf32>
    %679 = vector.broadcast %676 : vector<8x1xf32> to vector<8x64xf32>
    %680 = arith.mulf %679, %678 : vector<8x64xf32>
    %681 = arith.addf %673, %680 : vector<8x64xf32>
    %682 = vector.extract_strided_slice %608 {offsets = [56, 0], sizes = [8, 1], strides = [1, 1]} : vector<64x1xf32> to vector<8x1xf32>
    %683 = arith.subf %682, %623 : vector<8x1xf32>
    %684 = math.exp %683 : vector<8x1xf32>
    %685 = arith.addf %677, %684 : vector<8x1xf32>
    %686 = vector.extract_strided_slice %603 {offsets = [56, 0], sizes = [8, 64], strides = [1, 1]} : vector<64x64xf32> to vector<8x64xf32>
    %687 = vector.broadcast %684 : vector<8x1xf32> to vector<8x64xf32>
    %688 = arith.mulf %687, %686 : vector<8x64xf32>
    %689 = arith.addf %681, %688 : vector<8x64xf32>
    %690 = vector.broadcast %685 : vector<8x1xf32> to vector<8x64xf32>
    %691 = arith.divf %689, %690 : vector<8x64xf32>
    %692 = arith.truncf %691 : vector<8x64xf32> to vector<8x64xbf16>
    %c0_216 = arith.constant 0 : index
    %c0_217 = arith.constant 0 : index
    %693 = vector.load %arg9[%c0_216, %c0_217] : memref<64x4xbf16, #tpu.memory_space<vmem>>, vector<64x4xbf16>
    %cst_218 = arith.constant dense<0.000000e+00> : vector<8x4xf32>
    %694 = tpu.matmul %692, %693, %cst_218 {dimension_numbers = #tpu.dot_dimension_numbers<[1], [0], [0], [1], [0, 0, 1, 1], [], []>} : vector<8x64xbf16>, vector<64x4xbf16>, vector<8x4xf32> -> vector<8x4xf32>
    %c0_219 = arith.constant 0 : index
    %c0_220 = arith.constant 0 : index
    %695 = vector.load %arg10[%c0_219, %c0_220] : memref<1x4xf32, #tpu.memory_space<vmem>>, vector<1x4xf32>
    %696 = vector.broadcast %695 : vector<1x4xf32> to vector<8x4xf32>
    %697 = arith.addf %694, %696 : vector<8x4xf32>
    %c0_221 = arith.constant 0 : index
    %c0_222 = arith.constant 0 : index
    %698 = vector.load %arg11[%c0_221, %c0_222] : memref<8x4xf32, #tpu.memory_space<vmem>>, vector<8x4xf32>
    tpu.vector_store %arg11[%c0_221, %c0_222], %697 {strides = array<i32>} : memref<8x4xf32, #tpu.memory_space<vmem>>, vector<8x4xf32>,
    return
  }
  func.func @transform_0(%arg0: i32) -> (i32, i32) {
    %c0_i32 = arith.constant 0 : i32
    %c0_i32_0 = arith.constant 0 : i32
    %c0_i32_1 = arith.constant 0 : i32
    return %c0_i32, %c0_i32_0 : i32, i32
  }
  func.func @transform_1(%arg0: i32) -> (i32, i32) {
    %c0_i32 = arith.constant 0 : i32
    %c0_i32_0 = arith.constant 0 : i32
    %c0_i32_1 = arith.constant 0 : i32
    return %c0_i32, %c0_i32_0 : i32, i32
  }
  func.func @transform_2(%arg0: i32) -> (i32, i32) {
    %c0_i32 = arith.constant 0 : i32
    %c0_i32_0 = arith.constant 0 : i32
    %c0_i32_1 = arith.constant 0 : i32
    return %c0_i32, %c0_i32_0 : i32, i32
  }
  func.func @transform_3(%arg0: i32) -> (i32, i32) {
    %c0_i32 = arith.constant 0 : i32
    %c0_i32_0 = arith.constant 0 : i32
    %c0_i32_1 = arith.constant 0 : i32
    return %c0_i32, %c0_i32_0 : i32, i32
  }
  func.func @transform_4(%arg0: i32) -> (i32, i32) {
    %c0_i32 = arith.constant 0 : i32
    %c0_i32_0 = arith.constant 0 : i32
    %c0_i32_1 = arith.constant 0 : i32
    return %c0_i32, %c0_i32_0 : i32, i32
  }
  func.func @transform_5(%arg0: i32) -> (i32, i32) {
    %c0_i32 = arith.constant 0 : i32
    %c0_i32_0 = arith.constant 0 : i32
    %c0_i32_1 = arith.constant 0 : i32
    return %c0_i32, %c0_i32_0 : i32, i32
  }
  func.func @transform_6(%arg0: i32) -> (i32, i32) {
    %c0_i32 = arith.constant 0 : i32
    %c0_i32_0 = arith.constant 0 : i32
    %c0_i32_1 = arith.constant 0 : i32
    return %c0_i32, %c0_i32_0 : i32, i32
  }
  func.func @transform_7(%arg0: i32) -> (i32, i32) {
    %c0_i32 = arith.constant 0 : i32
    %c0_i32_0 = arith.constant 0 : i32
    %c0_i32_1 = arith.constant 0 : i32
    return %c0_i32, %c0_i32_0 : i32, i32
  }
  func.func @transform_8(%arg0: i32) -> (i32, i32) {
    %c0_i32 = arith.constant 0 : i32
    %c0_i32_0 = arith.constant 0 : i32
    %c0_i32_1 = arith.constant 0 : i32
    return %c0_i32, %c0_i32_0 : i32, i32
  }
  func.func @transform_9(%arg0: i32) -> (i32, i32) {
    %c0_i32 = arith.constant 0 : i32
    %c0_i32_0 = arith.constant 0 : i32
    %c0_i32_1 = arith.constant 0 : i32
    return %c0_i32, %c0_i32_0 : i32, i32
  }
  func.func @transform_10(%arg0: i32) -> (i32, i32) {
    %c0_i32 = arith.constant 0 : i32
    %c0_i32_0 = arith.constant 0 : i32
    %c0_i32_1 = arith.constant 0 : i32
    return %c0_i32, %c0_i32_0 : i32, i32
  }
}

</mosaic_0001>

<bundles_post_ra>
// kernel: lstm_model_forward.1
= control target key start
LH: loop header
LB: loop body
LE: loop exit
PB: predicated region body
PF: predicated region fallthrough
CT: control target
= control target key end

     0   :  { %15 = vsyncpa [#allocation5], 0  ;;  %s2593_s16 = smov [#allocation4]   ;;  %s2594_s18 = smov 128   ;;  %s3565_s0 = inlined_call_operand.vmem [shape: f32[64,8], index: 0, kind: input, shape index: {}]   ;;  %s3566_s1 = inlined_call_operand.vmem [shape: bf16[8,256], index: 1, kind: input, shape index: {}]   ;;  %s3567_s2 = inlined_call_operand.vmem [shape: bf16[64,256], index: 2, kind: input, shape index: {}]   ;;  %s3568_s3 = inlined_call_operand.vmem [shape: f32[1,256], index: 3, kind: input, shape index: {}]   ;;  %s3569_s4 = inlined_call_operand.vmem [shape: bf16[64,256], index: 4, kind: input, shape index: {}]   ;;  %s3570_s5 = inlined_call_operand.hbm [shape: bf16[64,256], index: 5, kind: input, shape index: {}]   ;;  %s3571_s6 = inlined_call_operand.vmem [shape: f32[1,256], index: 6, kind: input, shape index: {}]   ;;  %s3572_s7 = inlined_call_operand.vmem [shape: f32[1,64], index: 7, kind: input, shape index: {}]   ;;  %s3573_s8 = inlined_call_operand.vmem [shape: bf16[64,4], index: 8, kind: input, shape index: {}]   ;;  %s3574_s9 = inlined_call_operand.vmem [shape: f32[1,4], index: 9, kind: input, shape index: {}]   ;;  %s3575_s10 = inlined_call_operand.vmem [shape: f32[8,4], index: 10, kind: output, shape index: {}]  }
   0x1   :  { %s30_s15 = sshll.u32 %s3570_s5, 4  ;;  %s32_s17 = sshll.u32 %s2593_s16, 4  ;;  %s31_s15 = int_to_ptr.hbm [resolvable:$true] %s30_s15  ;;  %s33_s17 = int_to_ptr.vmem [resolvable:$true] %s32_s17 }
   0x2   :  { %s2595_s19 = smov 8  }
   0x3   :  { %38 = dma.hbm_to_vmem [thread:$0]  %s31_s15, 1024, %s33_s17, [#allocation5], %s2594_s18, %s2594_s18, %s2595_s19  }
   0x4   :  { %2591 = dma.done.wait [#allocation5], 1024  }
   0x5   :  { %2592 = vsyncadd [#allocation5], 4294966272  ;;  %v81_v0 = vld [vmem:[%s3566_s1] sm:$0xff]  ;;  %v2167_v3 = vld [vmem:[%s3567_s2 + $0x30] sm:$0xf]  ;;  %vm126_vm0 = vcmask 1043456   ;;  %v52_v54 = vlaneseq }
   0x6   :  { %v109_v1 = vunpack.c.l.b16 %v81_v0  ;;  %v110_v2 = vunpack.c.h.b16 %v81_v0  ;;  %v91_v4 = vld [vmem:[%s3565_s0] sm:$0xff]  ;;  %v92_v5 = vld [vmem:[%s3565_s0 + $0x8] sm:$0xff]  ;;  %v2329_v6 = vld [vmem:[%s3567_s2 + $0x34] sm:$0xf0]  ;;  %vm113_vm1 = vcmask 64512   ;;  %v2596_v34 = vmov 0  }
   0x7   :  { %v2671_v9 = vor.u32 %v2329_v6, %v2167_v3  ;;  %v99_v12 = vpack.c.bf16 %v92_v5, %v91_v4  ;;  %v2159_v13 = vld [vmem:[%s3567_s2 + $0x20] sm:$0xf]  ;;  %v2327_v14 = vld [vmem:[%s3567_s2 + $0x24] sm:$0xf0]  ;;  %v2151_v16 = vld [vmem:[%s3567_s2 + $0x10] sm:$0xf] }
   0x8   :  { %v111_v7 = vpack.c.b16 %v109_v1, %v109_v1  ;;  %v112_v8 = vpack.c.b16 %v110_v2, %v110_v2  ;;  %v2683_v15 = vor.u32 %v2327_v14, %v2159_v13  ;;  %v2325_v17 = vld [vmem:[%s3567_s2 + $0x14] sm:$0xf0]  ;;  %v2328_v18 = vld [vmem:[%s3567_s2 + $0x34] sm:$0xf]  ;;  %v2169_v19 = vld [vmem:[%s3567_s2 + $0x38] sm:$0xf0] }
   0x9   :  { %261 = vmatpush.bf16.msra.mxu2 %v2671_v9  ;;  %v2698_v20 = vor.u32 %v2325_v17, %v2151_v16  ;;  %v2700_v21 = vor.u32 %v2328_v18, %v2169_v19  ;;  %v2326_v22 = vld [vmem:[%s3567_s2 + $0x24] sm:$0xf]  ;;  %v2161_v23 = vld [vmem:[%s3567_s2 + $0x28] sm:$0xf0]  ;;  %v2143_v24 = vld [vmem:[%s3567_s2] sm:$0xf] }
   0xa   :  { %v128_v10 = vsel %vm126_vm0, %v111_v7, 0  ;;  %v131_v11 = vsel %vm126_vm0, %v112_v8, 0  ;;  %v2323_v25 = vld [vmem:[%s3567_s2 + $0x4] sm:$0xf0]  ;;  %v2716_v26 = vor.u32 %v2326_v22, %v2161_v23  ;;  %v2324_v27 = vld [vmem:[%s3567_s2 + $0x14] sm:$0xf] }
   0xb   :  { %140 = vmatpush.bf16.msra.mxu0 %v128_v10  ;;  %169 = vmatpush.bf16.msra.mxu1 %v131_v11  ;;  %v2153_v28 = vld [vmem:[%s3567_s2 + $0x18] sm:$0xf0]  ;;  %v2726_v29 = vor.u32 %v2323_v25, %v2143_v24  ;;  %v93_v31 = vld [vmem:[%s3565_s0 + $0x10] sm:$0xff]  ;;  %v2322_v35 = vld [vmem:[%s3567_s2 + $0x4] sm:$0xf]  ;;  %v53_v58 = vand.u32 127, %v52_v54 }
   0xc   :  { %274 = vmatpush.bf16.msra.mxu3 %v2700_v21  ;;  %v2730_v30 = vor.u32 %v2324_v27, %v2153_v28  ;;  %v94_v32 = vld [vmem:[%s3565_s0 + $0x18] sm:$0xff]  ;;  %v2145_v36 = vld [vmem:[%s3567_s2 + $0x8] sm:$0xf0]  ;;  %v95_v38 = vld [vmem:[%s3565_s0 + $0x20] sm:$0xff] }
   0xd   :  { %262 = vmatpush.bf16.msra.mxu2 %v2683_v15  ;;  %v100_v33 = vpack.c.bf16 %v94_v32, %v93_v31  ;;  %v2756_v37 = vor.u32 %v2322_v35, %v2145_v36  ;;  %v96_v39 = vld [vmem:[%s3565_s0 + $0x28] sm:$0xff]  ;;  %v97_v41 = vld [vmem:[%s3565_s0 + $0x30] sm:$0xff]  ;;  %v98_v42 = vld [vmem:[%s3565_s0 + $0x38] sm:$0xff]  ;;  %v54_v59 = vadd.s32 128, %v53_v58  ;;  %vm57_vm2 = vcmp.ge.s32.totalorder %v53_v58, 64  ;;  %s2597_s0 = smov 64  }
   0xe   :  { %2133 = vmatmul.msk.bf16.vlgmr.msra.gmra.mxu0 %vm113_vm1, %v99_v12  ;;  %2137 = vmatmul.msk.bf16.vlgmr.msra.gmra.mxu1 %vm113_vm1, %v99_v12  ;;  %v101_v40 = vpack.c.bf16 %v96_v39, %v95_v38  ;;  %v102_v43 = vpack.c.bf16 %v98_v42, %v97_v41  ;;  %v90_v46 = vld [vmem:[%s3568_s3] sm:$0x3]  ;;  %vm59_vm3 = vcmp.lt.s32.totalorder %v53_v58, 96  ;;  %vm55_vm6 = vcmp.lt.s32.totalorder %v53_v58, 32 }
   0xf   :  { %643 = vmatpush.bf16.msrb.mxu0 %v2671_v9  ;;  %656 = vmatpush.bf16.msrb.mxu1 %v2700_v21  ;;  %v105_v47 = vperm.slane %v90_v46, 1  ;;  %v104_v51 = vperm.slane %v90_v46, 0  ;;  %vm74_vm4 = vcmp.ge.s32.totalorder %v54_v59, 192  ;;  %vm76_vm5 = vcmp.lt.s32.totalorder %v54_v59, 224  ;;  %vm61_vm7 = vmand %vm57_vm2, %vm59_vm3 }
  0x10   :  { %275 = vmatpush.bf16.msra.mxu3 %v2716_v26  ;;  %vm68_vm8 = vcmp.lt.s32.totalorder %v54_v59, 160  ;;  %vm78_vm9 = vmand %vm74_vm4, %vm76_vm5  ;;  %vm253_vm4 = vcmask 523264  }
  0x11   :  { %263 = vmatpush.bf16.msra.mxu2 %v2698_v20  ;;  %vm2810_vm10 = vmor %vm55_vm6, %vm61_vm7 }
  0x12   :  { %vm2814_vm11 = vmor %vm68_vm8, %vm78_vm9 }
  0x13   :  { %644 = vmatpush.bf16.msrb.mxu0 %v2683_v15  ;;  %657 = vmatpush.bf16.msrb.mxu1 %v2716_v26 }
  0x14   :  { %276 = vmatpush.bf16.msra.mxu3 %v2730_v30 }
  0x15   :  { %264 = vmatpush.bf16.msra.mxu2 %v2726_v29 }
  0x17   :  { %645 = vmatpush.bf16.msrb.mxu0 %v2698_v20  ;;  %658 = vmatpush.bf16.msrb.mxu1 %v2730_v30 }
  0x18   :  { %265 = vmatmul.bf16.vlgmr.msra.gmra.mxu2 %v2596_v34  ;;  %277 = vmatpush.bf16.msra.mxu3 %v2756_v37 }
  0x19   :  { %358 = vmatpush.bf16.msrb.mxu2 %v2671_v9 }
  0x1b   :  { %646 = vmatpush.bf16.msrb.mxu0 %v2726_v29  ;;  %659 = vmatpush.bf16.msrb.mxu1 %v2756_v37 }
  0x1c   :  { %371 = vmatpush.bf16.msrb.mxu3 %v2700_v21 }
  0x1d   :  { %359 = vmatpush.bf16.msrb.mxu2 %v2683_v15  ;;  %278 = vmatmul.bf16.vlgmr.msra.gmra.mxu3 %v2596_v34 }
  0x1e   :  { %2134 = vmatmul.msk.bf16.gmra.mxu0 %vm113_vm1, %v100_v33  ;;  %2138 = vmatmul.msk.bf16.gmra.mxu1 %vm113_vm1, %v100_v33 }
  0x1f   :  { %833 = vmatpush.bf16.msra.mxu0 %v2671_v9  ;;  %846 = vmatpush.bf16.msra.mxu1 %v2700_v21 }
  0x20   :  { %372 = vmatpush.bf16.msrb.mxu3 %v2716_v26 }
  0x21   :  { %360 = vmatpush.bf16.msrb.mxu2 %v2698_v20 }
  0x23   :  { %834 = vmatpush.bf16.msra.mxu0 %v2683_v15  ;;  %847 = vmatpush.bf16.msra.mxu1 %v2716_v26 }
  0x24   :  { %373 = vmatpush.bf16.msrb.mxu3 %v2730_v30 }
  0x25   :  { %361 = vmatpush.bf16.msrb.mxu2 %v2726_v29 }
  0x27   :  { %835 = vmatpush.bf16.msra.mxu0 %v2698_v20  ;;  %848 = vmatpush.bf16.msra.mxu1 %v2730_v30 }
  0x28   :  { %374 = vmatpush.bf16.msrb.mxu3 %v2756_v37 }
  0x29   :  { %453 = vmatpush.bf16.msra.mxu2 %v2671_v9 }
  0x2b   :  { %836 = vmatpush.bf16.msra.mxu0 %v2726_v29  ;;  %849 = vmatpush.bf16.msra.mxu1 %v2756_v37 }
  0x2c   :  { %466 = vmatpush.bf16.msra.mxu3 %v2700_v21 }
  0x2d   :  { %454 = vmatpush.bf16.msra.mxu2 %v2683_v15 }
  0x2e   :  { %2135 = vmatmul.msk.bf16.gmra.mxu0 %vm113_vm1, %v101_v40  ;;  %2139 = vmatmul.msk.bf16.gmra.mxu1 %vm113_vm1, %v101_v40 }
  0x30   :  { %467 = vmatpush.bf16.msra.mxu3 %v2716_v26 }
  0x31   :  { %455 = vmatpush.bf16.msra.mxu2 %v2698_v20 }
  0x34   :  { %468 = vmatpush.bf16.msra.mxu3 %v2730_v30 }
  0x35   :  { %456 = vmatpush.bf16.msra.mxu2 %v2726_v29 }
  0x38   :  { %469 = vmatpush.bf16.msra.mxu3 %v2756_v37 }
  0x3e   :  { %2136 = vmatmul.msk.bf16.gmra.mxu0 %vm113_vm1, %v102_v43  ;;  %2140 = vmatmul.msk.bf16.gmra.mxu1 %vm113_vm1, %v102_v43 }
  0x8b   :  { %v142_v44 = vpop.f32.mrf.mxu0  ;;  %v171_v45 = vpop.f32.mrf.mxu1 }
  0x8c   :  { %v2880_v41 = vadd.f32 %v142_v44, %v104_v51  ;;  %v2882_v42 = vadd.f32 %v171_v45, %v105_v47 }
  0x93   :  { %v144_v48 = vpop.f32.mrf.mxu0  ;;  %v173_v49 = vpop.f32.mrf.mxu1 }
  0x94   :  { %v2800_v50 = vadd.f32 %v173_v49, %v105_v47  ;;  %v2858_v28 = vadd.f32 %v144_v48, %v104_v51 }
  0x9b   :  { %v147_v52 = vpop.f32.mrf.mxu0  ;;  %v176_v53 = vpop.f32.mrf.mxu1 }
  0x9c   :  { %v2802_v55 = vadd.f32 %v147_v52, %v104_v51  ;;  %v2804_v56 = vadd.f32 %v176_v53, %v105_v47  ;;  %v266_v57 = vpop.f32.mrf.mxu2 }
  0xa0   :  { %v279_v1 = vpop.f32.mrf.mxu3 }
  0xa3   :  { %v149_v60 = vpop.f32.mrf.mxu0  ;;  %v178_v61 = vpop.f32.mrf.mxu1 }
  0xa4   :  { %v2806_v62 = vadd.f32 %v149_v60, %v104_v51  ;;  %v2808_v63 = vadd.f32 %v178_v61, %v105_v47  ;;  %v268_v0 = vpop.f32.mrf.mxu2 }
  0xa8   :  { %v281_v8 = vpop.f32.mrf.mxu3 }
  0xab   :  { %v152_v3 = vpop.f32.mrf.mxu0  ;;  %v181_v4 = vpop.f32.mrf.mxu1 }
  0xac   :  { %v2818_v6 = vadd.f32 %v152_v3, %v104_v51  ;;  %v2820_v7 = vadd.f32 %v181_v4, %v105_v47 }
  0xae   :  { %v535_v10 = vsel %vm2810_vm10, %v2806_v62, %v2818_v6  ;;  %v536_v11 = vsel %vm2814_vm11, %v2808_v63, %v2820_v7  ;;  %v630_v12 = vsel %vm2810_vm10, %v2818_v6, %v2806_v62  ;;  %v631_v13 = vsel %vm2814_vm11, %v2820_v7, %v2808_v63 }
  0xb3   :  { %v154_v14 = vpop.f32.mrf.mxu0  ;;  %v183_v16 = vpop.f32.mrf.mxu1 }
  0xb4   :  { %v2838_v17 = vadd.f32 %v154_v14, %v104_v51  ;;  %v2840_v18 = vadd.f32 %v183_v16, %v105_v47 }
  0xb6   :  { %v440_v19 = vsel %vm2810_vm10, %v2802_v55, %v2838_v17  ;;  %v441_v22 = vsel %vm2814_vm11, %v2804_v56, %v2840_v18  ;;  %v725_v23 = vsel %vm2810_vm10, %v2838_v17, %v2802_v55  ;;  %v726_v24 = vsel %vm2814_vm11, %v2840_v18, %v2804_v56 }
  0xbb   :  { %v157_v25 = vpop.f32.mrf.mxu0  ;;  %v186_v27 = vpop.f32.mrf.mxu1 }
  0xbc   :  { %v2860_v31 = vadd.f32 %v157_v25, %v104_v51  ;;  %v2862_v32 = vadd.f32 %v186_v27, %v105_v47 }
  0xbe   :  { %v345_v33 = vsel %vm2810_vm10, %v2858_v28, %v2860_v31  ;;  %v346_v35 = vsel %vm2814_vm11, %v2800_v50, %v2862_v32  ;;  %v820_v36 = vsel %vm2810_vm10, %v2860_v31, %v2858_v28  ;;  %v821_v38 = vsel %vm2814_vm11, %v2862_v32, %v2800_v50 }
  0xc3   :  { %v159_v39 = vpop.f32.mrf.mxu0  ;;  %v188_v40 = vpop.f32.mrf.mxu1 }
  0xc4   :  { %v2884_v43 = vadd.f32 %v159_v39, %v104_v51  ;;  %v2886_v46 = vadd.f32 %v188_v40, %v105_v47 }
  0xc6   :  { %v211_v48 = vsel %vm2810_vm10, %v2880_v41, %v2884_v43  ;;  %v915_v49 = vsel %vm2810_vm10, %v2884_v43, %v2880_v41  ;;  %v916_v44 = vsel %vm2814_vm11, %v2886_v46, %v2882_v42  ;;  %v212_v53 = vsel %vm2814_vm11, %v2882_v42, %v2886_v46 }
  0xc7   :  { %v283_v45 = vadd.f32 %v266_v57, %v211_v48  ;;  %v284_v58 = vadd.f32 %v279_v1, %v212_v53 }
  0xc9   :  { %v2173_v51 = vmul.f32 -1.442695, %v283_v45  ;;  %v2174_v1 = vmul.f32 -1.442695, %v284_v58 }
  0xcb   :  { %2357 = vpow2.f32 %v2173_v51 }
  0xd1   :  { %v2358_v47 = vpop.eup %2357 }
  0xd2   :  { %v288_v52 = vadd.f32 1.0, %v2358_v47 }
  0xd4   :  { %2359 = vrcp.f32 %v288_v52  ;;  %v300_v61 = vand.u32 2147483648, %v288_v52  ;;  %v298_v3 = vand.u32 2147483647, %v288_v52  ;;  %vm294_vm13 = vweird.f32 %v288_v52 }
  0xd5   :  { %2361 = vtanh.f32 %v284_v58 }
  0xd6   :  { %v301_v4 = vor.u32 1.1754944e-38, %v300_v61  ;;  %vm299_vm15 = vcmp.eq.f32.partialorder %v298_v3, 8.507059e+37  ;;  %2363 = vpow2.f32 %v2174_v1 }
  0xda   :  { %v2360_v54 = vpop.eup %2359 }
  0xdb   :  { %v290_v59 = vmul.f32 %v2360_v54, %v288_v52  ;;  %vm295_vm12 = vweird.f32 %v2360_v54  ;;  %v2362_v14 = vpop.eup %2361 }
  0xdc   :  { %vm296_vm14 = vmor %vm294_vm13, %vm295_vm12  ;;  %v2364_v27 = vpop.eup %2363 }
  0xdd   :  { %v291_v60 = vsub.f32 1.0, %v290_v59  ;;  %v308_v39 = vadd.f32 1.0, %v2364_v27 }
  0xdf   :  { %v292_v0 = vmul.f32 %v2360_v54, %v291_v60  ;;  %2365 = vrcp.f32 %v308_v39  ;;  %v320_v59 = vand.u32 2147483648, %v308_v39  ;;  %vm314_vm1 = vweird.f32 %v308_v39 }
  0xe0   :  { %v318_v60 = vand.u32 2147483647, %v308_v39 }
  0xe1   :  { %v293_v57 = vadd.f32 %v2360_v54, %v292_v0  ;;  %v321_v61 = vor.u32 1.1754944e-38, %v320_v59 }
  0xe2   :  { %vm319_vm3 = vcmp.eq.f32.partialorder %v318_v60, 8.507059e+37 }
  0xe3   :  { %v297_v8 = vsel %vm296_vm14, %v2360_v54, %v293_v57 }
  0xe4   :  { %v302_v16 = vsel %vm299_vm15, %v301_v4, %v297_v8 }
  0xe5   :  { %v325_v25 = vmul.f32 %v2362_v14, %v302_v16  ;;  %v2366_v40 = vpop.eup %2365  ;;  %v324_v47 = vmul.f32 0.0, %v302_v16 }
  0xe6   :  { %v310_v48 = vmul.f32 %v2366_v40, %v308_v39  ;;  %vm315_vm0 = vweird.f32 %v2366_v40 }
  0xe7   :  { %327 = vrot.lane.b32.xlu0 %v325_v25, %s2597_s0  ;;  %vm316_vm2 = vmor %vm314_vm1, %vm315_vm0 }
  0xe8   :  { %v311_v45 = vsub.f32 1.0, %v310_v48 }
  0xea   :  { %v312_v51 = vmul.f32 %v2366_v40, %v311_v45 }
  0xec   :  { %v313_v54 = vadd.f32 %v2366_v40, %v312_v51 }
  0xee   :  { %v317_v58 = vsel %vm316_vm2, %v2366_v40, %v313_v54 }
  0xef   :  { %v322_v3 = vsel %vm319_vm3, %v321_v61, %v317_v58 }
 0x159   :  { %v328_v52 = vpop.permute.xlu0 %327 }
 0x15a   :  { %v2905_v53 = vadd.f32 %v328_v52, %v324_v47 }
 0x15c   :  { %2367 = vtanh.f32 %v2905_v53 }
 0x162   :  { %v2368_v0 = vpop.eup %2367 }
 0x163   :  { %v2908_v57 = vmul.f32 %v2368_v0, %v322_v3 }
 0x165   :  { %v347_v4 = vpack.c.bf16 %v2908_v57, %v2908_v57 }
 0x167   :  { %349 = vrot.lane.b32.xlu0 %v347_v4, %s2597_s0 }
 0x1d9   :  { %v350_v8 = vpop.permute.xlu0 %349 }
 0x1da   :  { %2175 = vmatmul.msk.bf16.vlgmr.msrb.gmra.mxu2 %vm253_vm4, %v350_v8  ;;  %2176 = vmatmul.msk.bf16.vlgmr.msrb.gmra.mxu3 %vm253_vm4, %v350_v8 }
 0x1db   :  { %548 = vmatpush.bf16.msrb.mxu2 %v2671_v9  ;;  %561 = vmatpush.bf16.msrb.mxu3 %v2700_v21 }
 0x1df   :  { %549 = vmatpush.bf16.msrb.mxu2 %v2683_v15  ;;  %562 = vmatpush.bf16.msrb.mxu3 %v2716_v26 }
 0x1e3   :  { %550 = vmatpush.bf16.msrb.mxu2 %v2698_v20  ;;  %563 = vmatpush.bf16.msrb.mxu3 %v2730_v30 }
 0x1e7   :  { %551 = vmatpush.bf16.msrb.mxu2 %v2726_v29  ;;  %564 = vmatpush.bf16.msrb.mxu3 %v2756_v37 }
 0x25d   :  { %v363_v14 = vpop.f32.mrf.mxu2  ;;  %v376_v16 = vpop.f32.mrf.mxu3 }
 0x25e   :  { %v380_v25 = vadd.f32 %v363_v14, %v345_v33  ;;  %v381_v51 = vadd.f32 %v376_v16, %v346_v35 }
 0x260   :  { %v2177_v1 = vmul.f32 -1.442695, %v380_v25  ;;  %v2178_v8 = vmul.f32 -1.442695, %v381_v51 }
 0x262   :  { %2369 = vpow2.f32 %v2177_v1 }
 0x265   :  { %v365_v27 = vpop.f32.mrf.mxu2  ;;  %v378_v39 = vpop.f32.mrf.mxu3 }
 0x268   :  { %v2370_v40 = vpop.eup %2369 }
 0x269   :  { %v385_v48 = vadd.f32 1.0, %v2370_v40 }
 0x26b   :  { %2371 = vrcp.f32 %v385_v48  ;;  %v397_v54 = vand.u32 2147483648, %v385_v48  ;;  %v395_v33 = vand.u32 2147483647, %v385_v48  ;;  %vm391_vm6 = vweird.f32 %v385_v48 }
 0x26c   :  { %2373 = vtanh.f32 %v381_v51 }
 0x26d   :  { %v398_v58 = vor.u32 1.1754944e-38, %v397_v54  ;;  %vm396_vm8 = vcmp.eq.f32.partialorder %v395_v33, 8.507059e+37  ;;  %2375 = vpow2.f32 %v2178_v8 }
 0x271   :  { %v2372_v45 = vpop.eup %2371 }
 0x272   :  { %v387_v47 = vmul.f32 %v2372_v45, %v385_v48  ;;  %vm392_vm5 = vweird.f32 %v2372_v45  ;;  %v2374_v0 = vpop.eup %2373 }
 0x273   :  { %vm393_vm7 = vmor %vm391_vm6, %vm392_vm5  ;;  %v2376_v35 = vpop.eup %2375 }
 0x274   :  { %v388_v52 = vsub.f32 1.0, %v387_v47  ;;  %v405_v14 = vadd.f32 1.0, %v2376_v35 }
 0x276   :  { %v389_v59 = vmul.f32 %v2372_v45, %v388_v52  ;;  %2377 = vrcp.f32 %v405_v14  ;;  %v417_v47 = vand.u32 2147483648, %v405_v14  ;;  %vm411_vm12 = vweird.f32 %v405_v14 }
 0x277   :  { %v415_v51 = vand.u32 2147483647, %v405_v14 }
 0x278   :  { %v390_v60 = vadd.f32 %v2372_v45, %v389_v59  ;;  %v418_v54 = vor.u32 1.1754944e-38, %v417_v47 }
 0x279   :  { %vm416_vm14 = vcmp.eq.f32.partialorder %v415_v51, 8.507059e+37 }
 0x27a   :  { %v394_v61 = vsel %vm393_vm7, %v2372_v45, %v390_v60 }
 0x27b   :  { %v399_v3 = vsel %vm396_vm8, %v398_v58, %v394_v61 }
 0x27c   :  { %v422_v4 = vmul.f32 %v2374_v0, %v399_v3  ;;  %v2378_v16 = vpop.eup %2377  ;;  %v421_v39 = vmul.f32 %v399_v3, %v2905_v53 }
 0x27d   :  { %v407_v25 = vmul.f32 %v2378_v16, %v405_v14  ;;  %vm412_vm9 = vweird.f32 %v2378_v16 }
 0x27e   :  { %424 = vrot.lane.b32.xlu1 %v422_v4, %s2597_s0  ;;  %vm413_vm13 = vmor %vm411_vm12, %vm412_vm9 }
 0x27f   :  { %v408_v1 = vsub.f32 1.0, %v407_v25 }
 0x281   :  { %v409_v27 = vmul.f32 %v2378_v16, %v408_v1 }
 0x283   :  { %v410_v45 = vadd.f32 %v2378_v16, %v409_v27 }
 0x285   :  { %v414_v52 = vsel %vm413_vm13, %v2378_v16, %v410_v45 }
 0x286   :  { %v419_v33 = vsel %vm416_vm14, %v418_v54, %v414_v52 }
 0x2f0   :  { %v425_v40 = vpop.permute.xlu1 %424 }
 0x2f1   :  { %v2935_v48 = vadd.f32 %v425_v40, %v421_v39 }
 0x2f3   :  { %2379 = vtanh.f32 %v2935_v48 }
 0x2f9   :  { %v2380_v59 = vpop.eup %2379 }
 0x2fa   :  { %v2938_v60 = vmul.f32 %v2380_v59, %v419_v33 }
 0x2fc   :  { %v442_v53 = vpack.c.bf16 %v2938_v60, %v2938_v60 }
 0x2fe   :  { %444 = vrot.lane.b32.xlu1 %v442_v53, %s2597_s0 }
 0x370   :  { %v445_v58 = vpop.permute.xlu1 %444 }
 0x371   :  { %2179 = vmatmul.msk.bf16.vlgmr.msra.gmra.mxu2 %vm253_vm4, %v445_v58  ;;  %2180 = vmatmul.msk.bf16.vlgmr.msra.gmra.mxu3 %vm253_vm4, %v445_v58 }
 0x372   :  { %738 = vmatpush.bf16.msra.mxu2 %v2671_v9  ;;  %751 = vmatpush.bf16.msra.mxu3 %v2700_v21 }
 0x376   :  { %739 = vmatpush.bf16.msra.mxu2 %v2683_v15  ;;  %752 = vmatpush.bf16.msra.mxu3 %v2716_v26 }
 0x37a   :  { %740 = vmatpush.bf16.msra.mxu2 %v2698_v20  ;;  %753 = vmatpush.bf16.msra.mxu3 %v2730_v30 }
 0x37e   :  { %741 = vmatpush.bf16.msra.mxu2 %v2726_v29  ;;  %754 = vmatpush.bf16.msra.mxu3 %v2756_v37 }
 0x3f4   :  { %v458_v61 = vpop.f32.mrf.mxu2  ;;  %v471_v0 = vpop.f32.mrf.mxu3 }
 0x3f5   :  { %v475_v3 = vadd.f32 %v458_v61, %v440_v19  ;;  %v476_v1 = vadd.f32 %v471_v0, %v441_v22 }
 0x3f7   :  { %v2181_v4 = vmul.f32 -1.442695, %v475_v3  ;;  %v2182_v53 = vmul.f32 -1.442695, %v476_v1 }
 0x3f9   :  { %2381 = vpow2.f32 %v2181_v4 }
 0x3fc   :  { %v460_v8 = vpop.f32.mrf.mxu2  ;;  %v473_v35 = vpop.f32.mrf.mxu3 }
 0x3ff   :  { %v2382_v14 = vpop.eup %2381 }
 0x400   :  { %v480_v16 = vadd.f32 1.0, %v2382_v14 }
 0x402   :  { %2383 = vrcp.f32 %v480_v16  ;;  %v492_v40 = vand.u32 2147483648, %v480_v16  ;;  %v490_v19 = vand.u32 2147483647, %v480_v16  ;;  %vm486_vm0 = vweird.f32 %v480_v16 }
 0x403   :  { %2385 = vtanh.f32 %v476_v1 }
 0x404   :  { %v493_v51 = vor.u32 1.1754944e-38, %v492_v40  ;;  %vm491_vm2 = vcmp.eq.f32.partialorder %v490_v19, 8.507059e+37  ;;  %2387 = vpow2.f32 %v2182_v53 }
 0x408   :  { %v2384_v25 = vpop.eup %2383 }
 0x409   :  { %v482_v27 = vmul.f32 %v2384_v25, %v480_v16  ;;  %vm487_vm15 = vweird.f32 %v2384_v25  ;;  %v2386_v54 = vpop.eup %2385 }
 0x40a   :  { %vm488_vm1 = vmor %vm486_vm0, %vm487_vm15  ;;  %v2388_v22 = vpop.eup %2387 }
 0x40b   :  { %v483_v39 = vsub.f32 1.0, %v482_v27  ;;  %v500_v58 = vadd.f32 1.0, %v2388_v22 }
 0x40d   :  { %v484_v45 = vmul.f32 %v2384_v25, %v483_v39  ;;  %2389 = vrcp.f32 %v500_v58  ;;  %vm506_vm5 = vweird.f32 %v500_v58  ;;  %v510_v1 = vand.u32 2147483647, %v500_v58 }
 0x40f   :  { %v485_v47 = vadd.f32 %v2384_v25, %v484_v45  ;;  %vm511_vm7 = vcmp.eq.f32.partialorder %v510_v1, 8.507059e+37 }
 0x411   :  { %v489_v52 = vsel %vm488_vm1, %v2384_v25, %v485_v47  ;;  %v512_v25 = vand.u32 2147483648, %v500_v58 }
 0x412   :  { %v494_v59 = vsel %vm491_vm2, %v493_v51, %v489_v52 }
 0x413   :  { %v517_v33 = vmul.f32 %v2386_v54, %v494_v59  ;;  %v2390_v61 = vpop.eup %2389  ;;  %v516_v8 = vmul.f32 %v494_v59, %v2935_v48  ;;  %v513_v39 = vor.u32 1.1754944e-38, %v512_v25 }
 0x414   :  { %v502_v0 = vmul.f32 %v2390_v61, %v500_v58  ;;  %vm507_vm3 = vweird.f32 %v2390_v61 }
 0x415   :  { %519 = vrot.lane.b32.xlu2 %v517_v33, %s2597_s0  ;;  %vm508_vm6 = vmor %vm506_vm5, %vm507_vm3 }
 0x416   :  { %v503_v3 = vsub.f32 1.0, %v502_v0 }
 0x418   :  { %v504_v4 = vmul.f32 %v2390_v61, %v503_v3 }
 0x41a   :  { %v505_v16 = vadd.f32 %v2390_v61, %v504_v4 }
 0x41c   :  { %v509_v27 = vsel %vm508_vm6, %v2390_v61, %v505_v16 }
 0x41d   :  { %v514_v45 = vsel %vm511_vm7, %v513_v39, %v509_v27 }
 0x46f   :  { %v520_v35 = vpop.permute.xlu2 %519 }
 0x470   :  { %v2965_v14 = vadd.f32 %v520_v35, %v516_v8 }
 0x472   :  { %2391 = vtanh.f32 %v2965_v14 }
 0x478   :  { %v2392_v40 = vpop.eup %2391 }
 0x479   :  { %v2968_v19 = vmul.f32 %v2392_v40, %v514_v45 }
 0x47b   :  { %v537_v48 = vpack.c.bf16 %v2968_v19, %v2968_v19 }
 0x47d   :  { %539 = vrot.lane.b32.xlu2 %v537_v48, %s2597_s0 }
 0x4d7   :  { %v540_v47 = vpop.permute.xlu2 %539 }
 0x4d8   :  { %2183 = vmatmul.msk.bf16.vlgmr.msrb.gmra.mxu2 %vm253_vm4, %v540_v47  ;;  %2184 = vmatmul.msk.bf16.vlgmr.msrb.gmra.mxu3 %vm253_vm4, %v540_v47 }
 0x4d9   :  { %928 = vmatpush.bf16.msrb.mxu2 %v2671_v9  ;;  %941 = vmatpush.bf16.msrb.mxu3 %v2700_v21 }
 0x4dd   :  { %929 = vmatpush.bf16.msrb.mxu2 %v2683_v15  ;;  %942 = vmatpush.bf16.msrb.mxu3 %v2716_v26 }
 0x4e1   :  { %930 = vmatpush.bf16.msrb.mxu2 %v2698_v20  ;;  %943 = vmatpush.bf16.msrb.mxu3 %v2730_v30 }
 0x4e5   :  { %931 = vmatpush.bf16.msrb.mxu2 %v2726_v29  ;;  %944 = vmatpush.bf16.msrb.mxu3 %v2756_v37 }
 0x55b   :  { %v553_v51 = vpop.f32.mrf.mxu2  ;;  %v566_v52 = vpop.f32.mrf.mxu3 }
 0x55c   :  { %v570_v9 = vadd.f32 %v553_v51, %v535_v10  ;;  %v571_v29 = vadd.f32 %v566_v52, %v536_v11 }
 0x55e   :  { %v2185_v21 = vmul.f32 -1.442695, %v570_v9  ;;  %v2186_v8 = vmul.f32 -1.442695, %v571_v29 }
 0x560   :  { %2393 = vpow2.f32 %v2185_v21 }
 0x563   :  { %v555_v15 = vpop.f32.mrf.mxu2  ;;  %v568_v26 = vpop.f32.mrf.mxu3 }
 0x566   :  { %v2394_v54 = vpop.eup %2393 }
 0x567   :  { %v575_v20 = vadd.f32 1.0, %v2394_v54 }
 0x569   :  { %2395 = vrcp.f32 %v575_v20  ;;  %v587_v33 = vand.u32 2147483648, %v575_v20  ;;  %v585_v10 = vand.u32 2147483647, %v575_v20  ;;  %vm581_vm9 = vweird.f32 %v575_v20 }
 0x56a   :  { %2397 = vtanh.f32 %v571_v29 }
 0x56b   :  { %v588_v58 = vor.u32 1.1754944e-38, %v587_v33  ;;  %vm586_vm13 = vcmp.eq.f32.partialorder %v585_v10, 8.507059e+37  ;;  %2399 = vpow2.f32 %v2186_v8 }
 0x56f   :  { %v2396_v30 = vpop.eup %2395 }
 0x570   :  { %v577_v37 = vmul.f32 %v2396_v30, %v575_v20  ;;  %vm582_vm8 = vweird.f32 %v2396_v30  ;;  %v2398_v0 = vpop.eup %2397 }
 0x571   :  { %vm583_vm12 = vmor %vm581_vm9, %vm582_vm8  ;;  %v2400_v11 = vpop.eup %2399 }
 0x572   :  { %v578_v59 = vsub.f32 1.0, %v577_v37  ;;  %v595_v35 = vadd.f32 1.0, %v2400_v11 }
 0x574   :  { %v579_v53 = vmul.f32 %v2396_v30, %v578_v59  ;;  %2401 = vrcp.f32 %v595_v35  ;;  %v607_v47 = vand.u32 2147483648, %v595_v35  ;;  %vm601_vm15 = vweird.f32 %v595_v35 }
 0x575   :  { %v605_v51 = vand.u32 2147483647, %v595_v35 }
 0x576   :  { %v580_v22 = vadd.f32 %v2396_v30, %v579_v53  ;;  %v608_v9 = vor.u32 1.1754944e-38, %v607_v47 }
 0x577   :  { %vm606_vm1 = vcmp.eq.f32.partialorder %v605_v51, 8.507059e+37 }
 0x578   :  { %v584_v61 = vsel %vm583_vm12, %v2396_v30, %v580_v22 }
 0x579   :  { %v589_v3 = vsel %vm586_vm13, %v588_v58, %v584_v61 }
 0x57a   :  { %v612_v4 = vmul.f32 %v2398_v0, %v589_v3  ;;  %v2402_v16 = vpop.eup %2401  ;;  %v611_v39 = vmul.f32 %v589_v3, %v2965_v14 }
 0x57b   :  { %v597_v25 = vmul.f32 %v2402_v16, %v595_v35  ;;  %vm602_vm14 = vweird.f32 %v2402_v16 }
 0x57c   :  { %614 = vrot.lane.b32.xlu0 %v612_v4, %s2597_s0  ;;  %vm603_vm0 = vmor %vm601_vm15, %vm602_vm14 }
 0x57d   :  { %v598_v1 = vsub.f32 1.0, %v597_v25 }
 0x57f   :  { %v599_v27 = vmul.f32 %v2402_v16, %v598_v1 }
 0x581   :  { %v600_v48 = vadd.f32 %v2402_v16, %v599_v27 }
 0x583   :  { %v604_v52 = vsel %vm603_vm0, %v2402_v16, %v600_v48 }
 0x584   :  { %v609_v15 = vsel %vm606_vm1, %v608_v9, %v604_v52 }
 0x5ee   :  { %v615_v40 = vpop.permute.xlu0 %614 }
 0x5ef   :  { %v617_v45 = vadd.f32 %v615_v40, %v611_v39 }
 0x5f1   :  { %2403 = vtanh.f32 %v617_v45 }
 0x5f7   :  { %v2404_v21 = vpop.eup %2403 }
 0x5f8   :  { %v2995_v26 = vmul.f32 %v2404_v21, %v609_v15 }
 0x5fa   :  { %v632_v54 = vpack.c.bf16 %v2995_v26, %v2995_v26 }
 0x5fc   :  { %634 = vrot.lane.b32.xlu1 %v632_v54, %s2597_s0 }
 0x66e   :  { %v635_v14 = vpop.permute.xlu1 %634 }
 0x66f   :  { %2187 = vmatmul.msk.bf16.vlgmr.msrb.gmra.mxu0 %vm253_vm4, %v635_v14  ;;  %2188 = vmatmul.msk.bf16.vlgmr.msrb.gmra.mxu1 %vm253_vm4, %v635_v14 }
 0x6ec   :  { %v648_v20 = vpop.f32.mrf.mxu0  ;;  %v661_v30 = vpop.f32.mrf.mxu1 }
 0x6ed   :  { %v665_v29 = vadd.f32 %v648_v20, %v630_v12  ;;  %v666_v58 = vadd.f32 %v661_v30, %v631_v13 }
 0x6ef   :  { %v2189_v37 = vmul.f32 -1.442695, %v665_v29  ;;  %v2190_v63 = vmul.f32 -1.442695, %v666_v58 }
 0x6f1   :  { %2405 = vpow2.f32 %v2189_v37 }
 0x6f4   :  { %v650_v59 = vpop.f32.mrf.mxu0  ;;  %v663_v33 = vpop.f32.mrf.mxu1 }
 0x6f7   :  { %v2406_v53 = vpop.eup %2405 }
 0x6f8   :  { %v670_v10 = vadd.f32 1.0, %v2406_v53 }
 0x6fa   :  { %2407 = vrcp.f32 %v670_v10  ;;  %v682_v3 = vand.u32 2147483648, %v670_v10  ;;  %v680_v6 = vand.u32 2147483647, %v670_v10  ;;  %vm676_vm3 = vweird.f32 %v670_v10 }
 0x6fb   :  { %2409 = vtanh.f32 %v666_v58 }
 0x6fc   :  { %v683_v4 = vor.u32 1.1754944e-38, %v682_v3  ;;  %vm681_vm6 = vcmp.eq.f32.partialorder %v680_v6, 8.507059e+37  ;;  %2411 = vpow2.f32 %v2190_v63 }
 0x700   :  { %v2408_v22 = vpop.eup %2407 }
 0x701   :  { %v672_v61 = vmul.f32 %v2408_v22, %v670_v10  ;;  %vm677_vm2 = vweird.f32 %v2408_v22  ;;  %v2410_v11 = vpop.eup %2409 }
 0x702   :  { %vm678_vm5 = vmor %vm676_vm3, %vm677_vm2  ;;  %v2412_v7 = vpop.eup %2411 }
 0x703   :  { %v673_v0 = vsub.f32 1.0, %v672_v61  ;;  %v690_v13 = vadd.f32 1.0, %v2412_v7 }
 0x705   :  { %v674_v62 = vmul.f32 %v2408_v22, %v673_v0  ;;  %2413 = vrcp.f32 %v690_v13  ;;  %v702_v52 = vand.u32 2147483648, %v690_v13  ;;  %vm696_vm8 = vweird.f32 %v690_v13 }
 0x706   :  { %v700_v9 = vand.u32 2147483647, %v690_v13 }
 0x707   :  { %v675_v12 = vadd.f32 %v2408_v22, %v674_v62  ;;  %v703_v15 = vor.u32 1.1754944e-38, %v702_v52 }
 0x708   :  { %vm701_vm12 = vcmp.eq.f32.partialorder %v700_v9, 8.507059e+37 }
 0x709   :  { %v679_v8 = vsel %vm678_vm5, %v2408_v22, %v675_v12 }
 0x70a   :  { %v684_v35 = vsel %vm681_vm6, %v683_v4, %v679_v8 }
 0x70b   :  { %v707_v16 = vmul.f32 %v2410_v11, %v684_v35  ;;  %v2414_v25 = vpop.eup %2413  ;;  %v706_v40 = vmul.f32 %v684_v35, %v617_v45 }
 0x70c   :  { %v692_v1 = vmul.f32 %v2414_v25, %v690_v13  ;;  %vm697_vm7 = vweird.f32 %v2414_v25 }
 0x70d   :  { %709 = vrot.lane.b32.xlu2 %v707_v16, %s2597_s0  ;;  %vm698_vm9 = vmor %vm696_vm8, %vm697_vm7 }
 0x70e   :  { %v693_v27 = vsub.f32 1.0, %v692_v1 }
 0x710   :  { %v694_v39 = vmul.f32 %v2414_v25, %v693_v27 }
 0x712   :  { %v695_v51 = vadd.f32 %v2414_v25, %v694_v39 }
 0x714   :  { %v699_v21 = vsel %vm698_vm9, %v2414_v25, %v695_v51 }
 0x715   :  { %v704_v14 = vsel %vm701_vm12, %v703_v15, %v699_v21 }
 0x767   :  { %v710_v48 = vpop.permute.xlu2 %709 }
 0x768   :  { %v712_v47 = vadd.f32 %v710_v48, %v706_v40 }
 0x76a   :  { %2415 = vtanh.f32 %v712_v47 }
 0x770   :  { %v2416_v54 = vpop.eup %2415 }
 0x771   :  { %v3013_v20 = vmul.f32 %v2416_v54, %v704_v14 }
 0x773   :  { %v727_v30 = vpack.c.bf16 %v3013_v20, %v3013_v20 }
 0x775   :  { %729 = vrot.lane.b32.xlu0 %v727_v30, %s2597_s0 }
 0x7e7   :  { %v730_v45 = vpop.permute.xlu0 %729 }
 0x7e8   :  { %2191 = vmatmul.msk.bf16.vlgmr.msra.gmra.mxu2 %vm253_vm4, %v730_v45  ;;  %2192 = vmatmul.msk.bf16.vlgmr.msra.gmra.mxu3 %vm253_vm4, %v730_v45 }
 0x86b   :  { %v743_v29 = vpop.f32.mrf.mxu2  ;;  %v756_v37 = vpop.f32.mrf.mxu3 }
 0x86c   :  { %v760_v59 = vadd.f32 %v743_v29, %v725_v23  ;;  %v761_v0 = vadd.f32 %v756_v37, %v726_v24 }
 0x86e   :  { %v2193_v33 = vmul.f32 -1.442695, %v760_v59  ;;  %v2194_v56 = vmul.f32 -1.442695, %v761_v0 }
 0x870   :  { %2417 = vpow2.f32 %v2193_v33 }
 0x873   :  { %v745_v53 = vpop.f32.mrf.mxu2  ;;  %v758_v10 = vpop.f32.mrf.mxu3 }
 0x876   :  { %v2418_v22 = vpop.eup %2417 }
 0x877   :  { %v765_v58 = vadd.f32 1.0, %v2418_v22 }
 0x879   :  { %2419 = vrcp.f32 %v765_v58  ;;  %v777_v6 = vand.u32 2147483648, %v765_v58  ;;  %v775_v17 = vand.u32 2147483647, %v765_v58  ;;  %vm771_vm14 = vweird.f32 %v765_v58 }
 0x87a   :  { %2421 = vtanh.f32 %v761_v0 }
 0x87b   :  { %v778_v12 = vor.u32 1.1754944e-38, %v777_v6  ;;  %vm776_vm0 = vcmp.eq.f32.partialorder %v775_v17, 8.507059e+37  ;;  %2423 = vpow2.f32 %v2194_v56 }
 0x87f   :  { %v2420_v61 = vpop.eup %2419 }
 0x880   :  { %v767_v3 = vmul.f32 %v2420_v61, %v765_v58  ;;  %vm772_vm13 = vweird.f32 %v2420_v61  ;;  %v2422_v8 = vpop.eup %2421 }
 0x881   :  { %vm773_vm15 = vmor %vm771_vm14, %vm772_vm13  ;;  %v2424_v18 = vpop.eup %2423 }
 0x882   :  { %v768_v62 = vsub.f32 1.0, %v767_v3  ;;  %v785_v24 = vadd.f32 1.0, %v2424_v18 }
 0x884   :  { %v769_v55 = vmul.f32 %v2420_v61, %v768_v62  ;;  %2425 = vrcp.f32 %v785_v24  ;;  %v797_v40 = vand.u32 2147483648, %v785_v24  ;;  %vm791_vm2 = vweird.f32 %v785_v24 }
 0x885   :  { %v795_v48 = vand.u32 2147483647, %v785_v24 }
 0x886   :  { %v770_v23 = vadd.f32 %v2420_v61, %v769_v55  ;;  %v798_v52 = vor.u32 1.1754944e-38, %v797_v40 }
 0x887   :  { %vm796_vm5 = vcmp.eq.f32.partialorder %v795_v48, 8.507059e+37 }
 0x888   :  { %v774_v4 = vsel %vm773_vm15, %v2420_v61, %v770_v23  ;;  %vm337_vm15 = vcmask 261120  }
 0x889   :  { %v779_v11 = vsel %vm776_vm0, %v778_v12, %v774_v4  ;;  %vm339_vm0 = vcmask 523520  }
 0x88a   :  { %v802_v35 = vmul.f32 %v2422_v8, %v779_v11  ;;  %v2426_v16 = vpop.eup %2425  ;;  %v801_v25 = vmul.f32 %v779_v11, %v712_v47 }
 0x88b   :  { %v787_v63 = vmul.f32 %v2426_v16, %v785_v24  ;;  %vm792_vm1 = vweird.f32 %v2426_v16 }
 0x88c   :  { %804 = vrot.lane.b32.xlu1 %v802_v35, %s2597_s0  ;;  %vm793_vm3 = vmor %vm791_vm2, %vm792_vm1 }
 0x88d   :  { %v788_v7 = vsub.f32 1.0, %v787_v63 }
 0x88f   :  { %v789_v13 = vmul.f32 %v2426_v16, %v788_v7 }
 0x891   :  { %v790_v39 = vadd.f32 %v2426_v16, %v789_v13 }
 0x893   :  { %v794_v51 = vsel %vm793_vm3, %v2426_v16, %v790_v39 }
 0x894   :  { %v799_v21 = vsel %vm796_vm5, %v798_v52, %v794_v51 }
 0x8fe   :  { %v805_v1 = vpop.permute.xlu1 %804 }
 0x8ff   :  { %v807_v27 = vadd.f32 %v805_v1, %v801_v25 }
 0x901   :  { %2427 = vtanh.f32 %v807_v27 }
 0x907   :  { %v2428_v9 = vpop.eup %2427 }
 0x908   :  { %v3031_v15 = vmul.f32 %v2428_v9, %v799_v21 }
 0x90a   :  { %v822_v54 = vpack.c.bf16 %v3031_v15, %v3031_v15 }
 0x90c   :  { %824 = vrot.lane.b32.xlu2 %v822_v54, %s2597_s0 }
 0x966   :  { %v825_v47 = vpop.permute.xlu2 %824 }
 0x967   :  { %2195 = vmatmul.msk.bf16.vlgmr.msra.gmra.mxu0 %vm253_vm4, %v825_v47  ;;  %2196 = vmatmul.msk.bf16.vlgmr.msra.gmra.mxu1 %vm253_vm4, %v825_v47 }
 0x9e4   :  { %v838_v14 = vpop.f32.mrf.mxu0  ;;  %v851_v30 = vpop.f32.mrf.mxu1 }
 0x9e5   :  { %v855_v45 = vadd.f32 %v838_v14, %v820_v36  ;;  %v856_v22 = vadd.f32 %v851_v30, %v821_v38 }
 0x9e7   :  { %v2197_v29 = vmul.f32 -1.442695, %v855_v45  ;;  %v2198_v50 = vmul.f32 -1.442695, %v856_v22 }
 0x9e9   :  { %2429 = vpow2.f32 %v2197_v29 }
 0x9ec   :  { %v840_v37 = vpop.f32.mrf.mxu0  ;;  %v853_v59 = vpop.f32.mrf.mxu1 }
 0x9ef   :  { %v2430_v33 = vpop.eup %2429 }
 0x9f0   :  { %v860_v53 = vadd.f32 1.0, %v2430_v33 }
 0x9f2   :  { %2431 = vrcp.f32 %v860_v53  ;;  %v872_v0 = vand.u32 2147483648, %v860_v53  ;;  %v870_v31 = vand.u32 2147483647, %v860_v53  ;;  %vm866_vm7 = vweird.f32 %v860_v53 }
 0x9f3   :  { %2433 = vtanh.f32 %v856_v22 }
 0x9f4   :  { %v873_v3 = vor.u32 1.1754944e-38, %v872_v0  ;;  %vm871_vm9 = vcmp.eq.f32.partialorder %v870_v31, 8.507059e+37  ;;  %2435 = vpow2.f32 %v2198_v50  ;;  %v2337_v0 = vld [vmem:[%s3569_s4 + $0x34] sm:$0xf0] }
 0x9f8   :  { %v2432_v10 = vpop.eup %2431 }
 0x9f9   :  { %v862_v58 = vmul.f32 %v2432_v10, %v860_v53  ;;  %vm867_vm6 = vweird.f32 %v2432_v10  ;;  %v2434_v6 = vpop.eup %2433 }
 0x9fa   :  { %vm868_vm8 = vmor %vm866_vm7, %vm867_vm6  ;;  %v2436_v32 = vpop.eup %2435 }
 0x9fb   :  { %v863_v61 = vsub.f32 1.0, %v862_v58  ;;  %v880_v38 = vadd.f32 1.0, %v2436_v32 }
 0x9fd   :  { %v864_v28 = vmul.f32 %v2432_v10, %v863_v61  ;;  %2437 = vrcp.f32 %v880_v38  ;;  %v892_v24 = vand.u32 2147483648, %v880_v38  ;;  %vm886_vm13 = vweird.f32 %v880_v38  ;;  %v2229_v61 = vld [vmem:[%s3569_s4 + $0x30] sm:$0xf] }
 0x9fe   :  { %v2230_v31 = vor.u32 %v2337_v0, %v2229_v61  ;;  %v2340_v0 = vld [vmem:[#allocation4 + $0x14] sm:$0xf] }
 0x9ff   :  { %v865_v36 = vadd.f32 %v2432_v10, %v864_v28  ;;  %v893_v63 = vor.u32 1.1754944e-38, %v892_v24  ;;  %v2336_v28 = vld [vmem:[%s3569_s4 + $0x34] sm:$0xf] }
 0xa00   :  { %1096 = vmatpush.bf16.msrb.mxu0 %v2230_v31 }
 0xa01   :  { %v869_v62 = vsel %vm868_vm8, %v2432_v10, %v865_v36  ;;  %v2221_v36 = vld [vmem:[%s3569_s4 + $0x20] sm:$0xf] }
 0xa02   :  { %v874_v55 = vsel %vm871_vm9, %v873_v3, %v869_v62  ;;  %v2335_v3 = vld [vmem:[%s3569_s4 + $0x24] sm:$0xf0] }
 0xa03   :  { %v897_v17 = vmul.f32 %v2434_v6, %v874_v55  ;;  %v2438_v23 = vpop.eup %2437  ;;  %v896_v11 = vmul.f32 %v874_v55, %v807_v27  ;;  %v2334_v55 = vld [vmem:[%s3569_s4 + $0x24] sm:$0xf]  ;;  %v2222_v50 = vor.u32 %v2335_v3, %v2221_v36 }
 0xa04   :  { %v882_v12 = vmul.f32 %v2438_v23, %v880_v38  ;;  %vm887_vm12 = vweird.f32 %v2438_v23 }
 0xa05   :  { %899 = vrot.lane.b32.xlu0 %v897_v17, %s2597_s0  ;;  %vm888_vm14 = vmor %vm886_vm13, %vm887_vm12  ;;  %v2223_v17 = vld [vmem:[%s3569_s4 + $0x28] sm:$0xf0]  ;;  %1097 = vmatpush.bf16.msrb.mxu0 %v2222_v50 }
 0xa06   :  { %v883_v4 = vsub.f32 1.0, %v882_v12  ;;  %v2226_v32 = vor.u32 %v2334_v55, %v2223_v17  ;;  %v2247_v55 = vld [vmem:[#allocation4 + $0x8] sm:$0xf0] }
 0xa08   :  { %v884_v8 = vmul.f32 %v2438_v23, %v883_v4 }
 0xa0a   :  { %v885_v18 = vadd.f32 %v2438_v23, %v884_v8 }
 0xa0c   :  { %v889_v16 = vsel %vm888_vm14, %v2438_v23, %v885_v18 }
 0xa0d   :  { %334 = vrot.lane.b32.xlu0 %v2908_v57, %s2597_s0  ;;  %v890_v57 = vand.u32 2147483647, %v880_v38 }
 0xa0f   :  { %vm891_vm1 = vcmp.eq.f32.partialorder %v890_v57, 8.507059e+37 }
 0xa10   :  { %v894_v25 = vsel %vm891_vm1, %v893_v63, %v889_v16 }
 0xa77   :  { %v900_v35 = vpop.permute.xlu0 %899 }
 0xa78   :  { %v3051_v56 = vadd.f32 %v900_v35, %v896_v11 }
 0xa7a   :  { %2439 = vtanh.f32 %v3051_v56 }
 0xa7f   :  { %v335_v7 = vpop.permute.xlu0 %334 }
 0xa80   :  { %v2440_v13 = vpop.eup %2439  ;;  %338 = vst.msk [vmem:[#allocation3] sm:$0xff] %vm337_vm15, %v335_v7 }
 0xa81   :  { %340 = vst.msk [vmem:[#allocation3 + $0x38] sm:$0xff] %vm339_vm0, %v335_v7  ;;  %v904_v1 = vmul.f32 %v2440_v13, %v894_v25  ;;  %v2213_v25 = vld [vmem:[%s3569_s4 + $0x10] sm:$0xf] }
 0xa83   :  { %v917_v27 = vpack.c.bf16 %v904_v1, %v904_v1 }
 0xa85   :  { %919 = vrot.lane.b32.xlu1 %v917_v27, %s2597_s0  ;;  %v2332_v27 = vld [vmem:[%s3569_s4 + $0x14] sm:$0xf] }
 0xa8d   :  { %431 = vrot.lane.b32.xlu1 %v2938_v60, %s2597_s0 }
 0xa95   :  { %526 = vrot.lane.b32.xlu1 %v2968_v19, %s2597_s0 }
 0xa9d   :  { %811 = vrot.lane.b32.xlu1 %v3031_v15, %s2597_s0 }
 0xaf7   :  { %v920_v39 = vpop.permute.xlu1 %919 }
 0xaf8   :  { %2199 = vmatmul.msk.bf16.vlgmr.msrb.gmra.mxu2 %vm253_vm4, %v920_v39  ;;  %2200 = vmatmul.msk.bf16.vlgmr.msrb.gmra.mxu3 %vm253_vm4, %v920_v39 }
 0xaff   :  { %v432_v40 = vpop.permute.xlu1 %431 }
 0xb00   :  { %434 = vst.msk [vmem:[#allocation3 + $0x8] sm:$0xff] %vm337_vm15, %v432_v40 }
 0xb01   :  { %435 = vst.msk [vmem:[#allocation3 + $0x30] sm:$0xff] %vm339_vm0, %v432_v40  ;;  %v2215_v40 = vld [vmem:[%s3569_s4 + $0x18] sm:$0xf0] }
 0xb07   :  { %v527_v48 = vpop.permute.xlu1 %526 }
 0xb08   :  { %529 = vst.msk [vmem:[#allocation3 + $0x10] sm:$0xff] %vm337_vm15, %v527_v48 }
 0xb09   :  { %530 = vst.msk [vmem:[#allocation3 + $0x28] sm:$0xff] %vm339_vm0, %v527_v48  ;;  %v2331_v48 = vld [vmem:[%s3569_s4 + $0x4] sm:$0xf0] }
 0xb0f   :  { %v812_v60 = vpop.permute.xlu1 %811 }
 0xb10   :  { %814 = vst.msk [vmem:[#allocation3 + $0x28] sm:$0xff] %vm337_vm15, %v812_v60 }
 0xb11   :  { %815 = vst.msk [vmem:[#allocation3 + $0x10] sm:$0xff] %vm339_vm0, %v812_v60  ;;  %v2218_v60 = vor.u32 %v2332_v27, %v2215_v40 }
 0xb18   :  { %v1025_v3 = vld [vmem:[#allocation3 + $0x10] sm:$0xff] }
 0xb7b   :  { %v933_v19 = vpop.f32.mrf.mxu2  ;;  %v946_v51 = vpop.f32.mrf.mxu3 }
 0xb7c   :  { %v950_v52 = vadd.f32 %v933_v19, %v915_v49  ;;  %v951_v30 = vadd.f32 %v946_v51, %v916_v44  ;;  %v2330_v19 = vld [vmem:[%s3569_s4 + $0x4] sm:$0xf]  ;;  %v2207_v51 = vld [vmem:[%s3569_s4 + $0x8] sm:$0xf0] }
 0xb7e   :  { %v2201_v9 = vmul.f32 -1.442695, %v950_v52  ;;  %v2202_v42 = vmul.f32 -1.442695, %v951_v30 }
 0xb80   :  { %2441 = vpow2.f32 %v2201_v9  ;;  %v2210_v9 = vor.u32 %v2330_v19, %v2207_v51 }
 0xb83   :  { %v935_v21 = vpop.f32.mrf.mxu2  ;;  %v948_v15 = vpop.f32.mrf.mxu3 }
 0xb84   :  { %v2269_v21 = vld [vmem:[#allocation4 + $0x30] sm:$0xf]  ;;  %v2345_v15 = vld [vmem:[#allocation4 + $0x34] sm:$0xf0] }
 0xb86   :  { %v2442_v54 = vpop.eup %2441 }
 0xb87   :  { %v955_v47 = vadd.f32 1.0, %v2442_v54  ;;  %v3141_v54 = vor.u32 %v2345_v15, %v2269_v21 }
 0xb89   :  { %2443 = vrcp.f32 %v955_v47  ;;  %v967_v37 = vand.u32 2147483648, %v955_v47  ;;  %v965_v43 = vand.u32 2147483647, %v955_v47  ;;  %vm961_vm3 = vweird.f32 %v955_v47  ;;  %1216 = vmatpush.bf16.msra.mxu2 %v3141_v54 }
 0xb8a   :  { %2445 = vtanh.f32 %v951_v30 }
 0xb8b   :  { %v968_v59 = vor.u32 1.1754944e-38, %v967_v37  ;;  %vm966_vm6 = vcmp.eq.f32.partialorder %v965_v43, 8.507059e+37  ;;  %2447 = vpow2.f32 %v2202_v42  ;;  %v2261_v37 = vld [vmem:[#allocation4 + $0x20] sm:$0xf]  ;;  %v2342_v42 = vld [vmem:[#allocation4 + $0x24] sm:$0xf] }
 0xb8f   :  { %v2444_v14 = vpop.eup %2443 }
 0xb90   :  { %v957_v45 = vmul.f32 %v2444_v14, %v955_v47  ;;  %vm962_vm2 = vweird.f32 %v2444_v14  ;;  %v2446_v53 = vpop.eup %2445 }
 0xb91   :  { %vm963_vm5 = vmor %vm961_vm3, %vm962_vm2  ;;  %v2448_v46 = vpop.eup %2447 }
 0xb92   :  { %v958_v29 = vsub.f32 1.0, %v957_v45  ;;  %v975_v44 = vadd.f32 1.0, %v2448_v46  ;;  %v2263_v46 = vld [vmem:[#allocation4 + $0x28] sm:$0xf0] }
 0xb93   :  { %v3160_v61 = vor.u32 %v2342_v42, %v2263_v46 }
 0xb94   :  { %v959_v41 = vmul.f32 %v2444_v14, %v958_v29  ;;  %2449 = vrcp.f32 %v975_v44  ;;  %v987_v35 = vand.u32 2147483648, %v975_v44  ;;  %vm981_vm8 = vweird.f32 %v975_v44 }
 0xb95   :  { %v985_v18 = vand.u32 2147483647, %v975_v44 }
 0xb96   :  { %v960_v49 = vadd.f32 %v2444_v14, %v959_v41  ;;  %v988_v57 = vor.u32 1.1754944e-38, %v987_v35  ;;  %v2343_v41 = vld [vmem:[#allocation4 + $0x24] sm:$0xf0] }
 0xb97   :  { %vm986_vm12 = vcmp.eq.f32.partialorder %v985_v18, 8.507059e+37  ;;  %v3151_v43 = vor.u32 %v2343_v41, %v2261_v37 }
 0xb98   :  { %v964_v33 = vsel %vm963_vm5, %v2444_v14, %v960_v49  ;;  %v2253_v49 = vld [vmem:[#allocation4 + $0x10] sm:$0xf] }
 0xb99   :  { %v969_v10 = vsel %vm966_vm6, %v968_v59, %v964_v33  ;;  %v2341_v59 = vld [vmem:[#allocation4 + $0x14] sm:$0xf0]  ;;  %v2344_v33 = vld [vmem:[#allocation4 + $0x34] sm:$0xf]  ;;  %1217 = vmatpush.bf16.msra.mxu2 %v3151_v43 }
 0xb9a   :  { %v992_v22 = vmul.f32 %v2446_v53, %v969_v10  ;;  %v2450_v58 = vpop.eup %2449  ;;  %v991_v12 = vmul.f32 %v969_v10, %v3051_v56  ;;  %v2271_v53 = vld [vmem:[#allocation4 + $0x38] sm:$0xf0]  ;;  %v3154_v10 = vor.u32 %v2341_v59, %v2253_v49 }
 0xb9b   :  { %v977_v62 = vmul.f32 %v2450_v58, %v975_v44  ;;  %vm982_vm7 = vweird.f32 %v2450_v58  ;;  %v2245_v44 = vld [vmem:[#allocation4] sm:$0xf] }
 0xb9c   :  { %994 = vrot.lane.b32.xlu2 %v992_v22, %s2597_s0  ;;  %vm983_vm9 = vmor %vm981_vm8, %vm982_vm7  ;;  %v3156_v22 = vor.u32 %v2344_v33, %v2271_v53 }
 0xb9d   :  { %v978_v38 = vsub.f32 1.0, %v977_v62  ;;  %1218 = vmatpush.bf16.msra.mxu2 %v3154_v10 }
 0xb9e   :  { %1229 = vmatpush.bf16.msra.mxu3 %v3156_v22 }
 0xb9f   :  { %v979_v23 = vmul.f32 %v2450_v58, %v978_v38 }
 0xba1   :  { %v980_v11 = vadd.f32 %v2450_v58, %v979_v23 }
 0xba2   :  { %1230 = vmatpush.bf16.msra.mxu3 %v3160_v61 }
 0xba3   :  { %v984_v24 = vsel %vm983_vm9, %v2450_v58, %v980_v11  ;;  %v2339_v58 = vld [vmem:[#allocation4 + $0x4] sm:$0xf0]  ;;  %v1022_v11 = vld [vmem:[%s3571_s6] sm:$0x3] }
 0xba4   :  { %906 = vrot.lane.b32.xlu2 %v904_v1, %s2597_s0  ;;  %v989_v7 = vsel %vm986_vm12, %v988_v57, %v984_v24  ;;  %v2333_v1 = vld [vmem:[%s3569_s4 + $0x14] sm:$0xf0]  ;;  %v3164_v31 = vor.u32 %v2339_v58, %v2245_v44  ;;  %v1036_v35 = vperm.slane %v1022_v11, 0  ;;  %v1037_v18 = vperm.slane %v1022_v11, 1 }
 0xba5   :  { %v2214_v39 = vor.u32 %v2333_v1, %v2213_v25 }
 0xba6   :  { %1219 = vmatpush.bf16.msra.mxu2 %v3164_v31 }
 0xba7   :  { %1098 = vmatpush.bf16.msrb.mxu0 %v2214_v39 }
 0xba9   :  { %1220 = vmatmul.bf16.vlgmr.msra.gmra.mxu2 %v2596_v34 }
 0xbaa   :  { %1311 = vmatpush.bf16.msrb.mxu2 %v3141_v54 }
 0xbac   :  { %621 = vrot.lane.b32.xlu2 %v2995_v26, %s2597_s0  ;;  %v2231_v26 = vld [vmem:[%s3569_s4 + $0x38] sm:$0xf0] }
 0xbad   :  { %v2234_v6 = vor.u32 %v2336_v28, %v2231_v26  ;;  %v2255_v28 = vld [vmem:[#allocation4 + $0x18] sm:$0xf0] }
 0xbae   :  { %v3168_v26 = vor.u32 %v2340_v0, %v2255_v28  ;;  %1312 = vmatpush.bf16.msrb.mxu2 %v3151_v43 }
 0xbaf   :  { %1125 = vmatpush.bf16.msrb.mxu1 %v2234_v6  ;;  %v2338_v6 = vld [vmem:[#allocation4 + $0x4] sm:$0xf] }
 0xbb0   :  { %1231 = vmatpush.bf16.msra.mxu3 %v3168_v26  ;;  %v3182_v17 = vor.u32 %v2338_v6, %v2247_v55 }
 0xbb2   :  { %1313 = vmatpush.bf16.msrb.mxu2 %v3154_v10 }
 0xbb3   :  { %1126 = vmatpush.bf16.msrb.mxu1 %v2226_v32  ;;  %v1028_v32 = vld [vmem:[#allocation3 + $0x28] sm:$0xff] }
 0xbb4   :  { %1232 = vmatpush.bf16.msra.mxu3 %v3182_v17 }
 0xbb6   :  { %1314 = vmatpush.bf16.msrb.mxu2 %v3164_v31 }
 0xbb7   :  { %1127 = vmatpush.bf16.msrb.mxu1 %v2218_v60  ;;  %1233 = vmatmul.bf16.vlgmr.msra.gmra.mxu3 %v2596_v34 }
 0xbb8   :  { %1324 = vmatpush.bf16.msrb.mxu3 %v3156_v22 }
 0xbba   :  { %1406 = vmatpush.bf16.msra.mxu2 %v3141_v54 }
 0xbbb   :  { %1128 = vmatpush.bf16.msrb.mxu1 %v2210_v9 }
 0xbbc   :  { %1325 = vmatpush.bf16.msrb.mxu3 %v3160_v61 }
 0xbbe   :  { %1407 = vmatpush.bf16.msra.mxu2 %v3151_v43 }
 0xbbf   :  { %1609 = vmatpush.bf16.msra.mxu1 %v3156_v22 }
 0xbc0   :  { %1326 = vmatpush.bf16.msrb.mxu3 %v3168_v26 }
 0xbc2   :  { %1408 = vmatpush.bf16.msra.mxu2 %v3154_v10 }
 0xbc3   :  { %1610 = vmatpush.bf16.msra.mxu1 %v3160_v61 }
 0xbc4   :  { %1327 = vmatpush.bf16.msrb.mxu3 %v3182_v17 }
 0xbc6   :  { %1409 = vmatpush.bf16.msra.mxu2 %v3164_v31 }
 0xbc7   :  { %1611 = vmatpush.bf16.msra.mxu1 %v3168_v26 }
 0xbc8   :  { %1419 = vmatpush.bf16.msra.mxu3 %v3156_v22 }
 0xbcb   :  { %1612 = vmatpush.bf16.msra.mxu1 %v3182_v17 }
 0xbcc   :  { %1420 = vmatpush.bf16.msra.mxu3 %v3160_v61 }
 0xbd0   :  { %1421 = vmatpush.bf16.msra.mxu3 %v3168_v26 }
 0xbd4   :  { %1422 = vmatpush.bf16.msra.mxu3 %v3182_v17 }
 0xbf6   :  { %v995_v4 = vpop.permute.xlu2 %994 }
 0xbf7   :  { %v997_v8 = vadd.f32 %v995_v4, %v991_v12 }
 0xbf9   :  { %2451 = vtanh.f32 %v997_v8 }
 0xbfe   :  { %v907_v16 = vpop.permute.xlu2 %906 }
 0xbff   :  { %v2452_v63 = vpop.eup %2451  ;;  %909 = vst.msk [vmem:[#allocation3 + $0x30] sm:$0xff] %vm337_vm15, %v907_v16 }
 0xc00   :  { %910 = vst.msk [vmem:[#allocation3 + $0x8] sm:$0xff] %vm339_vm0, %v907_v16  ;;  %v999_v56 = vmul.f32 %v2452_v63, %v989_v7 }
 0xc02   :  { %1001 = vrot.lane.b32.xlu0 %v999_v56, %s2597_s0 }
 0xc06   :  { %v622_v13 = vpop.permute.xlu2 %621  ;;  %v1029_v23 = vld [vmem:[#allocation3 + $0x30] sm:$0xff] }
 0xc07   :  { %624 = vst.msk [vmem:[#allocation3 + $0x18] sm:$0xff] %vm337_vm15, %v622_v13  ;;  %v1024_v45 = vld [vmem:[#allocation3 + $0x8] sm:$0xff] }
 0xc08   :  { %625 = vst.msk [vmem:[#allocation3 + $0x20] sm:$0xff] %vm339_vm0, %v622_v13 }
 0xc0a   :  { %716 = vrot.lane.b32.xlu0 %v3013_v20, %s2597_s0  ;;  %v2205_v20 = vld [vmem:[%s3569_s4] sm:$0xf] }
 0xc0b   :  { %v2206_v52 = vor.u32 %v2331_v48, %v2205_v20 }
 0xc0d   :  { %1099 = vmatpush.bf16.msrb.mxu0 %v2206_v52 }
 0xc11   :  { %1596 = vmatpush.bf16.msra.mxu0 %v3141_v54 }
 0xc15   :  { %1597 = vmatpush.bf16.msra.mxu0 %v3151_v43 }
 0xc19   :  { %1598 = vmatpush.bf16.msra.mxu0 %v3154_v10 }
 0xc1d   :  { %1599 = vmatpush.bf16.msra.mxu0 %v3164_v31 }
 0xc2c   :  { %v1221_v1 = vpop.f32.mrf.mxu2 }
 0xc34   :  { %v1223_v48 = vpop.f32.mrf.mxu2 }
 0xc3a   :  { %v1234_v60 = vpop.f32.mrf.mxu3 }
 0xc42   :  { %v1236_v21 = vpop.f32.mrf.mxu3 }
 0xc74   :  { %v1002_v47 = vpop.permute.xlu0 %1001 }
 0xc75   :  { %1004 = vst.msk [vmem:[#allocation3 + $0x38] sm:$0xff] %vm337_vm15, %v1002_v47 }
 0xc76   :  { %1005 = vst.msk [vmem:[#allocation3] sm:$0xff] %vm339_vm0, %v1002_v47 }
 0xc7c   :  { %v717_v14 = vpop.permute.xlu0 %716  ;;  %v1030_v34 = vld [vmem:[#allocation3 + $0x38] sm:$0xff] }
 0xc7d   :  { %719 = vst.msk [vmem:[#allocation3 + $0x20] sm:$0xff] %vm337_vm15, %v717_v14  ;;  %v1023_v30 = vld [vmem:[#allocation3] sm:$0xff]  ;;  %v1034_v12 = vpack.c.bf16 %v1030_v34, %v1029_v23 }
 0xc7e   :  { %720 = vst.msk [vmem:[#allocation3 + $0x18] sm:$0xff] %vm339_vm0, %v717_v14  ;;  %v1031_v29 = vpack.c.bf16 %v1024_v45, %v1023_v30 }
 0xc80   :  { %2235 = vmatmul.msk.bf16.vlgmr.msrb.gmra.mxu0 %vm253_vm4, %v1031_v29  ;;  %2239 = vmatmul.msk.bf16.vlgmr.msrb.gmra.mxu1 %vm253_vm4, %v1031_v29 }
 0xc81   :  { %1786 = vmatpush.bf16.msrb.mxu0 %v3141_v54  ;;  %1799 = vmatpush.bf16.msrb.mxu1 %v3156_v22 }
 0xc84   :  { %v1027_v50 = vld [vmem:[#allocation3 + $0x20] sm:$0xff] }
 0xc85   :  { %v1026_v36 = vld [vmem:[#allocation3 + $0x18] sm:$0xff]  ;;  %1787 = vmatpush.bf16.msrb.mxu0 %v3151_v43  ;;  %1800 = vmatpush.bf16.msrb.mxu1 %v3160_v61  ;;  %v1033_v38 = vpack.c.bf16 %v1028_v32, %v1027_v50 }
 0xc86   :  { %v1032_v62 = vpack.c.bf16 %v1026_v36, %v1025_v3 }
 0xc89   :  { %1788 = vmatpush.bf16.msrb.mxu0 %v3154_v10  ;;  %1801 = vmatpush.bf16.msrb.mxu1 %v3168_v26 }
 0xc8d   :  { %1789 = vmatpush.bf16.msrb.mxu0 %v3164_v31  ;;  %1802 = vmatpush.bf16.msrb.mxu1 %v3182_v17 }
 0xc90   :  { %2236 = vmatmul.msk.bf16.gmra.mxu0 %vm253_vm4, %v1032_v62  ;;  %2240 = vmatmul.msk.bf16.gmra.mxu1 %vm253_vm4, %v1032_v62 }
 0xca0   :  { %2237 = vmatmul.msk.bf16.gmra.mxu0 %vm253_vm4, %v1033_v38  ;;  %2241 = vmatmul.msk.bf16.gmra.mxu1 %vm253_vm4, %v1033_v38 }
 0xcb0   :  { %2238 = vmatmul.msk.bf16.gmra.mxu0 %vm253_vm4, %v1034_v12  ;;  %2242 = vmatmul.msk.bf16.gmra.mxu1 %vm253_vm4, %v1034_v12 }
 0xcfd   :  { %v1101_v4 = vpop.f32.mrf.mxu0  ;;  %v1130_v8 = vpop.f32.mrf.mxu1 }
 0xcfe   :  { %v3286_v55 = vadd.f32 %v1101_v4, %v1036_v35  ;;  %v3288_v50 = vadd.f32 %v1130_v8, %v1037_v18 }
 0xd05   :  { %v1103_v24 = vpop.f32.mrf.mxu0  ;;  %v1132_v57 = vpop.f32.mrf.mxu1 }
 0xd06   :  { %v3214_v16 = vadd.f32 %v1103_v24, %v1036_v35  ;;  %v3216_v63 = vadd.f32 %v1132_v57, %v1037_v18 }
 0xd0d   :  { %v1106_v7 = vpop.f32.mrf.mxu0  ;;  %v1135_v56 = vpop.f32.mrf.mxu1 }
 0xd0e   :  { %v3218_v13 = vadd.f32 %v1106_v7, %v1036_v35  ;;  %v3220_v25 = vadd.f32 %v1135_v56, %v1037_v18 }
 0xd15   :  { %v1108_v27 = vpop.f32.mrf.mxu0  ;;  %v1137_v39 = vpop.f32.mrf.mxu1 }
 0xd16   :  { %v3222_v40 = vadd.f32 %v1108_v27, %v1036_v35  ;;  %v3224_v20 = vadd.f32 %v1137_v39, %v1037_v18 }
 0xd1d   :  { %v1111_v19 = vpop.f32.mrf.mxu0  ;;  %v1140_v51 = vpop.f32.mrf.mxu1 }
 0xd1e   :  { %v3226_v52 = vadd.f32 %v1111_v19, %v1036_v35  ;;  %v3228_v9 = vadd.f32 %v1140_v51, %v1037_v18 }
 0xd20   :  { %v1488_v15 = vsel %vm2810_vm10, %v3222_v40, %v3226_v52  ;;  %v1489_v47 = vsel %vm2814_vm11, %v3224_v20, %v3228_v9  ;;  %v1583_v14 = vsel %vm2810_vm10, %v3226_v52, %v3222_v40  ;;  %v1584_v30 = vsel %vm2814_vm11, %v3228_v9, %v3224_v20 }
 0xd25   :  { %v1113_v45 = vpop.f32.mrf.mxu0  ;;  %v1142_v29 = vpop.f32.mrf.mxu1 }
 0xd26   :  { %v3246_v37 = vadd.f32 %v1113_v45, %v1036_v35  ;;  %v3248_v41 = vadd.f32 %v1142_v29, %v1037_v18 }
 0xd28   :  { %v1393_v49 = vsel %vm2810_vm10, %v3218_v13, %v3246_v37  ;;  %v1394_v59 = vsel %vm2814_vm11, %v3220_v25, %v3248_v41  ;;  %v1678_v33 = vsel %vm2810_vm10, %v3246_v37, %v3218_v13  ;;  %v1679_v53 = vsel %vm2814_vm11, %v3248_v41, %v3220_v25 }
 0xd2d   :  { %v1116_v42 = vpop.f32.mrf.mxu0  ;;  %v1145_v46 = vpop.f32.mrf.mxu1 }
 0xd2e   :  { %v3266_v44 = vadd.f32 %v1116_v42, %v1036_v35  ;;  %v3268_v58 = vadd.f32 %v1145_v46, %v1037_v18 }
 0xd30   :  { %v1298_v0 = vsel %vm2810_vm10, %v3214_v16, %v3266_v44  ;;  %v1299_v28 = vsel %vm2814_vm11, %v3216_v63, %v3268_v58  ;;  %v1773_v36 = vsel %vm2810_vm10, %v3266_v44, %v3214_v16  ;;  %v1774_v3 = vsel %vm2814_vm11, %v3268_v58, %v3216_v63 }
 0xd35   :  { %v1118_v62 = vpop.f32.mrf.mxu0  ;;  %v1147_v6 = vpop.f32.mrf.mxu1 }
 0xd36   :  { %v3290_v32 = vadd.f32 %v1118_v62, %v1036_v35  ;;  %v3292_v38 = vadd.f32 %v1147_v6, %v1037_v18 }
 0xd38   :  { %v1170_v34 = vsel %vm2810_vm10, %v3286_v55, %v3290_v32  ;;  %v1868_v23 = vsel %vm2810_vm10, %v3290_v32, %v3286_v55  ;;  %v1869_v12 = vsel %vm2814_vm11, %v3292_v38, %v3288_v50  ;;  %v1171_v18 = vsel %vm2814_vm11, %v3288_v50, %v3292_v38 }
 0xd39   :  { %v1238_v4 = vadd.f32 %v1221_v1, %v1170_v34  ;;  %v1239_v57 = vadd.f32 %v1234_v60, %v1171_v18 }
 0xd3b   :  { %v2275_v8 = vmul.f32 -1.442695, %v1238_v4  ;;  %v2276_v42 = vmul.f32 -1.442695, %v1239_v57 }
 0xd3d   :  { %2453 = vpow2.f32 %v2275_v8 }
 0xd43   :  { %v2454_v11 = vpop.eup %2453 }
 0xd44   :  { %v1243_v35 = vadd.f32 1.0, %v2454_v11 }
 0xd46   :  { %2455 = vrcp.f32 %v1243_v35  ;;  %v1255_v27 = vand.u32 2147483648, %v1243_v35  ;;  %v1253_v48 = vand.u32 2147483647, %v1243_v35  ;;  %vm1249_vm14 = vweird.f32 %v1243_v35 }
 0xd47   :  { %2457 = vtanh.f32 %v1239_v57 }
 0xd48   :  { %v1256_v19 = vor.u32 1.1754944e-38, %v1255_v27  ;;  %vm1254_vm2 = vcmp.eq.f32.partialorder %v1253_v48, 8.507059e+37  ;;  %2459 = vpow2.f32 %v2276_v42 }
 0xd4c   :  { %v2456_v24 = vpop.eup %2455 }
 0xd4d   :  { %v1245_v7 = vmul.f32 %v2456_v24, %v1243_v35  ;;  %vm1250_vm13 = vweird.f32 %v2456_v24  ;;  %v2458_v21 = vpop.eup %2457 }
 0xd4e   :  { %vm1251_vm1 = vmor %vm1249_vm14, %vm1250_vm13  ;;  %v2460_v60 = vpop.eup %2459 }
 0xd4f   :  { %v1246_v56 = vsub.f32 1.0, %v1245_v7  ;;  %v1263_v46 = vadd.f32 1.0, %v2460_v60 }
 0xd51   :  { %v1247_v39 = vmul.f32 %v2456_v24, %v1246_v56  ;;  %2461 = vrcp.f32 %v1263_v46  ;;  %vm1269_vm5 = vweird.f32 %v1263_v46  ;;  %v1273_v7 = vand.u32 2147483647, %v1263_v46 }
 0xd53   :  { %v1248_v1 = vadd.f32 %v2456_v24, %v1247_v39  ;;  %vm1274_vm7 = vcmp.eq.f32.partialorder %v1273_v7, 8.507059e+37 }
 0xd55   :  { %v1252_v51 = vsel %vm1251_vm1, %v2456_v24, %v1248_v1  ;;  %v1275_v24 = vand.u32 2147483648, %v1263_v46 }
 0xd56   :  { %v1257_v45 = vsel %vm1254_vm2, %v1256_v19, %v1252_v51 }
 0xd57   :  { %v1280_v29 = vmul.f32 %v2458_v21, %v1257_v45  ;;  %v2462_v62 = vpop.eup %2461  ;;  %v1279_v8 = vmul.f32 0.0, %v1257_v45  ;;  %v1276_v56 = vor.u32 1.1754944e-38, %v1275_v24 }
 0xd58   :  { %v1265_v6 = vmul.f32 %v2462_v62, %v1263_v46  ;;  %vm1270_vm3 = vweird.f32 %v2462_v62 }
 0xd59   :  { %1282 = vrot.lane.b32.xlu2 %v1280_v29, %s2597_s0  ;;  %vm1271_vm6 = vmor %vm1269_vm5, %vm1270_vm3 }
 0xd5a   :  { %v1266_v34 = vsub.f32 1.0, %v1265_v6 }
 0xd5c   :  { %v1267_v4 = vmul.f32 %v2462_v62, %v1266_v34 }
 0xd5e   :  { %v1268_v18 = vadd.f32 %v2462_v62, %v1267_v4 }
 0xd60   :  { %v1272_v57 = vsel %vm1271_vm6, %v2462_v62, %v1268_v18 }
 0xd61   :  { %v1277_v39 = vsel %vm1274_vm7, %v1276_v56, %v1272_v57 }
 0xdb3   :  { %v1283_v11 = vpop.permute.xlu2 %1282 }
 0xdb4   :  { %v3311_v35 = vadd.f32 %v1283_v11, %v1279_v8 }
 0xdb6   :  { %2463 = vtanh.f32 %v3311_v35 }
 0xdbc   :  { %v2464_v27 = vpop.eup %2463 }
 0xdbd   :  { %v3314_v48 = vmul.f32 %v2464_v27, %v1277_v39 }
 0xdbf   :  { %v1300_v1 = vpack.c.bf16 %v3314_v48, %v3314_v48 }
 0xdc1   :  { %1302 = vrot.lane.b32.xlu0 %v1300_v1, %s2597_s0 }
 0xe33   :  { %v1303_v19 = vpop.permute.xlu0 %1302 }
 0xe34   :  { %2277 = vmatmul.msk.bf16.vlgmr.msrb.gmra.mxu2 %vm253_vm4, %v1303_v19  ;;  %2278 = vmatmul.msk.bf16.vlgmr.msrb.gmra.mxu3 %vm253_vm4, %v1303_v19 }
 0xe35   :  { %1501 = vmatpush.bf16.msrb.mxu2 %v3141_v54  ;;  %1514 = vmatpush.bf16.msrb.mxu3 %v3156_v22 }
 0xe39   :  { %1502 = vmatpush.bf16.msrb.mxu2 %v3151_v43  ;;  %1515 = vmatpush.bf16.msrb.mxu3 %v3160_v61 }
 0xe3d   :  { %1503 = vmatpush.bf16.msrb.mxu2 %v3154_v10  ;;  %1516 = vmatpush.bf16.msrb.mxu3 %v3168_v26 }
 0xe41   :  { %1504 = vmatpush.bf16.msrb.mxu2 %v3164_v31  ;;  %1517 = vmatpush.bf16.msrb.mxu3 %v3182_v17 }
 0xeb7   :  { %v1316_v51 = vpop.f32.mrf.mxu2  ;;  %v1329_v21 = vpop.f32.mrf.mxu3 }
 0xeb8   :  { %v1333_v45 = vadd.f32 %v1316_v51, %v1298_v0  ;;  %v1334_v34 = vadd.f32 %v1329_v21, %v1299_v28 }
 0xeba   :  { %v2279_v29 = vmul.f32 -1.442695, %v1333_v45  ;;  %v2280_v1 = vmul.f32 -1.442695, %v1334_v34 }
 0xebc   :  { %2465 = vpow2.f32 %v2279_v29 }
 0xebf   :  { %v1318_v42 = vpop.f32.mrf.mxu2  ;;  %v1331_v60 = vpop.f32.mrf.mxu3 }
 0xec2   :  { %v2466_v46 = vpop.eup %2465 }
 0xec3   :  { %v1338_v62 = vadd.f32 1.0, %v2466_v46 }
 0xec5   :  { %2467 = vrcp.f32 %v1338_v62  ;;  %v1350_v11 = vand.u32 2147483648, %v1338_v62  ;;  %v1348_v0 = vand.u32 2147483647, %v1338_v62  ;;  %vm1344_vm9 = vweird.f32 %v1338_v62 }
 0xec6   :  { %2469 = vtanh.f32 %v1334_v34 }
 0xec7   :  { %v1351_v7 = vor.u32 1.1754944e-38, %v1350_v11  ;;  %vm1349_vm13 = vcmp.eq.f32.partialorder %v1348_v0, 8.507059e+37  ;;  %2471 = vpow2.f32 %v2280_v1 }
 0xecb   :  { %v2468_v6 = vpop.eup %2467 }
 0xecc   :  { %v1340_v4 = vmul.f32 %v2468_v6, %v1338_v62  ;;  %vm1345_vm8 = vweird.f32 %v2468_v6  ;;  %v2470_v56 = vpop.eup %2469 }
 0xecd   :  { %vm1346_vm12 = vmor %vm1344_vm9, %vm1345_vm8  ;;  %v2472_v28 = vpop.eup %2471 }
 0xece   :  { %v1341_v8 = vsub.f32 1.0, %v1340_v4  ;;  %v1358_v19 = vadd.f32 1.0, %v2472_v28 }
 0xed0   :  { %v1342_v18 = vmul.f32 %v2468_v6, %v1341_v8  ;;  %2473 = vrcp.f32 %v1358_v19  ;;  %vm1364_vm1 = vweird.f32 %v1358_v19  ;;  %v1368_v34 = vand.u32 2147483647, %v1358_v19 }
 0xed2   :  { %v1343_v24 = vadd.f32 %v2468_v6, %v1342_v18  ;;  %vm1369_vm3 = vcmp.eq.f32.partialorder %v1368_v34, 8.507059e+37 }
 0xed4   :  { %v1347_v57 = vsel %vm1346_vm12, %v2468_v6, %v1343_v24  ;;  %v1370_v6 = vand.u32 2147483648, %v1358_v19 }
 0xed5   :  { %v1352_v27 = vsel %vm1349_vm13, %v1351_v7, %v1347_v57 }
 0xed6   :  { %v1375_v39 = vmul.f32 %v2470_v56, %v1352_v27  ;;  %v2474_v51 = vpop.eup %2473  ;;  %v1374_v42 = vmul.f32 %v1352_v27, %v3311_v35  ;;  %v1371_v8 = vor.u32 1.1754944e-38, %v1370_v6 }
 0xed7   :  { %v1360_v21 = vmul.f32 %v2474_v51, %v1358_v19  ;;  %vm1365_vm14 = vweird.f32 %v2474_v51 }
 0xed8   :  { %1377 = vrot.lane.b32.xlu1 %v1375_v39, %s2597_s0  ;;  %vm1366_vm2 = vmor %vm1364_vm1, %vm1365_vm14 }
 0xed9   :  { %v1361_v45 = vsub.f32 1.0, %v1360_v21 }
 0xedb   :  { %v1362_v29 = vmul.f32 %v2474_v51, %v1361_v45 }
 0xedd   :  { %v1363_v62 = vadd.f32 %v2474_v51, %v1362_v29 }
 0xedf   :  { %v1367_v4 = vsel %vm1366_vm2, %v2474_v51, %v1363_v62 }
 0xee0   :  { %v1372_v18 = vsel %vm1369_vm3, %v1371_v8, %v1367_v4 }
 0xf4a   :  { %v1378_v60 = vpop.permute.xlu1 %1377 }
 0xf4b   :  { %v3341_v46 = vadd.f32 %v1378_v60, %v1374_v42 }
 0xf4d   :  { %2475 = vtanh.f32 %v3341_v46 }
 0xf53   :  { %v2476_v11 = vpop.eup %2475 }
 0xf54   :  { %v3344_v0 = vmul.f32 %v2476_v11, %v1372_v18 }
 0xf56   :  { %v1395_v35 = vpack.c.bf16 %v3344_v0, %v3344_v0 }
 0xf58   :  { %1397 = vrot.lane.b32.xlu2 %v1395_v35, %s2597_s0 }
 0xfb2   :  { %v1398_v24 = vpop.permute.xlu2 %1397 }
 0xfb3   :  { %2281 = vmatmul.msk.bf16.vlgmr.msra.gmra.mxu2 %vm253_vm4, %v1398_v24  ;;  %2282 = vmatmul.msk.bf16.vlgmr.msra.gmra.mxu3 %vm253_vm4, %v1398_v24 }
 0xfb4   :  { %1691 = vmatpush.bf16.msra.mxu2 %v3141_v54  ;;  %1704 = vmatpush.bf16.msra.mxu3 %v3156_v22 }
 0xfb8   :  { %1692 = vmatpush.bf16.msra.mxu2 %v3151_v43  ;;  %1705 = vmatpush.bf16.msra.mxu3 %v3160_v61 }
 0xfbc   :  { %1693 = vmatpush.bf16.msra.mxu2 %v3154_v10  ;;  %1706 = vmatpush.bf16.msra.mxu3 %v3168_v26 }
 0xfc0   :  { %1694 = vmatpush.bf16.msra.mxu2 %v3164_v31  ;;  %1707 = vmatpush.bf16.msra.mxu3 %v3182_v17 }
0x1036   :  { %v1411_v7 = vpop.f32.mrf.mxu2  ;;  %v1424_v57 = vpop.f32.mrf.mxu3 }
0x1037   :  { %v1428_v56 = vadd.f32 %v1411_v7, %v1393_v49  ;;  %v1429_v21 = vadd.f32 %v1424_v57, %v1394_v59 }
0x1039   :  { %v2283_v27 = vmul.f32 -1.442695, %v1428_v56  ;;  %v2284_v18 = vmul.f32 -1.442695, %v1429_v21 }
0x103b   :  { %2477 = vpow2.f32 %v2283_v27 }
0x103e   :  { %v1413_v39 = vpop.f32.mrf.mxu2  ;;  %v1426_v1 = vpop.f32.mrf.mxu3 }
0x1041   :  { %v2478_v28 = vpop.eup %2477 }
0x1042   :  { %v1433_v19 = vadd.f32 1.0, %v2478_v28 }
0x1044   :  { %2479 = vrcp.f32 %v1433_v19  ;;  %v1445_v42 = vand.u32 2147483648, %v1433_v19  ;;  %v1443_v49 = vand.u32 2147483647, %v1433_v19  ;;  %vm1439_vm6 = vweird.f32 %v1433_v19 }
0x1045   :  { %2481 = vtanh.f32 %v1429_v21 }
0x1046   :  { %v1446_v6 = vor.u32 1.1754944e-38, %v1445_v42  ;;  %vm1444_vm8 = vcmp.eq.f32.partialorder %v1443_v49, 8.507059e+37  ;;  %2483 = vpow2.f32 %v2284_v18 }
0x104a   :  { %v2480_v51 = vpop.eup %2479 }
0x104b   :  { %v1435_v45 = vmul.f32 %v2480_v51, %v1433_v19  ;;  %vm1440_vm5 = vweird.f32 %v2480_v51  ;;  %v2482_v4 = vpop.eup %2481 }
0x104c   :  { %vm1441_vm7 = vmor %vm1439_vm6, %vm1440_vm5  ;;  %v2484_v59 = vpop.eup %2483 }
0x104d   :  { %v1436_v29 = vsub.f32 1.0, %v1435_v45  ;;  %v1453_v35 = vadd.f32 1.0, %v2484_v59 }
0x104f   :  { %v1437_v60 = vmul.f32 %v2480_v51, %v1436_v29  ;;  %2485 = vrcp.f32 %v1453_v35  ;;  %v1465_v19 = vand.u32 2147483648, %v1453_v35  ;;  %vm1459_vm12 = vweird.f32 %v1453_v35 }
0x1051   :  { %v1438_v62 = vadd.f32 %v2480_v51, %v1437_v60  ;;  %v1466_v45 = vor.u32 1.1754944e-38, %v1465_v19 }
0x1053   :  { %v1442_v34 = vsel %vm1441_vm7, %v2480_v51, %v1438_v62  ;;  %v1463_v51 = vand.u32 2147483647, %v1453_v35 }
0x1054   :  { %v1447_v8 = vsel %vm1444_vm8, %v1446_v6, %v1442_v34 }
0x1055   :  { %v1470_v11 = vmul.f32 %v2482_v4, %v1447_v8  ;;  %v2486_v24 = vpop.eup %2485  ;;  %v1469_v27 = vmul.f32 %v1447_v8, %v3341_v46  ;;  %vm1464_vm14 = vcmp.eq.f32.partialorder %v1463_v51, 8.507059e+37 }
0x1056   :  { %v1455_v7 = vmul.f32 %v2486_v24, %v1453_v35  ;;  %vm1460_vm9 = vweird.f32 %v2486_v24 }
0x1057   :  { %1472 = vrot.lane.b32.xlu0 %v1470_v11, %s2597_s0  ;;  %vm1461_vm13 = vmor %vm1459_vm12, %vm1460_vm9 }
0x1058   :  { %v1456_v57 = vsub.f32 1.0, %v1455_v7 }
0x105a   :  { %v1457_v56 = vmul.f32 %v2486_v24, %v1456_v57 }
0x105c   :  { %v1458_v28 = vadd.f32 %v2486_v24, %v1457_v56 }
0x105e   :  { %v1462_v21 = vsel %vm1461_vm13, %v2486_v24, %v1458_v28 }
0x105f   :  { %v1467_v42 = vsel %vm1464_vm14, %v1466_v45, %v1462_v21 }
0x10c9   :  { %v1473_v39 = vpop.permute.xlu0 %1472 }
0x10ca   :  { %v3371_v1 = vadd.f32 %v1473_v39, %v1469_v27 }
0x10cc   :  { %2487 = vtanh.f32 %v3371_v1 }
0x10d2   :  { %v2488_v29 = vpop.eup %2487 }
0x10d3   :  { %v3374_v60 = vmul.f32 %v2488_v29, %v1467_v42 }
0x10d5   :  { %v1490_v46 = vpack.c.bf16 %v3374_v60, %v3374_v60 }
0x10d7   :  { %1492 = vrot.lane.b32.xlu1 %v1490_v46, %s2597_s0 }
0x1149   :  { %v1493_v49 = vpop.permute.xlu1 %1492 }
0x114a   :  { %2285 = vmatmul.msk.bf16.vlgmr.msrb.gmra.mxu2 %vm253_vm4, %v1493_v49  ;;  %2286 = vmatmul.msk.bf16.vlgmr.msrb.gmra.mxu3 %vm253_vm4, %v1493_v49 }
0x114b   :  { %1881 = vmatpush.bf16.msrb.mxu2 %v3141_v54  ;;  %1894 = vmatpush.bf16.msrb.mxu3 %v3156_v22 }
0x114f   :  { %1882 = vmatpush.bf16.msrb.mxu2 %v3151_v43  ;;  %1895 = vmatpush.bf16.msrb.mxu3 %v3160_v61 }
0x1153   :  { %1883 = vmatpush.bf16.msrb.mxu2 %v3154_v10  ;;  %1896 = vmatpush.bf16.msrb.mxu3 %v3168_v26 }
0x1157   :  { %1884 = vmatpush.bf16.msrb.mxu2 %v3164_v31  ;;  %1897 = vmatpush.bf16.msrb.mxu3 %v3182_v17 }
0x11cd   :  { %v1506_v62 = vpop.f32.mrf.mxu2  ;;  %v1519_v6 = vpop.f32.mrf.mxu3 }
0x11ce   :  { %v1523_v54 = vadd.f32 %v1506_v62, %v1488_v15  ;;  %v1524_v31 = vadd.f32 %v1519_v6, %v1489_v47 }
0x11d0   :  { %v2287_v22 = vmul.f32 -1.442695, %v1523_v54  ;;  %v2288_v56 = vmul.f32 -1.442695, %v1524_v31 }
0x11d2   :  { %2489 = vpow2.f32 %v2287_v22 }
0x11d5   :  { %v1508_v43 = vpop.f32.mrf.mxu2  ;;  %v1521_v61 = vpop.f32.mrf.mxu3 }
0x11d8   :  { %v2490_v34 = vpop.eup %2489 }
0x11d9   :  { %v1528_v10 = vadd.f32 1.0, %v2490_v34 }
0x11db   :  { %2491 = vrcp.f32 %v1528_v10  ;;  %v1540_v8 = vand.u32 2147483648, %v1528_v10  ;;  %v1538_v15 = vand.u32 2147483647, %v1528_v10  ;;  %vm1534_vm2 = vweird.f32 %v1528_v10 }
0x11dc   :  { %2493 = vtanh.f32 %v1524_v31 }
0x11dd   :  { %v1541_v59 = vor.u32 1.1754944e-38, %v1540_v8  ;;  %vm1539_vm5 = vcmp.eq.f32.partialorder %v1538_v15, 8.507059e+37  ;;  %2495 = vpow2.f32 %v2288_v56 }
0x11e1   :  { %v2492_v26 = vpop.eup %2491 }
0x11e2   :  { %v1530_v17 = vmul.f32 %v2492_v26, %v1528_v10  ;;  %vm1535_vm1 = vweird.f32 %v2492_v26  ;;  %v2494_v24 = vpop.eup %2493 }
0x11e3   :  { %vm1536_vm3 = vmor %vm1534_vm2, %vm1535_vm1  ;;  %v2496_v47 = vpop.eup %2495 }
0x11e4   :  { %v1531_v4 = vsub.f32 1.0, %v1530_v17  ;;  %v1548_v27 = vadd.f32 1.0, %v2496_v47 }
0x11e6   :  { %v1532_v11 = vmul.f32 %v2492_v26, %v1531_v4  ;;  %2497 = vrcp.f32 %v1548_v27  ;;  %v1560_v46 = vand.u32 2147483648, %v1548_v27  ;;  %vm1554_vm7 = vweird.f32 %v1548_v27 }
0x11e7   :  { %v1558_v49 = vand.u32 2147483647, %v1548_v27 }
0x11e8   :  { %v1533_v18 = vadd.f32 %v2492_v26, %v1532_v11  ;;  %v1561_v6 = vor.u32 1.1754944e-38, %v1560_v46 }
0x11e9   :  { %vm1559_vm9 = vcmp.eq.f32.partialorder %v1558_v49, 8.507059e+37 }
0x11ea   :  { %v1537_v35 = vsel %vm1536_vm3, %v2492_v26, %v1533_v18 }
0x11eb   :  { %v1542_v7 = vsel %vm1539_vm5, %v1541_v59, %v1537_v35 }
0x11ec   :  { %v1565_v57 = vmul.f32 %v2494_v24, %v1542_v7  ;;  %v2498_v39 = vpop.eup %2497  ;;  %v1564_v21 = vmul.f32 %v1542_v7, %v3371_v1 }
0x11ed   :  { %v1550_v28 = vmul.f32 %v2498_v39, %v1548_v27  ;;  %vm1555_vm6 = vweird.f32 %v2498_v39 }
0x11ee   :  { %1567 = vrot.lane.b32.xlu2 %v1565_v57, %s2597_s0  ;;  %vm1556_vm8 = vmor %vm1554_vm7, %vm1555_vm6 }
0x11ef   :  { %v1551_v19 = vsub.f32 1.0, %v1550_v28 }
0x11f1   :  { %v1552_v51 = vmul.f32 %v2498_v39, %v1551_v19 }
0x11f3   :  { %v1553_v42 = vadd.f32 %v2498_v39, %v1552_v51 }
0x11f5   :  { %v1557_v62 = vsel %vm1556_vm8, %v2498_v39, %v1553_v42 }
0x11f6   :  { %v1562_v22 = vsel %vm1559_vm9, %v1561_v6, %v1557_v62 }
0x1248   :  { %v1568_v45 = vpop.permute.xlu2 %1567 }
0x1249   :  { %v1570_v29 = vadd.f32 %v1568_v45, %v1564_v21 }
0x124b   :  { %2499 = vtanh.f32 %v1570_v29 }
0x1251   :  { %v2500_v54 = vpop.eup %2499 }
0x1252   :  { %v3401_v43 = vmul.f32 %v2500_v54, %v1562_v22 }
0x1254   :  { %v1585_v61 = vpack.c.bf16 %v3401_v43, %v3401_v43 }
0x1256   :  { %1587 = vrot.lane.b32.xlu0 %v1585_v61, %s2597_s0 }
0x12c8   :  { %v1588_v1 = vpop.permute.xlu0 %1587 }
0x12c9   :  { %2289 = vmatmul.msk.bf16.vlgmr.msra.gmra.mxu0 %vm253_vm4, %v1588_v1  ;;  %2290 = vmatmul.msk.bf16.vlgmr.msra.gmra.mxu1 %vm253_vm4, %v1588_v1 }
0x1346   :  { %v1601_v34 = vpop.f32.mrf.mxu0  ;;  %v1614_v10 = vpop.f32.mrf.mxu1 }
0x1347   :  { %v1618_v26 = vadd.f32 %v1601_v34, %v1583_v14  ;;  %v1619_v18 = vadd.f32 %v1614_v10, %v1584_v30 }
0x1349   :  { %v2291_v31 = vmul.f32 -1.442695, %v1618_v26  ;;  %v2292_v20 = vmul.f32 -1.442695, %v1619_v18 }
0x134b   :  { %2501 = vpow2.f32 %v2291_v31 }
0x134e   :  { %v1603_v17 = vpop.f32.mrf.mxu0  ;;  %v1616_v4 = vpop.f32.mrf.mxu1 }
0x1351   :  { %v2502_v8 = vpop.eup %2501 }
0x1352   :  { %v1623_v11 = vadd.f32 1.0, %v2502_v8 }
0x1354   :  { %2503 = vrcp.f32 %v1623_v11  ;;  %v1635_v24 = vand.u32 2147483648, %v1623_v11  ;;  %v1633_v52 = vand.u32 2147483647, %v1623_v11  ;;  %vm1629_vm13 = vweird.f32 %v1623_v11 }
0x1355   :  { %2505 = vtanh.f32 %v1619_v18 }
0x1356   :  { %v1636_v7 = vor.u32 1.1754944e-38, %v1635_v24  ;;  %vm1634_vm1 = vcmp.eq.f32.partialorder %v1633_v52, 8.507059e+37  ;;  %2507 = vpow2.f32 %v2292_v20 }
0x135a   :  { %v2504_v15 = vpop.eup %2503 }
0x135b   :  { %v1625_v59 = vmul.f32 %v2504_v15, %v1623_v11  ;;  %vm1630_vm12 = vweird.f32 %v2504_v15  ;;  %v2506_v56 = vpop.eup %2505 }
0x135c   :  { %vm1631_vm14 = vmor %vm1629_vm13, %vm1630_vm12  ;;  %v2508_v9 = vpop.eup %2507 }
0x135d   :  { %v1626_v35 = vsub.f32 1.0, %v1625_v59  ;;  %v1643_v30 = vadd.f32 1.0, %v2508_v9 }
0x135f   :  { %v1627_v40 = vmul.f32 %v2504_v15, %v1626_v35  ;;  %2509 = vrcp.f32 %v1643_v30  ;;  %v1655_v49 = vand.u32 2147483648, %v1643_v30  ;;  %vm1649_vm3 = vweird.f32 %v1643_v30 }
0x1360   :  { %v1653_v62 = vand.u32 2147483647, %v1643_v30 }
0x1361   :  { %v1628_v14 = vadd.f32 %v2504_v15, %v1627_v40  ;;  %v1656_v54 = vor.u32 1.1754944e-38, %v1655_v49 }
0x1362   :  { %vm1654_vm6 = vcmp.eq.f32.partialorder %v1653_v62, 8.507059e+37 }
0x1363   :  { %v1632_v57 = vsel %vm1631_vm14, %v2504_v15, %v1628_v14 }
0x1364   :  { %v1637_v47 = vsel %vm1634_vm1, %v1636_v7, %v1632_v57 }
0x1365   :  { %v1660_v27 = vmul.f32 %v2506_v56, %v1637_v47  ;;  %v2510_v39 = vpop.eup %2509  ;;  %v1659_v21 = vmul.f32 %v1637_v47, %v1570_v29 }
0x1366   :  { %v1645_v28 = vmul.f32 %v2510_v39, %v1643_v30  ;;  %vm1650_vm2 = vweird.f32 %v2510_v39 }
0x1367   :  { %1662 = vrot.lane.b32.xlu1 %v1660_v27, %s2597_s0  ;;  %vm1651_vm5 = vmor %vm1649_vm3, %vm1650_vm2 }
0x1368   :  { %v1646_v19 = vsub.f32 1.0, %v1645_v28 }
0x136a   :  { %v1647_v51 = vmul.f32 %v2510_v39, %v1646_v19 }
0x136c   :  { %v1648_v46 = vadd.f32 %v2510_v39, %v1647_v51 }
0x136e   :  { %v1652_v6 = vsel %vm1651_vm5, %v2510_v39, %v1648_v46 }
0x136f   :  { %v1657_v61 = vsel %vm1654_vm6, %v1656_v54, %v1652_v6 }
0x13d9   :  { %v1663_v45 = vpop.permute.xlu1 %1662 }
0x13da   :  { %v1665_v42 = vadd.f32 %v1663_v45, %v1659_v21 }
0x13dc   :  { %2511 = vtanh.f32 %v1665_v42 }
0x13e2   :  { %v2512_v22 = vpop.eup %2511 }
0x13e3   :  { %v3419_v1 = vmul.f32 %v2512_v22, %v1657_v61 }
0x13e5   :  { %v1680_v34 = vpack.c.bf16 %v3419_v1, %v3419_v1 }
0x13e7   :  { %1682 = vrot.lane.b32.xlu2 %v1680_v34, %s2597_s0 }
0x1441   :  { %v1683_v29 = vpop.permute.xlu2 %1682 }
0x1442   :  { %2293 = vmatmul.msk.bf16.vlgmr.msra.gmra.mxu2 %vm253_vm4, %v1683_v29  ;;  %2294 = vmatmul.msk.bf16.vlgmr.msra.gmra.mxu3 %vm253_vm4, %v1683_v29 }
0x14c5   :  { %v1696_v10 = vpop.f32.mrf.mxu2  ;;  %v1709_v26 = vpop.f32.mrf.mxu3 }
0x14c6   :  { %v1713_v31 = vadd.f32 %v1696_v10, %v1678_v33  ;;  %v1714_v59 = vadd.f32 %v1709_v26, %v1679_v53 }
0x14c8   :  { %v2295_v17 = vmul.f32 -1.442695, %v1713_v31  ;;  %v2296_v25 = vmul.f32 -1.442695, %v1714_v59 }
0x14ca   :  { %2513 = vpow2.f32 %v2295_v17 }
0x14cd   :  { %v1698_v4 = vpop.f32.mrf.mxu2  ;;  %v1711_v8 = vpop.f32.mrf.mxu3 }
0x14d0   :  { %v2514_v11 = vpop.eup %2513 }
0x14d1   :  { %v1718_v15 = vadd.f32 1.0, %v2514_v11 }
0x14d3   :  { %2515 = vrcp.f32 %v1718_v15  ;;  %v1730_v40 = vand.u32 2147483648, %v1718_v15  ;;  %v1728_v37 = vand.u32 2147483647, %v1718_v15  ;;  %vm1724_vm8 = vweird.f32 %v1718_v15 }
0x14d4   :  { %2517 = vtanh.f32 %v1714_v59 }
0x14d5   :  { %v1731_v52 = vor.u32 1.1754944e-38, %v1730_v40  ;;  %vm1729_vm12 = vcmp.eq.f32.partialorder %v1728_v37, 8.507059e+37  ;;  %2519 = vpow2.f32 %v2296_v25 }
0x14d9   :  { %v2516_v18 = vpop.eup %2515 }
0x14da   :  { %v1720_v35 = vmul.f32 %v2516_v18, %v1718_v15  ;;  %vm1725_vm7 = vweird.f32 %v2516_v18  ;;  %v2518_v7 = vpop.eup %2517 }
0x14db   :  { %vm1726_vm9 = vmor %vm1724_vm8, %vm1725_vm7  ;;  %v2520_v41 = vpop.eup %2519 }
0x14dc   :  { %v1721_v24 = vsub.f32 1.0, %v1720_v35  ;;  %v1738_v53 = vadd.f32 1.0, %v2520_v41 }
0x14de   :  { %v1722_v13 = vmul.f32 %v2516_v18, %v1721_v24  ;;  %2521 = vrcp.f32 %v1738_v53  ;;  %v1750_v51 = vand.u32 2147483648, %v1738_v53  ;;  %vm1744_vm14 = vweird.f32 %v1738_v53 }
0x14df   :  { %v1748_v21 = vand.u32 2147483647, %v1738_v53 }
0x14e0   :  { %v1723_v33 = vadd.f32 %v2516_v18, %v1722_v13  ;;  %v1751_v46 = vor.u32 1.1754944e-38, %v1750_v51 }
0x14e1   :  { %vm1749_vm2 = vcmp.eq.f32.partialorder %v1748_v21, 8.507059e+37 }
0x14e2   :  { %v1727_v14 = vsel %vm1726_vm9, %v2516_v18, %v1723_v33 }
0x14e3   :  { %v1732_v57 = vsel %vm1729_vm12, %v1731_v52, %v1727_v14 }
0x14e4   :  { %v1755_v56 = vmul.f32 %v2518_v7, %v1732_v57  ;;  %v2522_v47 = vpop.eup %2521  ;;  %v1754_v30 = vmul.f32 %v1732_v57, %v1665_v42 }
0x14e5   :  { %v1740_v27 = vmul.f32 %v2522_v47, %v1738_v53  ;;  %vm1745_vm13 = vweird.f32 %v2522_v47 }
0x14e6   :  { %1757 = vrot.lane.b32.xlu0 %v1755_v56, %s2597_s0  ;;  %vm1746_vm1 = vmor %vm1744_vm14, %vm1745_vm13 }
0x14e7   :  { %v1741_v20 = vsub.f32 1.0, %v1740_v27 }
0x14e9   :  { %v1742_v9 = vmul.f32 %v2522_v47, %v1741_v20 }
0x14eb   :  { %v1743_v19 = vadd.f32 %v2522_v47, %v1742_v9 }
0x14ed   :  { %v1747_v45 = vsel %vm1746_vm1, %v2522_v47, %v1743_v19 }
0x14ee   :  { %v1752_v62 = vsel %vm1749_vm2, %v1751_v46, %v1747_v45 }
0x1558   :  { %v1758_v39 = vpop.permute.xlu0 %1757 }
0x1559   :  { %v1760_v28 = vadd.f32 %v1758_v39, %v1754_v30 }
0x155b   :  { %2523 = vtanh.f32 %v1760_v28 }
0x1561   :  { %v2524_v49 = vpop.eup %2523 }
0x1562   :  { %v3437_v6 = vmul.f32 %v2524_v49, %v1752_v62 }
0x1564   :  { %v1775_v54 = vpack.c.bf16 %v3437_v6, %v3437_v6 }
0x1566   :  { %1777 = vrot.lane.b32.xlu1 %v1775_v54, %s2597_s0 }
0x15d8   :  { %v1778_v42 = vpop.permute.xlu1 %1777 }
0x15d9   :  { %2297 = vmatmul.msk.bf16.vlgmr.msrb.gmra.mxu0 %vm253_vm4, %v1778_v42  ;;  %2298 = vmatmul.msk.bf16.vlgmr.msrb.gmra.mxu1 %vm253_vm4, %v1778_v42 }
0x1656   :  { %v1791_v22 = vpop.f32.mrf.mxu0  ;;  %v1804_v61 = vpop.f32.mrf.mxu1 }
0x1657   :  { %v1808_v34 = vadd.f32 %v1791_v22, %v1773_v36  ;;  %v1809_v8 = vadd.f32 %v1804_v61, %v1774_v3 }
0x1659   :  { %v2299_v29 = vmul.f32 -1.442695, %v1808_v34  ;;  %v2300_v63 = vmul.f32 -1.442695, %v1809_v8 }
0x165b   :  { %2525 = vpow2.f32 %v2299_v29 }
0x165e   :  { %v1793_v10 = vpop.f32.mrf.mxu0  ;;  %v1806_v26 = vpop.f32.mrf.mxu1 }
0x1661   :  { %v2526_v31 = vpop.eup %2525 }
0x1662   :  { %v1813_v17 = vadd.f32 1.0, %v2526_v31 }
0x1664   :  { %2527 = vrcp.f32 %v1813_v17  ;;  %v1825_v18 = vand.u32 2147483648, %v1813_v17  ;;  %v1823_v44 = vand.u32 2147483647, %v1813_v17  ;;  %vm1819_vm5 = vweird.f32 %v1813_v17 }
0x1665   :  { %2529 = vtanh.f32 %v1809_v8 }
0x1666   :  { %v1826_v59 = vor.u32 1.1754944e-38, %v1825_v18  ;;  %vm1824_vm7 = vcmp.eq.f32.partialorder %v1823_v44, 8.507059e+37  ;;  %2531 = vpow2.f32 %v2300_v63 }
0x166a   :  { %v2528_v4 = vpop.eup %2527 }
0x166b   :  { %v1815_v11 = vmul.f32 %v2528_v4, %v1813_v17  ;;  %vm1820_vm3 = vweird.f32 %v2528_v4  ;;  %v2530_v24 = vpop.eup %2529 }
0x166c   :  { %vm1821_vm6 = vmor %vm1819_vm5, %vm1820_vm3  ;;  %v2532_v58 = vpop.eup %2531 }
0x166d   :  { %v1816_v15 = vsub.f32 1.0, %v1815_v11  ;;  %v1833_v3 = vadd.f32 1.0, %v2532_v58  ;;  %v2355_v58 = vld [vmem:[%s3572_s7] ss:$0 sm:$0xff] }
0x166f   :  { %v1817_v16 = vmul.f32 %v2528_v4, %v1816_v15  ;;  %2533 = vrcp.f32 %v1833_v3  ;;  %v1845_v41 = vand.u32 2147483648, %v1833_v3  ;;  %vm1839_vm9 = vweird.f32 %v1833_v3 }
0x1671   :  { %v1818_v36 = vadd.f32 %v2528_v4, %v1817_v16  ;;  %v1846_v47 = vor.u32 1.1754944e-38, %v1845_v41 }
0x1673   :  { %v1822_v35 = vsel %vm1821_vm6, %v2528_v4, %v1818_v36 }
0x1674   :  { %v1827_v40 = vsel %vm1824_vm7, %v1826_v59, %v1822_v35 }
0x1675   :  { %v1850_v13 = vmul.f32 %v2530_v24, %v1827_v40  ;;  %v2534_v37 = vpop.eup %2533  ;;  %v1849_v7 = vmul.f32 %v1827_v40, %v1760_v28 }
0x1676   :  { %v1835_v33 = vmul.f32 %v2534_v37, %v1833_v3  ;;  %vm1840_vm8 = vweird.f32 %v2534_v37 }
0x1677   :  { %1852 = vrot.lane.b32.xlu2 %v1850_v13, %s2597_s0  ;;  %vm1841_vm12 = vmor %vm1839_vm9, %vm1840_vm8  ;;  %vm2126_vm9 = vcmask 31744  }
0x1678   :  { %v1836_v52 = vsub.f32 1.0, %v1835_v33 }
0x167a   :  { %v1837_v14 = vmul.f32 %v2534_v37, %v1836_v52 }
0x167c   :  { %v1838_v25 = vadd.f32 %v2534_v37, %v1837_v14 }
0x167e   :  { %v1842_v53 = vsel %vm1841_vm12, %v2534_v37, %v1838_v25 }
0x167f   :  { %1289 = vrot.lane.b32.xlu2 %v3314_v48, %s2597_s0  ;;  %v1843_v48 = vand.u32 2147483647, %v1833_v3 }
0x1681   :  { %vm1844_vm13 = vcmp.eq.f32.partialorder %v1843_v48, 8.507059e+37 }
0x1682   :  { %v1847_v9 = vsel %vm1844_vm13, %v1846_v47, %v1842_v53 }
0x16d1   :  { %v1853_v57 = vpop.permute.xlu2 %1852 }
0x16d2   :  { %v3457_v56 = vadd.f32 %v1853_v57, %v1849_v7 }
0x16d4   :  { %2535 = vtanh.f32 %v3457_v56 }
0x16d9   :  { %v1290_v27 = vpop.permute.xlu2 %1289 }
0x16da   :  { %v2536_v20 = vpop.eup %2535  ;;  %1292 = vst.msk [vmem:[#allocation3] sm:$0xff] %vm337_vm15, %v1290_v27 }
0x16db   :  { %1293 = vst.msk [vmem:[#allocation3 + $0x38] sm:$0xff] %vm339_vm0, %v1290_v27  ;;  %v1857_v30 = vmul.f32 %v2536_v20, %v1847_v9 }
0x16dd   :  { %v1870_v39 = vpack.c.bf16 %v1857_v30, %v1857_v30 }
0x16df   :  { %1872 = vrot.lane.b32.xlu0 %v1870_v39, %s2597_s0 }
0x16e7   :  { %1384 = vrot.lane.b32.xlu0 %v3344_v0, %s2597_s0 }
0x16ef   :  { %1479 = vrot.lane.b32.xlu0 %v3374_v60, %s2597_s0 }
0x16f7   :  { %1669 = vrot.lane.b32.xlu0 %v3419_v1, %s2597_s0 }
0x1751   :  { %v1873_v28 = vpop.permute.xlu0 %1872 }
0x1752   :  { %2301 = vmatmul.msk.bf16.vlgmr.msrb.gmra.mxu2 %vm253_vm4, %v1873_v28  ;;  %2302 = vmatmul.msk.bf16.vlgmr.msrb.gmra.mxu3 %vm253_vm4, %v1873_v28 }
0x1759   :  { %v1385_v19 = vpop.permute.xlu0 %1384 }
0x175a   :  { %1387 = vst.msk [vmem:[#allocation3 + $0x8] sm:$0xff] %vm337_vm15, %v1385_v19 }
0x175b   :  { %1388 = vst.msk [vmem:[#allocation3 + $0x30] sm:$0xff] %vm339_vm0, %v1385_v19 }
0x1761   :  { %v1480_v51 = vpop.permute.xlu0 %1479 }
0x1762   :  { %1482 = vst.msk [vmem:[#allocation3 + $0x10] sm:$0xff] %vm337_vm15, %v1480_v51 }
0x1763   :  { %1483 = vst.msk [vmem:[#allocation3 + $0x28] sm:$0xff] %vm339_vm0, %v1480_v51 }
0x1769   :  { %v1670_v53 = vpop.permute.xlu0 %1669 }
0x17d5   :  { %v1886_v0 = vpop.f32.mrf.mxu2  ;;  %v1899_v60 = vpop.f32.mrf.mxu3 }
0x17d6   :  { %v1903_v1 = vadd.f32 %v1886_v0, %v1868_v23  ;;  %v1904_v42 = vadd.f32 %v1899_v60, %v1869_v12 }
0x17d8   :  { %v2303_v21 = vmul.f32 -1.442695, %v1903_v1  ;;  %v2304_v50 = vmul.f32 -1.442695, %v1904_v42 }
0x17da   :  { %2537 = vpow2.f32 %v2303_v21 }
0x17dd   :  { %v1888_v45 = vpop.f32.mrf.mxu2  ;;  %v1901_v46 = vpop.f32.mrf.mxu3 }
0x17e0   :  { %v2538_v49 = vpop.eup %2537 }
0x17e1   :  { %v1908_v62 = vadd.f32 1.0, %v2538_v49 }
0x17e3   :  { %2539 = vrcp.f32 %v1908_v62  ;;  %v1920_v61 = vand.u32 2147483648, %v1908_v62  ;;  %v1918_v32 = vand.u32 2147483647, %v1908_v62  ;;  %vm1914_vm14 = vweird.f32 %v1908_v62 }
0x17e4   :  { %2541 = vtanh.f32 %v1904_v42 }
0x17e5   :  { %v1921_v34 = vor.u32 1.1754944e-38, %v1920_v61  ;;  %vm1919_vm2 = vcmp.eq.f32.partialorder %v1918_v32, 8.507059e+37  ;;  %2543 = vpow2.f32 %v2304_v50 }
0x17e9   :  { %v2540_v54 = vpop.eup %2539 }
0x17ea   :  { %v1910_v22 = vmul.f32 %v2540_v54, %v1908_v62  ;;  %vm1915_vm10 = vweird.f32 %v2540_v54  ;;  %v2542_v10 = vpop.eup %2541 }
0x17eb   :  { %vm1916_vm1 = vmor %vm1914_vm14, %vm1915_vm10  ;;  %v2544_v38 = vpop.eup %2543 }
0x17ec   :  { %v1911_v2 = vsub.f32 1.0, %v1910_v22  ;;  %v1928_v12 = vadd.f32 1.0, %v2544_v38 }
0x17ee   :  { %v1912_v55 = vmul.f32 %v2540_v54, %v1911_v2  ;;  %2545 = vrcp.f32 %v1928_v12  ;;  %v1940_v44 = vand.u32 2147483648, %v1928_v12  ;;  %vm1934_vm3 = vweird.f32 %v1928_v12 }
0x17ef   :  { %v1938_v36 = vand.u32 2147483647, %v1928_v12 }
0x17f0   :  { %v1913_v23 = vadd.f32 %v2540_v54, %v1912_v55  ;;  %v1941_v59 = vor.u32 1.1754944e-38, %v1940_v44 }
0x17f1   :  { %vm1939_vm6 = vcmp.eq.f32.partialorder %v1938_v36, 8.507059e+37  ;;  %v2348_v36 = vld [vmem:[%s3573_s8 + $0x10] sm:$0xff] }
0x17f2   :  { %v1917_v29 = vsel %vm1916_vm1, %v2540_v54, %v1913_v23 }
0x17f3   :  { %v1922_v26 = vsel %vm1919_vm2, %v1921_v34, %v1917_v29 }
0x17f4   :  { %v1945_v5 = vmul.f32 %v2542_v10, %v1922_v26  ;;  %v2546_v31 = vpop.eup %2545  ;;  %v1944_v11 = vmul.f32 %v1922_v26, %v3457_v56 }
0x17f5   :  { %v1930_v17 = vmul.f32 %v2546_v31, %v1928_v12  ;;  %vm1935_vm11 = vweird.f32 %v2546_v31 }
0x17f6   :  { %1947 = vrot.lane.b32.xlu1 %v1945_v5, %s2597_s0  ;;  %vm1936_vm5 = vmor %vm1934_vm3, %vm1935_vm11 }
0x17f7   :  { %v1931_v4 = vsub.f32 1.0, %v1930_v17 }
0x17f9   :  { %v1932_v8 = vmul.f32 %v2546_v31, %v1931_v4 }
0x17fb   :  { %v1933_v16 = vadd.f32 %v2546_v31, %v1932_v8 }
0x17fe   :  { %1859 = vrot.lane.b32.xlu1 %v1857_v30, %s2597_s0 }
0x1806   :  { %1764 = vrot.lane.b32.xlu1 %v3437_v6, %s2597_s0  ;;  %v1937_v6 = vsel %vm1936_vm5, %v2546_v31, %v1933_v16 }
0x1807   :  { %v1942_v40 = vsel %vm1939_vm6, %v1941_v59, %v1937_v6 }
0x1868   :  { %v1948_v15 = vpop.permute.xlu1 %1947 }
0x1869   :  { %v1950_v18 = vadd.f32 %v1948_v15, %v1944_v11  ;;  %v2349_v11 = vld [vmem:[%s3573_s8 + $0x18] sm:$0xff] }
0x186a   :  { %2117 = vmatpush.bf16.msra.mxu0 %v2349_v11 }
0x186b   :  { %2547 = vtanh.f32 %v1950_v18 }
0x186e   :  { %2118 = vmatpush.bf16.msra.mxu0 %v2348_v36 }
0x1870   :  { %v1860_v35 = vpop.permute.xlu1 %1859 }
0x1871   :  { %v2548_v24 = vpop.eup %2547  ;;  %1862 = vst.msk [vmem:[#allocation3 + $0x30] sm:$0xff] %vm337_vm15, %v1860_v35 }
0x1872   :  { %1863 = vst.msk [vmem:[#allocation3 + $0x8] sm:$0xff] %vm339_vm0, %v1860_v35  ;;  %v1952_v13 = vmul.f32 %v2548_v24, %v1942_v40 }
0x1874   :  { %1954 = vrot.lane.b32.xlu2 %v1952_v13, %s2597_s0 }
0x1878   :  { %v1765_v63 = vpop.permute.xlu1 %1764  ;;  %v3504_v52 = vld [vmem:[#allocation3 + $0x30] sm:$0xff] }
0x1879   :  { %1767 = vst.msk [vmem:[#allocation3 + $0x28] sm:$0xff] %vm337_vm15, %v1765_v63  ;;  %v1977_v14 = vmul.f32 %v2355_v58, %v3504_v52  ;;  %v3508_v57 = vld [vmem:[#allocation3 + $0x8] sm:$0xff] }
0x187a   :  { %1768 = vst.msk [vmem:[#allocation3 + $0x10] sm:$0xff] %vm339_vm0, %v1765_v63  ;;  %v2347_v63 = vld [vmem:[%s3573_s8 + $0x8] sm:$0xff] }
0x187b   :  { %v1997_v7 = vsel %vm253_vm4, %v1977_v14, 0.0  ;;  %2119 = vmatpush.bf16.msra.mxu0 %v2347_v63 }
0x187c   :  { %1574 = vrot.lane.b32.xlu2 %v3401_v43, %s2597_s0  ;;  %v1972_v43 = vmul.f32 %v2355_v58, %v3508_v57 }
0x187e   :  { %v1982_v56 = vsel %vm253_vm4, %v1972_v43, 0.0  ;;  %v2346_v43 = vld [vmem:[%s3573_s8] sm:$0xff] }
0x187f   :  { %2120 = vmatpush.bf16.msra.mxu0 %v2346_v43 }
0x1880   :  { %v3532_v0 = vld [vmem:[#allocation3 + $0x28] sm:$0xff] }
0x1881   :  { %v3500_v3 = vld [vmem:[#allocation3 + $0x10] sm:$0xff]  ;;  %v1976_v1 = vmul.f32 %v2355_v58, %v3532_v0 }
0x1882   :  { %v1973_v37 = vmul.f32 %v2355_v58, %v3500_v3 }
0x1883   :  { %v1994_v45 = vsel %vm253_vm4, %v1976_v1, 0.0 }
0x1884   :  { %v1985_v33 = vsel %vm253_vm4, %v1973_v37, 0.0 }
0x1885   :  { %1986 = vadd.xlane.f32.xlu0 %v1985_v33 }
0x188d   :  { %1998 = vadd.xlane.f32.xlu0 %v1997_v7 }
0x18a5   :  { %1983 = vadd.xlane.f32.xlu2 %v1982_v56 }
0x18ce   :  { %v1955_v25 = vpop.permute.xlu2 %1954 }
0x18cf   :  { %1957 = vst.msk [vmem:[#allocation3 + $0x38] sm:$0xff] %vm337_vm15, %v1955_v25 }
0x18d0   :  { %1958 = vst.msk [vmem:[#allocation3] sm:$0xff] %vm339_vm0, %v1955_v25 }
0x18d6   :  { %v1575_v41 = vpop.permute.xlu2 %1574  ;;  %v3530_v51 = vld [vmem:[#allocation3 + $0x38] sm:$0xff] }
0x18d7   :  { %1577 = vst.msk [vmem:[#allocation3 + $0x18] sm:$0xff] %vm337_vm15, %v1575_v41  ;;  %v3515_v48 = vld [vmem:[#allocation3] sm:$0xff]  ;;  %v1978_v60 = vmul.f32 %v2355_v58, %v3530_v51 }
0x18d8   :  { %1578 = vst.msk [vmem:[#allocation3 + $0x20] sm:$0xff] %vm339_vm0, %v1575_v41  ;;  %v1971_v47 = vmul.f32 %v2355_v58, %v3515_v48 }
0x18d9   :  { %1672 = vst.msk [vmem:[#allocation3 + $0x20] sm:$0xff] %vm337_vm15, %v1670_v53  ;;  %v2000_v21 = vsel %vm253_vm4, %v1978_v60, 0.0 }
0x18da   :  { %1673 = vst.msk [vmem:[#allocation3 + $0x18] sm:$0xff] %vm339_vm0, %v1670_v53  ;;  %v1979_v27 = vsel %vm253_vm4, %v1971_v47, 0.0 }
0x18db   :  { %1980 = vadd.xlane.f32.xlu1 %v1979_v27 }
0x18e0   :  { %v3522_v20 = vld [vmem:[#allocation3 + $0x20] sm:$0xff] }
0x18e1   :  { %v1975_v9 = vmul.f32 %v2355_v58, %v3522_v20  ;;  %v3525_v30 = vld [vmem:[#allocation3 + $0x18] sm:$0xff] }
0x18e2   :  { %v1974_v39 = vmul.f32 %v2355_v58, %v3525_v30 }
0x18e3   :  { %v1991_v28 = vsel %vm253_vm4, %v1975_v9, 0.0 }
0x18e4   :  { %1992 = vadd.xlane.f32.xlu1 %v1991_v28  ;;  %v1988_v19 = vsel %vm253_vm4, %v1974_v39, 0.0 }
0x18e5   :  { %1989 = vadd.xlane.f32.xlu2 %v1988_v19 }
0x18ec   :  { %2001 = vadd.xlane.f32.xlu1 %v2000_v21 }
0x18ed   :  { %1995 = vadd.xlane.f32.xlu2 %v1994_v45 }
0x18f8   :  { %v1987_v54 = vpop.xlane.xlu0 %1986 }
0x1900   :  { %v1999_v34 = vpop.xlane.xlu0 %1998 }
0x1918   :  { %v1984_v46 = vpop.xlane.xlu2 %1983 }
0x194e   :  { %v1981_v49 = vpop.xlane.xlu1 %1980 }
0x194f   :  { %v2003_v62 = vmax.f32 %v1981_v49, %v1984_v46 }
0x1951   :  { %v2004_v22 = vmax.f32 %v2003_v62, %v1987_v54 }
0x1957   :  { %v1993_v2 = vpop.xlane.xlu1 %1992 }
0x1958   :  { %v1990_v42 = vpop.xlane.xlu2 %1989 }
0x1959   :  { %v2005_v61 = vmax.f32 %v2004_v22, %v1990_v42 }
0x195b   :  { %v2006_v55 = vmax.f32 %v2005_v61, %v1993_v2 }
0x195f   :  { %v2002_v10 = vpop.xlane.xlu1 %2001 }
0x1960   :  { %v1996_v32 = vpop.xlane.xlu2 %1995 }
0x1961   :  { %v2007_v23 = vmax.f32 %v2006_v55, %v1996_v32 }
0x1963   :  { %v2008_v29 = vmax.f32 %v2007_v23, %v1999_v34 }
0x1965   :  { %v2009_v26 = vmax.f32 %v2008_v29, %v2002_v10 }
0x1967   :  { %v2010_v5 = vsub.f32 %v1981_v49, %v2009_v26  ;;  %v2016_v50 = vsub.f32 %v1984_v46, %v2009_v26  ;;  %v2022_v38 = vsub.f32 %v1987_v54, %v2009_v26  ;;  %v2028_v12 = vsub.f32 %v1990_v42, %v2009_v26 }
0x1968   :  { %v2034_v8 = vsub.f32 %v1993_v2, %v2009_v26  ;;  %v2040_v18 = vsub.f32 %v1996_v32, %v2009_v26  ;;  %v2046_v44 = vsub.f32 %v1999_v34, %v2009_v26  ;;  %v2052_v59 = vsub.f32 %v2002_v10, %v2009_v26 }
0x1969   :  { %v2011_v31 = vmul.f32 1.442695, %v2010_v5  ;;  %v2017_v17 = vmul.f32 1.442695, %v2016_v50  ;;  %v2023_v4 = vmul.f32 1.442695, %v2022_v38 }
0x196a   :  { %v2029_v15 = vmul.f32 1.442695, %v2028_v12  ;;  %v2035_v16 = vmul.f32 1.442695, %v2034_v8  ;;  %v2041_v6 = vmul.f32 1.442695, %v2040_v18 }
0x196b   :  { %2549 = vpow2.f32 %v2011_v31  ;;  %v2047_v40 = vmul.f32 1.442695, %v2046_v44  ;;  %v2053_v14 = vmul.f32 1.442695, %v2052_v59 }
0x196c   :  { %2551 = vpow2.f32 %v2017_v17 }
0x196d   :  { %2553 = vpow2.f32 %v2023_v4 }
0x196e   :  { %2555 = vpow2.f32 %v2029_v15 }
0x196f   :  { %2557 = vpow2.f32 %v2035_v16 }
0x1970   :  { %2559 = vpow2.f32 %v2041_v6 }
0x1971   :  { %v2550_v35 = vpop.eup %2549  ;;  %2561 = vpow2.f32 %v2047_v40 }
0x1972   :  { %v2552_v24 = vpop.eup %2551  ;;  %v2014_v37 = vmul.f32 %v2550_v35, %v3515_v48  ;;  %2563 = vpow2.f32 %v2053_v14 }
0x1973   :  { %v2019_v13 = vadd.f32 %v2552_v24, %v2550_v35  ;;  %v2554_v58 = vpop.eup %2553  ;;  %v2020_v33 = vmul.f32 %v2552_v24, %v3508_v57 }
0x1974   :  { %v2556_v56 = vpop.eup %2555  ;;  %v2026_v48 = vmul.f32 %v2554_v58, %v3500_v3 }
0x1975   :  { %v2025_v7 = vadd.f32 %v2554_v58, %v2019_v13  ;;  %v2558_v41 = vpop.eup %2557  ;;  %v2021_v53 = vadd.f32 %v2020_v33, %v2014_v37  ;;  %v2032_v60 = vmul.f32 %v2556_v56, %v3525_v30 }
0x1976   :  { %v2560_v27 = vpop.eup %2559  ;;  %v2038_v45 = vmul.f32 %v2558_v41, %v3522_v20 }
0x1977   :  { %v2031_v25 = vadd.f32 %v2556_v56, %v2025_v7  ;;  %v2562_v9 = vpop.eup %2561  ;;  %v2027_v39 = vadd.f32 %v2026_v48, %v2021_v53  ;;  %v2044_v49 = vmul.f32 %v2560_v27, %v3532_v0 }
0x1978   :  { %v2564_v19 = vpop.eup %2563  ;;  %v2050_v3 = vmul.f32 %v2562_v9, %v3504_v52  ;;  %v2356_v52 = vld [vmem:[%s3574_s9] ss:$0 sm:$0xff] }
0x1979   :  { %v2037_v47 = vadd.f32 %v2558_v41, %v2031_v25  ;;  %v2033_v21 = vadd.f32 %v2032_v60, %v2027_v39  ;;  %v2056_v30 = vmul.f32 %v2564_v19, %v3530_v51 }
0x197b   :  { %v2043_v57 = vadd.f32 %v2560_v27, %v2037_v47  ;;  %v2039_v46 = vadd.f32 %v2038_v45, %v2033_v21 }
0x197d   :  { %v2049_v28 = vadd.f32 %v2562_v9, %v2043_v57  ;;  %v2045_v54 = vadd.f32 %v2044_v49, %v2039_v46 }
0x197f   :  { %v2055_v1 = vadd.f32 %v2564_v19, %v2049_v28  ;;  %v2051_v61 = vadd.f32 %v2050_v3, %v2045_v54 }
0x1981   :  { %2565 = vrcp.f32 %v2055_v1  ;;  %v2069_v2 = vand.u32 2147483648, %v2055_v1  ;;  %v2067_v32 = vand.u32 2147483647, %v2055_v1  ;;  %vm2063_vm0 = vweird.f32 %v2055_v1 }
0x1982   :  { %v2057_v34 = vadd.f32 %v2056_v30, %v2051_v61 }
0x1983   :  { %v2070_v20 = vor.u32 1.1754944e-38, %v2069_v2  ;;  %vm2068_vm8 = vcmp.eq.f32.partialorder %v2067_v32, 8.507059e+37 }
0x1987   :  { %v2566_v62 = vpop.eup %2565 }
0x1988   :  { %v2059_v42 = vmul.f32 %v2566_v62, %v2055_v1  ;;  %vm2064_vm15 = vweird.f32 %v2566_v62 }
0x1989   :  { %vm2065_vm7 = vmor %vm2063_vm0, %vm2064_vm15 }
0x198a   :  { %v2060_v22 = vsub.f32 1.0, %v2059_v42 }
0x198c   :  { %v2061_v55 = vmul.f32 %v2566_v62, %v2060_v22 }
0x198e   :  { %v2062_v23 = vadd.f32 %v2566_v62, %v2061_v55 }
0x1990   :  { %v2066_v29 = vsel %vm2065_vm7, %v2566_v62, %v2062_v23 }
0x1991   :  { %v2071_v0 = vsel %vm2068_vm8, %v2070_v20, %v2066_v29 }
0x1992   :  { %v2072_v10 = vmul.f32 %v2071_v0, %v2057_v34 }
0x1994   :  { %v2073_v26 = vpack.c.bf16 %v2072_v10, %v2072_v10 }
0x1996   :  { %2321 = vmatmul.msk.bf16.vlgmr.msra.gmra.mxu0 %vm253_vm4, %v2073_v26 }
0x1a13   :  { %v2122_v5 = vpop.f32.mrf.mxu0 }
0x1a14   :  { %v2123_v50 = vadd.f32 %v2356_v52, %v2122_v5 }
0x1a16   :  { %2127 = vst.msk [vmem:[%s3575_s10] sm:$0xff] %vm2126_vm9, %v2123_v50 }
0x1a1b   :  { %v2124_v51 = vpop.f32.mrf.mxu0 }
0x1a1c   :  { %2132 = vsyncpa [#allocation5], 1 }

</bundles_post_ra>
